<compile_context>
chip_gen: v7x
topology: tpu7x:2x2x1
jax: 0.10.0
libtpu: 0.0.40
codegen_flags: <defaults>
</compile_context>

<pallas_src>
import jax
import jax.numpy as jnp
from jax import lax
from jax.experimental import pallas as pl
from jax.experimental.pallas import tpu as pltpu

NUM_SEM = 10   # stand-in for Tree.num_sem (not defined in the snippet)
EPS = 1e-5     # PyTorch GroupNorm default eps
_HI = lax.Precision.HIGHEST  # keep f32-accurate MXU matmuls (matches reference)


def make_decoder_kernel(B, F, H, C, S, G):
    """Build the kernel for fixed (static) sizes."""
    GS = F // G            # channels per GroupNorm group
    inv_gs = 1.0 / GS

    def kernel(x_ref, wp_ref, bp_ref, wex_ref, bex_ref, wsm_ref, bsm_ref,
               wcf_ref, bcf_ref, mg_ref, mgt_ref, gamma_ref, beta_ref,
               feats_ref, sem_ref, exists_ref):
        x = x_ref[...]                                                # [B, F]

        # mlp_parent + relu: one [B, F] @ [F, C*H] matmul.
        ph = jnp.dot(x, wp_ref[...], precision=_HI,
                     preferred_element_type=jnp.float32) + bp_ref[...]
        ph = jnp.maximum(ph, 0.0)                                     # [B, C*H]

        # Heads fused over all children via block-diagonal weights:
        # one matmul per head, output already lane-dense -> one store each.
        ex = jnp.dot(ph, wex_ref[...], precision=_HI,
                     preferred_element_type=jnp.float32) + bex_ref[...]   # [B, C]
        exists_ref[...] = ex.astype(exists_ref.dtype)

        sm = jnp.dot(ph, wsm_ref[...], precision=_HI,
                     preferred_element_type=jnp.float32) + bsm_ref[...]   # [B, C*S]
        sem_ref[...] = sm.astype(sem_ref.dtype)

        cf = jnp.dot(ph, wcf_ref[...], precision=_HI,
                     preferred_element_type=jnp.float32) + bcf_ref[...]   # [B, C*F]

        # Vectorized GroupNorm over all C*G groups at once.  Group reductions
        # and the broadcast back to channels are matmuls against a 0/1
        # membership matrix (MXU), so no per-group slicing / XLU reductions.
        mg = mg_ref[...]                                              # [C*F, C*G]
        mgt = mgt_ref[...]                                            # [C*G, C*F]
        mean = jnp.dot(cf, mg, precision=_HI,
                       preferred_element_type=jnp.float32) * inv_gs       # [B, C*G]
        mean_b = jnp.dot(mean, mgt, precision=_HI,
                         preferred_element_type=jnp.float32)              # [B, C*F]
        d = cf - mean_b
        var = jnp.dot(d * d, mg, precision=_HI,
                      preferred_element_type=jnp.float32) * inv_gs        # [B, C*G]
        inv = lax.rsqrt(var + EPS)                                        # [B, C*G]
        inv_b = jnp.dot(inv, mgt, precision=_HI,
                        preferred_element_type=jnp.float32)               # [B, C*F]

        out = jnp.maximum(d * inv_b * gamma_ref[...] + beta_ref[...], 0.0)
        feats_ref[...] = out.astype(feats_ref.dtype)

    return kernel


def _block_diag(w, C):
    """[H, N] -> [C*H, C*N] block-diagonal (one copy of w per child)."""
    H, N = w.shape
    eye = jnp.eye(C, dtype=w.dtype)
    return jnp.einsum("cd,hn->chdn", eye, w).reshape(C * H, C * N)


def concat_child_decoder(x, params, *, max_child_num, hidden_size, num_sem):
    """Pallas wrapper reproducing ConcatChildDecoder.forward."""
    B, F = x.shape
    H, C, S = hidden_size, max_child_num, num_sem
    G = min(32, F // 8)                                   # GroupNorm groups
    assert G >= 1 and F % G == 0, "feature_size must be divisible by num_groups"
    GS = F // G

    # Wrapper-side weight packing (one-time glue, no per-step compute).
    wex = _block_diag(params["we"], C)                    # [C*H, C]
    wsm = _block_diag(params["ws"], C)                    # [C*H, C*S]
    wcf = _block_diag(params["wc"], C)                    # [C*H, C*F]
    bex = jnp.tile(params["be"], (1, C))                  # [1, C]
    bsm = jnp.tile(params["bs"], (1, C))                  # [1, C*S]
    bcf = jnp.tile(params["bc"], (1, C))                  # [1, C*F]
    gamma_t = jnp.tile(params["gamma"], (1, C))           # [1, C*F]
    beta_t = jnp.tile(params["beta"], (1, C))             # [1, C*F]
    # 0/1 group membership: flat channel i (of C*F) belongs to group i // GS.
    mg = (jnp.arange(C * F)[:, None] // GS
          == jnp.arange(C * G)[None, :]).astype(jnp.float32)          # [C*F, C*G]
    mgt = mg.T                                                         # [C*G, C*F]

    kernel = make_decoder_kernel(B, F, H, C, S, G)
    vmem = pl.BlockSpec(memory_space=pltpu.MemorySpace.VMEM)
    inputs = (x, params["wp"], params["bp"], wex, bex, wsm, bsm,
              wcf, bcf, mg, mgt, gamma_t, beta_t)
    out_shapes = (jax.ShapeDtypeStruct((B, C * F), x.dtype),
                  jax.ShapeDtypeStruct((B, C * S), x.dtype),
                  jax.ShapeDtypeStruct((B, C), x.dtype))

    # TODO(synk): if B (or B*C) grows to hundreds of rows, add a grid over the
    # batch dim with dimension_semantics=("parallel",) to use both v7x cores,
    # sizing tiles against v7x's 64 MiB VMEM.
    feats_flat, sem_flat, exists_flat = pl.pallas_call(
        kernel,
        out_shape=out_shapes,
        in_specs=[vmem] * len(inputs),
        out_specs=(vmem, vmem, vmem),
    )(*inputs)

    child_feats = feats_flat.reshape(B, C, F)
    child_sem_logits = sem_flat.reshape(B, C, S)
    child_exists_logits = exists_flat.reshape(B, C, 1)
    return child_feats, child_sem_logits, child_exists_logits


def reference(x, p, *, max_child_num, hidden_size, num_sem):
    """Pure-JAX mirror of the PyTorch forward, for verification."""
    B, F = x.shape
    H, C, S = hidden_size, max_child_num, num_sem
    G = min(32, F // 8)
    GS = F // G
    ph = jax.nn.relu(jnp.dot(x, p["wp"], precision=_HI) + p["bp"][0])   # [B, C*H]
    hc = ph.reshape(B * C, H)
    ex = (jnp.dot(hc, p["we"], precision=_HI) + p["be"][0]).reshape(B, C, 1)
    sm = (jnp.dot(hc, p["ws"], precision=_HI) + p["bs"][0]).reshape(B, C, S)
    feat = jnp.dot(hc, p["wc"], precision=_HI) + p["bc"][0]             # [B*C, F]
    fg = feat.reshape(B * C, G, GS)
    mu = fg.mean(axis=2, keepdims=True)
    var = ((fg - mu) ** 2).mean(axis=2, keepdims=True)
    fn = ((fg - mu) / jnp.sqrt(var + EPS)).reshape(B * C, F)
    fn = fn * p["gamma"][0] + p["beta"][0]
    feats = jax.nn.relu(fn).reshape(B, C, F)
    return feats, sm, ex


if __name__ == "__main__":
    # small shapes consistent with the module
    B = 2                # batch
    FEATURE_SIZE = 32    # feature_size
    HIDDEN_SIZE = 32     # hidden_size
    MAX_CHILD = 8        # max_child_num
    S = NUM_SEM

    key = jax.random.PRNGKey(0)
    keys = jax.random.split(key, 10)

    def linear_params(kw, kb, fan_in, fan_out):
        bound = 1.0 / (fan_in ** 0.5)
        w = jax.random.uniform(kw, (fan_in, fan_out), jnp.float32, -bound, bound)
        b = jax.random.uniform(kb, (1, fan_out), jnp.float32, -bound, bound)
        return w, b

    wp, bp = linear_params(keys[0], keys[1], FEATURE_SIZE, HIDDEN_SIZE * MAX_CHILD)
    we, be = linear_params(keys[2], keys[3], HIDDEN_SIZE, 1)
    ws, bs = linear_params(keys[4], keys[5], HIDDEN_SIZE, S)
    wc, bc = linear_params(keys[6], keys[7], HIDDEN_SIZE, FEATURE_SIZE)
    # GroupNorm affine params: PyTorch defaults (weight=1, bias=0)
    gamma = jnp.ones((1, FEATURE_SIZE), jnp.float32)
    beta = jnp.zeros((1, FEATURE_SIZE), jnp.float32)

    params = dict(wp=wp, bp=bp, we=we, be=be, ws=ws, bs=bs,
                  wc=wc, bc=bc, gamma=gamma, beta=beta)

    x = jax.random.normal(keys[8], (B, FEATURE_SIZE), jnp.float32)

    feats, sem, exists = concat_child_decoder(
        x, params, max_child_num=MAX_CHILD, hidden_size=HIDDEN_SIZE, num_sem=S)
    jax.block_until_ready((feats, sem, exists))

    feats_ref, sem_ref, exists_ref = reference(
        x, params, max_child_num=MAX_CHILD, hidden_size=HIDDEN_SIZE, num_sem=S)

    assert feats.shape == (B, MAX_CHILD, FEATURE_SIZE)
    assert sem.shape == (B, MAX_CHILD, S)
    assert exists.shape == (B, MAX_CHILD, 1)
    assert jnp.allclose(feats, feats_ref, rtol=1e-4, atol=1e-4)
    assert jnp.allclose(sem, sem_ref, rtol=1e-4, atol=1e-4)
    assert jnp.allclose(exists, exists_ref, rtol=1e-4, atol=1e-4)

    print("KERNEL_OK")
</pallas_src>

<mosaic_0001>
module attributes {stable_mosaic.version = 11 : i64} {
  func.func @kernel(%arg0: memref<2x32xf32, #tpu.memory_space<vmem>>, %arg1: memref<32x256xf32, #tpu.memory_space<vmem>>, %arg2: memref<1x256xf32, #tpu.memory_space<vmem>>, %arg3: memref<256x8xf32, #tpu.memory_space<vmem>>, %arg4: memref<1x8xf32, #tpu.memory_space<vmem>>, %arg5: memref<256x80xf32, #tpu.memory_space<vmem>>, %arg6: memref<1x80xf32, #tpu.memory_space<vmem>>, %arg7: memref<256x256xf32, #tpu.memory_space<vmem>>, %arg8: memref<1x256xf32, #tpu.memory_space<vmem>>, %arg9: memref<256x32xf32, #tpu.memory_space<vmem>>, %arg10: memref<32x256xf32, #tpu.memory_space<vmem>>, %arg11: memref<1x256xf32, #tpu.memory_space<vmem>>, %arg12: memref<1x256xf32, #tpu.memory_space<vmem>>, %arg13: memref<2x256xf32, #tpu.memory_space<vmem>>, %arg14: memref<2x80xf32, #tpu.memory_space<vmem>>, %arg15: memref<2x8xf32, #tpu.memory_space<vmem>>) attributes {dimension_semantics = [], scalar_prefetch = 0 : i64, scratch_operands = 0 : i64, tpu.core_type = #tpu.core_type<tc>} {
    %c0 = arith.constant 0 : index
    %c0_0 = arith.constant 0 : index
    %0 = vector.load %arg0[%c0, %c0_0] : memref<2x32xf32, #tpu.memory_space<vmem>>, vector<2x32xf32>
    %c0_1 = arith.constant 0 : index
    %c0_2 = arith.constant 0 : index
    %1 = vector.load %arg1[%c0_1, %c0_2] : memref<32x256xf32, #tpu.memory_space<vmem>>, vector<32x256xf32>
    %cst = arith.constant dense<0.000000e+00> : vector<2x256xf32>
    %2 = tpu.matmul %0, %1, %cst {dimension_numbers = #tpu.dot_dimension_numbers<[1], [0], [0], [1], [0, 0, 1, 1], [], []>, precision = #tpu.contract_precision<fp32>} : vector<2x32xf32>, vector<32x256xf32>, vector<2x256xf32> -> vector<2x256xf32>
    %c0_3 = arith.constant 0 : index
    %c0_4 = arith.constant 0 : index
    %3 = vector.load %arg2[%c0_3, %c0_4] : memref<1x256xf32, #tpu.memory_space<vmem>>, vector<1x256xf32>
    %4 = vector.broadcast %3 : vector<1x256xf32> to vector<2x256xf32>
    %5 = arith.addf %2, %4 : vector<2x256xf32>
    %cst_5 = arith.constant 0.000000e+00 : f32
    %6 = vector.broadcast %cst_5 : f32 to vector<2x256xf32>
    %7 = arith.maximumf %5, %6 : vector<2x256xf32>
    %c0_6 = arith.constant 0 : index
    %c0_7 = arith.constant 0 : index
    %8 = vector.load %arg3[%c0_6, %c0_7] : memref<256x8xf32, #tpu.memory_space<vmem>>, vector<256x8xf32>
    %cst_8 = arith.constant dense<0.000000e+00> : vector<2x8xf32>
    %9 = tpu.matmul %7, %8, %cst_8 {dimension_numbers = #tpu.dot_dimension_numbers<[1], [0], [0], [1], [0, 0, 1, 1], [], []>, precision = #tpu.contract_precision<fp32>} : vector<2x256xf32>, vector<256x8xf32>, vector<2x8xf32> -> vector<2x8xf32>
    %c0_9 = arith.constant 0 : index
    %c0_10 = arith.constant 0 : index
    %10 = vector.load %arg4[%c0_9, %c0_10] : memref<1x8xf32, #tpu.memory_space<vmem>>, vector<1x8xf32>
    %11 = vector.broadcast %10 : vector<1x8xf32> to vector<2x8xf32>
    %12 = arith.addf %9, %11 : vector<2x8xf32>
    %c0_11 = arith.constant 0 : index
    %c0_12 = arith.constant 0 : index
    %13 = vector.load %arg15[%c0_11, %c0_12] : memref<2x8xf32, #tpu.memory_space<vmem>>, vector<2x8xf32>
    tpu.vector_store %arg15[%c0_11, %c0_12], %12 {strides = array<i32>} : memref<2x8xf32, #tpu.memory_space<vmem>>, vector<2x8xf32>,
    %c0_13 = arith.constant 0 : index
    %c0_14 = arith.constant 0 : index
    %14 = vector.load %arg5[%c0_13, %c0_14] : memref<256x80xf32, #tpu.memory_space<vmem>>, vector<256x80xf32>
    %cst_15 = arith.constant dense<0.000000e+00> : vector<2x80xf32>
    %15 = tpu.matmul %7, %14, %cst_15 {dimension_numbers = #tpu.dot_dimension_numbers<[1], [0], [0], [1], [0, 0, 1, 1], [], []>, precision = #tpu.contract_precision<fp32>} : vector<2x256xf32>, vector<256x80xf32>, vector<2x80xf32> -> vector<2x80xf32>
    %c0_16 = arith.constant 0 : index
    %c0_17 = arith.constant 0 : index
    %16 = vector.load %arg6[%c0_16, %c0_17] : memref<1x80xf32, #tpu.memory_space<vmem>>, vector<1x80xf32>
    %17 = vector.broadcast %16 : vector<1x80xf32> to vector<2x80xf32>
    %18 = arith.addf %15, %17 : vector<2x80xf32>
    %c0_18 = arith.constant 0 : index
    %c0_19 = arith.constant 0 : index
    %19 = vector.load %arg14[%c0_18, %c0_19] : memref<2x80xf32, #tpu.memory_space<vmem>>, vector<2x80xf32>
    tpu.vector_store %arg14[%c0_18, %c0_19], %18 {strides = array<i32>} : memref<2x80xf32, #tpu.memory_space<vmem>>, vector<2x80xf32>,
    %c0_20 = arith.constant 0 : index
    %c0_21 = arith.constant 0 : index
    %20 = vector.load %arg7[%c0_20, %c0_21] : memref<256x256xf32, #tpu.memory_space<vmem>>, vector<256x256xf32>
    %cst_22 = arith.constant dense<0.000000e+00> : vector<2x256xf32>
    %21 = tpu.matmul %7, %20, %cst_22 {dimension_numbers = #tpu.dot_dimension_numbers<[1], [0], [0], [1], [0, 0, 1, 1], [], []>, precision = #tpu.contract_precision<fp32>} : vector<2x256xf32>, vector<256x256xf32>, vector<2x256xf32> -> vector<2x256xf32>
    %c0_23 = arith.constant 0 : index
    %c0_24 = arith.constant 0 : index
    %22 = vector.load %arg8[%c0_23, %c0_24] : memref<1x256xf32, #tpu.memory_space<vmem>>, vector<1x256xf32>
    %23 = vector.broadcast %22 : vector<1x256xf32> to vector<2x256xf32>
    %24 = arith.addf %21, %23 : vector<2x256xf32>
    %c0_25 = arith.constant 0 : index
    %c0_26 = arith.constant 0 : index
    %25 = vector.load %arg9[%c0_25, %c0_26] : memref<256x32xf32, #tpu.memory_space<vmem>>, vector<256x32xf32>
    %c0_27 = arith.constant 0 : index
    %c0_28 = arith.constant 0 : index
    %26 = vector.load %arg10[%c0_27, %c0_28] : memref<32x256xf32, #tpu.memory_space<vmem>>, vector<32x256xf32>
    %cst_29 = arith.constant dense<0.000000e+00> : vector<2x32xf32>
    %27 = tpu.matmul %24, %25, %cst_29 {dimension_numbers = #tpu.dot_dimension_numbers<[1], [0], [0], [1], [0, 0, 1, 1], [], []>, precision = #tpu.contract_precision<fp32>} : vector<2x256xf32>, vector<256x32xf32>, vector<2x32xf32> -> vector<2x32xf32>
    %cst_30 = arith.constant 1.250000e-01 : f32
    %28 = vector.broadcast %cst_30 : f32 to vector<2x32xf32>
    %29 = arith.mulf %27, %28 : vector<2x32xf32>
    %cst_31 = arith.constant dense<0.000000e+00> : vector<2x256xf32>
    %30 = tpu.matmul %29, %26, %cst_31 {dimension_numbers = #tpu.dot_dimension_numbers<[1], [0], [0], [1], [0, 0, 1, 1], [], []>, precision = #tpu.contract_precision<fp32>} : vector<2x32xf32>, vector<32x256xf32>, vector<2x256xf32> -> vector<2x256xf32>
    %31 = arith.subf %24, %30 : vector<2x256xf32>
    %32 = arith.mulf %31, %31 : vector<2x256xf32>
    %cst_32 = arith.constant dense<0.000000e+00> : vector<2x32xf32>
    %33 = tpu.matmul %32, %25, %cst_32 {dimension_numbers = #tpu.dot_dimension_numbers<[1], [0], [0], [1], [0, 0, 1, 1], [], []>, precision = #tpu.contract_precision<fp32>} : vector<2x256xf32>, vector<256x32xf32>, vector<2x32xf32> -> vector<2x32xf32>
    %cst_33 = arith.constant 1.250000e-01 : f32
    %34 = vector.broadcast %cst_33 : f32 to vector<2x32xf32>
    %35 = arith.mulf %33, %34 : vector<2x32xf32>
    %cst_34 = arith.constant 9.99999974E-6 : f32
    %36 = vector.broadcast %cst_34 : f32 to vector<2x32xf32>
    %37 = arith.addf %35, %36 : vector<2x32xf32>
    %38 = math.rsqrt %37 : vector<2x32xf32>
    %cst_35 = arith.constant dense<0.000000e+00> : vector<2x256xf32>
    %39 = tpu.matmul %38, %26, %cst_35 {dimension_numbers = #tpu.dot_dimension_numbers<[1], [0], [0], [1], [0, 0, 1, 1], [], []>, precision = #tpu.contract_precision<fp32>} : vector<2x32xf32>, vector<32x256xf32>, vector<2x256xf32> -> vector<2x256xf32>
    %40 = arith.mulf %31, %39 : vector<2x256xf32>
    %c0_36 = arith.constant 0 : index
    %c0_37 = arith.constant 0 : index
    %41 = vector.load %arg11[%c0_36, %c0_37] : memref<1x256xf32, #tpu.memory_space<vmem>>, vector<1x256xf32>
    %42 = vector.broadcast %41 : vector<1x256xf32> to vector<2x256xf32>
    %43 = arith.mulf %40, %42 : vector<2x256xf32>
    %c0_38 = arith.constant 0 : index
    %c0_39 = arith.constant 0 : index
    %44 = vector.load %arg12[%c0_38, %c0_39] : memref<1x256xf32, #tpu.memory_space<vmem>>, vector<1x256xf32>
    %45 = vector.broadcast %44 : vector<1x256xf32> to vector<2x256xf32>
    %46 = arith.addf %43, %45 : vector<2x256xf32>
    %cst_40 = arith.constant 0.000000e+00 : f32
    %47 = vector.broadcast %cst_40 : f32 to vector<2x256xf32>
    %48 = arith.maximumf %46, %47 : vector<2x256xf32>
    %c0_41 = arith.constant 0 : index
    %c0_42 = arith.constant 0 : index
    %49 = vector.load %arg13[%c0_41, %c0_42] : memref<2x256xf32, #tpu.memory_space<vmem>>, vector<2x256xf32>
    tpu.vector_store %arg13[%c0_41, %c0_42], %48 {strides = array<i32>} : memref<2x256xf32, #tpu.memory_space<vmem>>, vector<2x256xf32>,
    return
  }
}

</mosaic_0001>

<bundles_post_ra>
// kernel: tpu_custom_call.1
= control target key start
LH: loop header
LB: loop body
LE: loop exit
PB: predicated region body
PF: predicated region fallthrough
CT: control target
= control target key end

     0   :  { %21 = vsyncpa [#allocation3], 0  ;;  %v12820_v9 = vmov 0.0   ;;  %vm70_vm0 = vcmask 261120   ;;  %s12803_s0 = inlined_call_operand.vmem [shape: f32[2,32], index: 0, kind: input, shape index: {}]   ;;  %s12804_s1 = inlined_call_operand.vmem [shape: f32[32,256], index: 1, kind: input, shape index: {}]   ;;  %s12805_s2 = inlined_call_operand.vmem [shape: f32[1,256], index: 2, kind: input, shape index: {}]   ;;  %s12806_s3 = inlined_call_operand.vmem [shape: f32[256,8], index: 3, kind: input, shape index: {}]   ;;  %s12807_s4 = inlined_call_operand.vmem [shape: f32[1,8], index: 4, kind: input, shape index: {}]   ;;  %s12808_s5 = inlined_call_operand.vmem [shape: f32[256,80], index: 5, kind: input, shape index: {}]   ;;  %s12809_s6 = inlined_call_operand.vmem [shape: f32[1,80], index: 6, kind: input, shape index: {}]   ;;  %s12810_s7 = inlined_call_operand.vmem [shape: f32[256,256], index: 7, kind: input, shape index: {}]   ;;  %s12811_s8 = inlined_call_operand.vmem [shape: f32[1,256], index: 8, kind: input, shape index: {}]   ;;  %s12812_s9 = inlined_call_operand.vmem [shape: f32[256,32], index: 9, kind: input, shape index: {}]   ;;  %s12813_s10 = inlined_call_operand.vmem [shape: f32[32,256], index: 10, kind: input, shape index: {}]   ;;  %s12814_s11 = inlined_call_operand.vmem [shape: f32[1,256], index: 11, kind: input, shape index: {}]   ;;  %s12815_s12 = inlined_call_operand.vmem [shape: f32[1,256], index: 12, kind: input, shape index: {}]   ;;  %s12816_s13 = inlined_call_operand.hbm [shape: f32[2,256], index: 13, kind: output, shape index: {0}]   ;;  %s12817_s14 = inlined_call_operand.hbm [shape: f32[2,80], index: 14, kind: output, shape index: {1}]   ;;  %s12818_s15 = inlined_call_operand.hbm [shape: f32[2,8], index: 15, kind: output, shape index: {2}]  }
   0x1   :  { %v51_v0 = vld [vmem:[%s12804_s1 + $0x8] sm:$0xff]  ;;  %v53_v1 = vld [vmem:[%s12804_s1 + $0x18] sm:$0xff]  ;;  %v50_v2 = vld [vmem:[%s12804_s1] sm:$0xff]  ;;  %146 = vmatprep.mubr.f32.mxu0 %v12820_v9 }
   0x2   :  { %v74_v3 = vand.u32 4294901760, %v51_v0  ;;  %v78_v4 = vand.u32 4294901760, %v53_v1  ;;  %v52_v5 = vld [vmem:[%s12804_s1 + $0x10] sm:$0xff]  ;;  %v76_v6 = vand.u32 4294901760, %v50_v2  ;;  %v55_v7 = vld [vmem:[%s12804_s1 + $0x28] sm:$0xff]  ;;  %v57_v8 = vld [vmem:[%s12804_s1 + $0x38] sm:$0xff] }
   0x3   :  { %v80_v10 = vand.u32 4294901760, %v52_v5  ;;  %v82_v11 = vand.u32 4294901760, %v55_v7  ;;  %v86_v12 = vand.u32 4294901760, %v57_v8  ;;  %v54_v13 = vld [vmem:[%s12804_s1 + $0x20] sm:$0xff]  ;;  %v56_v14 = vld [vmem:[%s12804_s1 + $0x30] sm:$0xff] }
   0x4   :  { %v9102_v15 = vpack.c.bf16 %v78_v4, %v74_v3  ;;  %v9104_v16 = vsub.f32 %v51_v0, %v74_v3  ;;  %v9106_v17 = vsub.f32 %v53_v1, %v78_v4  ;;  %v9108_v18 = vsub.f32 %v50_v2, %v76_v6  ;;  %v49_v19 = vld [vmem:[%s12803_s0] sm:$0x3] }
   0x5   :  { %v9113_v20 = vpack.c.bf16 %v80_v10, %v76_v6  ;;  %v9115_v21 = vsub.f32 %v52_v5, %v80_v10  ;;  %v9117_v22 = vpack.c.bf16 %v86_v12, %v82_v11  ;;  %v9119_v23 = vsub.f32 %v55_v7, %v82_v11 }
   0x6   :  { %7578 = vmatprep.subr.bf16.mxu0 %v9102_v15  ;;  %v9122_v24 = vsub.f32 %v57_v8, %v86_v12  ;;  %v84_v25 = vand.u32 4294901760, %v54_v13  ;;  %v88_v26 = vand.u32 4294901760, %v56_v14  ;;  %v72_v27 = vsel %vm70_vm0, %v49_v19, 0 }
   0x7   :  { %7580 = vmatpush1.bf16.msra.mxu0 %v9113_v20  ;;  %v9126_v28 = vand.u32 4294901760, %v72_v27  ;;  %v160_v29 = vand.u32 4294901760, %v9104_v16  ;;  %v172_v30 = vand.u32 4294901760, %v9106_v17  ;;  %v166_v31 = vand.u32 4294901760, %v9108_v18 }
   0x8   :  { %7582 = vmatprep.subr.bf16.mxu0 %v9117_v22  ;;  %v9132_v32 = vpack.c.bf16 %v88_v26, %v84_v25  ;;  %v9134_v33 = vsub.f32 %v54_v13, %v84_v25  ;;  %v9136_v34 = vsub.f32 %v56_v14, %v88_v26  ;;  %v178_v35 = vand.u32 4294901760, %v9115_v21 }
   0x9   :  { %v9140_v36 = vsub.f32 %v72_v27, %v9126_v28  ;;  %v161_v37 = vsub.f32 %v9104_v16, %v160_v29  ;;  %v173_v38 = vsub.f32 %v9106_v17, %v172_v30  ;;  %v167_v39 = vsub.f32 %v9108_v18, %v166_v31 }
   0xa   :  { %v179_v40 = vsub.f32 %v9115_v21, %v178_v35  ;;  %v184_v41 = vand.u32 4294901760, %v9119_v23  ;;  %v196_v42 = vand.u32 4294901760, %v9122_v24  ;;  %v190_v43 = vand.u32 4294901760, %v9134_v33 }
   0xb   :  { %7584 = vmatpush1.bf16.msra.mxu0 %v9132_v32  ;;  %v149_v44 = vand.u32 4294901760, %v9140_v36  ;;  %v162_v45 = vand.u32 4294901760, %v161_v37  ;;  %v174_v46 = vand.u32 4294901760, %v173_v38  ;;  %v168_v47 = vand.u32 4294901760, %v167_v39 }
   0xc   :  { %v180_v48 = vand.u32 4294901760, %v179_v40  ;;  %v185_v49 = vsub.f32 %v9119_v23, %v184_v41  ;;  %v197_v50 = vsub.f32 %v9122_v24, %v196_v42  ;;  %v191_v51 = vsub.f32 %v9134_v33, %v190_v43 }
   0xd   :  { %v150_v52 = vsub.f32 %v9140_v36, %v149_v44  ;;  %v7585_v53 = vpack.c.bf16 %v174_v46, %v162_v45  ;;  %v202_v54 = vand.u32 4294901760, %v9136_v34 }
   0xe   :  { %22 = vsyncpa [#allocation5], 0  ;;  %v7587_v55 = vpack.c.bf16 %v180_v48, %v168_v47  ;;  %v186_v56 = vand.u32 4294901760, %v185_v49  ;;  %v198_v57 = vand.u32 4294901760, %v197_v50  ;;  %v192_v59 = vand.u32 4294901760, %v191_v51  ;;  %v9179_v63 = vld [vmem:[%s12806_s3 + $0x80] sm:$0xff] }
   0xf   :  { %v151_v58 = vand.u32 4294901760, %v150_v52  ;;  %7586 = vmatprep.subr.bf16.mxu0 %v7585_v53  ;;  %v203_v60 = vsub.f32 %v9136_v34, %v202_v54  ;;  %v9184_v0 = vld [vmem:[%s12806_s3 + $0x88] sm:$0xff]  ;;  %v7593_v2 = vpack.c.bf16 %v9106_v17, %v9104_v16  ;;  %v9191_v3 = vld [vmem:[%s12806_s3] sm:$0xff]  ;;  %v707_v5 = vand.u32 4294901760, %v9179_v63  ;;  %v9203_v7 = vld [vmem:[%s12806_s3 + $0x90] sm:$0xff] }
  0x10   :  { %v7589_v61 = vpack.c.bf16 %v198_v57, %v186_v56  ;;  %v9196_v4 = vld [vmem:[%s12806_s3 + $0x8] sm:$0xff]  ;;  %v710_v6 = vand.u32 4294901760, %v9184_v0  ;;  %v9208_v8 = vld [vmem:[%s12806_s3 + $0x98] sm:$0xff]  ;;  %v7595_v10 = vpack.c.bf16 %v9115_v21, %v9108_v18  ;;  %v7597_v11 = vpack.c.bf16 %v9122_v24, %v9119_v23  ;;  %v9219_v14 = vld [vmem:[%s12806_s3 + $0x10] sm:$0xff] }
  0x11   :  { %152 = vmatmul.mubr.f32.vlgmr.msra.gmra.mrb[0].mxu0 %v151_v58  ;;  %v204_v62 = vand.u32 4294901760, %v203_v60  ;;  %v659_v12 = vand.u32 4294901760, %v9191_v3  ;;  %v662_v13 = vand.u32 4294901760, %v9196_v4  ;;  %v9224_v19 = vld [vmem:[%s12806_s3 + $0x18] sm:$0xff]  ;;  %v713_v26 = vand.u32 4294901760, %v9203_v7  ;;  %v9239_v37 = vld [vmem:[%s12806_s3 + $0xa0] sm:$0xff] }
  0x12   :  { %7588 = vmatpush1.bf16.msra.mxu0 %v7587_v55  ;;  %262 = vmatprep.mubr.f32.mxu0 %v12820_v9  ;;  %v9230_v25 = vpack.c.bf16 %v710_v6, %v707_v5  ;;  %v12819_v27 = vand.u32 4294901760, %v9208_v8  ;;  %v9244_v38 = vld [vmem:[%s12806_s3 + $0xa8] sm:$0xff]  ;;  %v7599_v40 = vpack.c.bf16 %v9136_v34, %v9134_v33  ;;  %v665_v45 = vand.u32 4294901760, %v9219_v14  ;;  %v9267_v48 = vld [vmem:[%s12806_s3 + $0x20] sm:$0xff]  ;;  %v9282_v53 = vld [vmem:[%s12806_s3 + $0xb0] sm:$0xff] }
  0x13   :  { %7590 = vmatprep.subr.bf16.mxu0 %v7589_v61  ;;  %v7591_v1 = vpack.c.bf16 %v204_v62, %v192_v59  ;;  %v9250_v39 = vpack.c.bf16 %v662_v13, %v659_v12  ;;  %v668_v46 = vand.u32 4294901760, %v9224_v19  ;;  %v9272_v49 = vld [vmem:[%s12806_s3 + $0x28] sm:$0xff]  ;;  %v719_v50 = vand.u32 4294901760, %v9239_v37  ;;  %v9287_v55 = vld [vmem:[%s12806_s3 + $0xb8] sm:$0xff]  ;;  %v9298_v59 = vld [vmem:[%s12806_s3 + $0x30] sm:$0xff] }
  0x14   :  { %13377 = vst [vmem:[#allocation9_spill] sm:$0xff] %v9230_v25  ;;  %7626 = vmatprep.subr.bf16.mxu1 %v9230_v25  ;;  %v9261_v47 = vpack.c.bf16 %v12819_v27, %v713_v26  ;;  %v722_v51 = vand.u32 4294901760, %v9244_v38  ;;  %v671_v56 = vand.u32 4294901760, %v9267_v48  ;;  %v674_v57 = vand.u32 4294901760, %v9272_v49  ;;  %v9303_v60 = vld [vmem:[%s12806_s3 + $0x38] sm:$0xff] }
  0x15   :  { %13378 = vst [vmem:[#allocation10_spill] sm:$0xff] %v9250_v39  ;;  %7628 = vmatpush3.bf16.msra.mxu1 %v9250_v39  ;;  %v9277_v52 = vpack.c.bf16 %v668_v46, %v665_v45  ;;  %v725_v61 = vand.u32 4294901760, %v9282_v53  ;;  %v728_v62 = vand.u32 4294901760, %v9287_v55  ;;  %v7611_v16 = vpack.c.bf16 %v178_v35, %v166_v31 }
  0x16   :  { %7592 = vmatpush1.bf16.msra.mxu0 %v7591_v1  ;;  %13379 = vst [vmem:[#allocation11_spill] sm:$0xff] %v9261_v47  ;;  %7630 = vmatprep.subr.bf16.mxu1 %v9261_v47  ;;  %v9291_v58 = vpack.c.bf16 %v722_v51, %v719_v50  ;;  %v9308_v1 = vpack.c.bf16 %v674_v57, %v671_v56  ;;  %v13388_v34 = vand.u32 4294901760, %v9208_v8  ;;  %vm1520_vm1 = vcmask 58368  }
  0x17   :  { %7594 = vmatprep.subr.bf16.mxu0 %v7593_v2  ;;  %13380 = vst [vmem:[#allocation12_spill] sm:$0xff] %v9277_v52  ;;  %v677_v2 = vand.u32 4294901760, %v9298_v59  ;;  %v7613_v17 = vpack.c.bf16 %v196_v42, %v184_v41  ;;  %v7615_v18 = vpack.c.bf16 %v202_v54, %v190_v43  ;;  %v9350_v21 = vsub.f32 %v9179_v63, %v707_v5 }
  0x18   :  { %13381 = vst [vmem:[#allocation13_spill] sm:$0xff] %v9291_v58  ;;  %13382 = vst [vmem:[#allocation14_spill] sm:$0xff] %v9308_v1  ;;  %v9355_v23 = vsub.f32 %v9184_v0, %v710_v6  ;;  %v9360_v24 = vsub.f32 %v9191_v3, %v659_v12  ;;  %v9373_v33 = vsub.f32 %v9203_v7, %v713_v26  ;;  %vm2423_vm2 = vcmask 648192  }
  0x19   :  { %264 = vmatmul.mubr.f32.vlgmr.msra.gmra.mrb[0].mxu0 %v9126_v28  ;;  %7632 = vmatpush3.bf16.msra.mxu1 %v9277_v52  ;;  %v9378_v35 = vsub.f32 %v9208_v8, %v13388_v34  ;;  %v9389_v42 = vsub.f32 %v9224_v19, %v668_v46  ;;  %v9392_v43 = vsub.f32 %v9239_v37, %v719_v50  ;;  %v9444_v37 = vld [vmem:[%s12806_s3 + $0x40] sm:$0xff] }
  0x1a   :  { %7596 = vmatpush1.bf16.msra.mxu0 %v7595_v10  ;;  %350 = vmatprep.mubr.f32.mxu0 %v12820_v9  ;;  %v680_v10 = vand.u32 4294901760, %v9303_v60  ;;  %13385 = vst [vmem:[#allocation17_spill] sm:$0xff] %v9360_v24  ;;  %v12844_v31 = vand.u32 4294901760, %v9355_v23  ;;  %13387 = vst [vmem:[#allocation19_spill] sm:$0xff] %v9373_v33  ;;  %v12833_v54 = vand.u32 4294901760, %v9373_v33  ;;  %v9405_v0 = vsub.f32 %v9267_v48, %v671_v56  ;;  %v9456_v48 = vld [vmem:[%s12806_s3 + $0xd0] sm:$0xff] }
  0x1b   :  { %7598 = vmatprep.subr.bf16.mxu0 %v7597_v11  ;;  %7634 = vmatprep.subr.bf16.mxu1 %v9291_v58  ;;  %v9315_v11 = vpack.c.bf16 %v728_v62, %v725_v61  ;;  %13389 = vst [vmem:[#allocation20_spill] sm:$0xff] %v9378_v35  ;;  %13391 = vst [vmem:[#allocation22_spill] sm:$0xff] %v9389_v42  ;;  %v12832_v63 = vand.u32 4294901760, %v9378_v35  ;;  %v9408_v3 = vsub.f32 %v9272_v49, %v674_v57  ;;  %v9461_v49 = vld [vmem:[%s12806_s3 + $0xd8] sm:$0xff] }
  0x1c   :  { %v9328_v27 = vpack.c.bf16 %v680_v10, %v677_v2  ;;  %13392 = vst [vmem:[#allocation23_spill] sm:$0xff] %v9392_v43  ;;  %13394 = vst [vmem:[#allocation25_spill] sm:$0xff] %v9405_v0  ;;  %v9422_v6 = vsub.f32 %v9282_v53, %v725_v61  ;;  %v9425_v7 = vsub.f32 %v9287_v55, %v728_v62  ;;  %v12828_v12 = vand.u32 4294901760, %v9389_v42 }
  0x1d   :  { %13383 = vst [vmem:[#allocation15_spill] sm:$0xff] %v9315_v11  ;;  %7636 = vmatpush3.bf16.msra.mxu1 %v9308_v1  ;;  %13395 = vst [vmem:[#allocation26_spill] sm:$0xff] %v9408_v3  ;;  %v7757_v19 = vpack.c.bf16 %v12832_v63, %v12833_v54  ;;  %v12824_v46 = vand.u32 4294901760, %v9408_v3  ;;  %v9469_v53 = vsub.f32 %v9298_v59, %v677_v2  ;;  %v12851_v57 = vand.u32 4294901760, %v9444_v37 }
  0x1e   :  { %7600 = vmatpush1.bf16.msra.mxu0 %v7599_v40  ;;  %v7609_v40 = vpack.c.bf16 %v172_v30, %v160_v29  ;;  %7638 = vmatprep.subr.bf16.mxu1 %v9315_v11  ;;  %13384 = vst [vmem:[#allocation16_spill] sm:$0xff] %v9328_v27  ;;  %v9365_v29 = vsub.f32 %v9196_v4, %v662_v13  ;;  %v12845_v30 = vand.u32 4294901760, %v9350_v21  ;;  %v9413_v4 = vld [vmem:[%s12806_s3 + $0xc0] sm:$0xff]  ;;  %13396 = vst [vmem:[#allocation27_spill] sm:$0xff] %v9422_v6 }
  0x1f   :  { %7602 = vmatprep.subr.bf16.mxu0 %v9102_v15  ;;  %13397 = vst [vmem:[#allocation28_spill] sm:$0xff] %v9425_v7  ;;  %v12827_v13 = vand.u32 4294901760, %v9392_v43  ;;  %v731_v26 = vand.u32 4294901760, %v9413_v4  ;;  %v12823_v50 = vand.u32 4294901760, %v9422_v6  ;;  %13398 = vst [vmem:[#allocation29_spill] sm:$0xff] %v9469_v53  ;;  %v9474_v55 = vsub.f32 %v9303_v60, %v680_v10  ;;  %v9501_v10 = vld [vmem:[%s12806_s3 + $0x50] sm:$0xff] }
  0x20   :  { %13386 = vst [vmem:[#allocation18_spill] sm:$0xff] %v9365_v29  ;;  %v12842_v41 = vand.u32 4294901760, %v9365_v29  ;;  %v12849_v62 = vand.u32 4294901760, %v9456_v48  ;;  %v12848_v2 = vand.u32 4294901760, %v9461_v49  ;;  %v13409_v11 = vand.u32 4294901760, %v9444_v37 }
  0x21   :  { %353 = vmatmul.mubr.f32.vlgmr.msra.gmra.mrb[0].mxu0 %v9140_v36  ;;  %7640 = vmatpush3.bf16.msra.mxu1 %v9328_v27  ;;  %v12843_v36 = vand.u32 4294901760, %v9360_v24  ;;  %13399 = vst [vmem:[#allocation30_spill] sm:$0xff] %v9474_v55  ;;  %v9489_v60 = vsub.f32 %v9413_v4, %v731_v26  ;;  %v12829_v34 = vand.u32 4294901760, %v9474_v55 }
  0x22   :  { %7604 = vmatpush1.bf16.msra.mxu0 %v9113_v20  ;;  %431 = vmatprep.mubr.f32.mxu0 %v12820_v9 }
  0x23   :  { %7606 = vmatprep.subr.bf16.mxu0 %v9117_v22  ;;  %v7755_v8 = vpack.c.bf16 %v12842_v41, %v12843_v36  ;;  %13400 = vst [vmem:[#allocation31_spill] sm:$0xff] %v9489_v60  ;;  %v649_v41 = vld [vmem:[%s12806_s3 + $0xf0] sm:$0xff]  ;;  %v650_v36 = vld [vmem:[%s12806_s3 + $0xf8] sm:$0xff] }
  0x26   :  { %7608 = vmatpush1.bf16.msra.mxu0 %v9132_v32 }
  0x27   :  { %7610 = vmatprep.subr.bf16.mxu0 %v7609_v40  ;;  %v9506_v40 = vld [vmem:[%s12806_s3 + $0x58] sm:$0xff] }
  0x29   :  { %435 = vmatmul.mubr.f32.vlgmr.msra.gmra.mrb[0].mxu0 %v149_v44  ;;  %v9395_v44 = vsub.f32 %v9244_v38, %v722_v51  ;;  %v9449_v38 = vld [vmem:[%s12806_s3 + $0x48] sm:$0xff]  ;;  %v12822_v51 = vand.u32 4294901760, %v9425_v7 }
  0x2a   :  { %7612 = vmatpush1.bf16.msra.mxu0 %v7611_v16  ;;  %529 = vmatprep.mubr.f32.mxu0 %v12820_v9  ;;  %v12850_v59 = vand.u32 4294901760, %v9449_v38  ;;  %v13410_v1 = vand.u32 4294901760, %v9449_v38 }
  0x2b   :  { %7614 = vmatprep.subr.bf16.mxu0 %v7613_v17  ;;  %13393 = vst [vmem:[#allocation24_spill] sm:$0xff] %v9395_v44  ;;  %v7765_v17 = vpack.c.bf16 %v12822_v51, %v12823_v50  ;;  %v12841_v51 = vand.u32 4294901760, %v9489_v60 }
  0x2c   :  { %v9626_v58 = vpack.c.bf16 %v13410_v1, %v13409_v11  ;;  %v13415_v11 = vand.u32 4294901760, %v9456_v48 }
  0x2e   :  { %7616 = vmatpush1.bf16.msra.mxu0 %v7615_v18  ;;  %v12830_v18 = vand.u32 4294901760, %v9469_v53  ;;  %13411 = vst [vmem:[#allocation40_spill] sm:$0xff] %v9626_v58 }
  0x2f   :  { %7618 = vmatprep.subr.bf16.mxu0 %v9102_v15  ;;  %v9383_v15 = vsub.f32 %v9219_v14, %v665_v45  ;;  %v12826_v14 = vand.u32 4294901760, %v9395_v44  ;;  %v12825_v45 = vand.u32 4294901760, %v9405_v0 }
  0x31   :  { %531 = vmatmul.mubr.f32.vlgmr.msra.gmra.mrb[0].mxu0 %v9126_v28  ;;  %13390 = vst [vmem:[#allocation21_spill] sm:$0xff] %v9383_v15  ;;  %v12831_v5 = vand.u32 4294901760, %v9383_v15  ;;  %v7761_v56 = vpack.c.bf16 %v12826_v14, %v12827_v13  ;;  %v7763_v16 = vpack.c.bf16 %v12824_v46, %v12825_v45  ;;  %v9540_v46 = vsub.f32 %v9461_v49, %v12848_v2 }
  0x32   :  { %7620 = vmatpush1.bf16.msra.mxu0 %v9113_v20  ;;  %609 = vmatprep.mubr.f32.mxu0 %v12820_v9  ;;  %v7753_v20 = vpack.c.bf16 %v12844_v31, %v12845_v30  ;;  %v12846_v9 = vand.u32 4294901760, %v9506_v40  ;;  %v7767_v45 = vpack.c.bf16 %v12829_v34, %v12830_v18 }
  0x33   :  { %7622 = vmatprep.subr.bf16.mxu0 %v9117_v22  ;;  %v9418_v22 = vld [vmem:[%s12806_s3 + $0xc8] sm:$0xff]  ;;  %13402 = vst [vmem:[#allocation33_spill] sm:$0xff] %v9540_v46  ;;  %v12839_v18 = vand.u32 4294901760, %v9540_v46 }
  0x36   :  { %7624 = vmatpush1.bf16.msra.mxu0 %v9132_v32  ;;  %v734_v32 = vand.u32 4294901760, %v9418_v22 }
  0x37   :  { %7754 = vmatprep.subr.bf16.mxu0 %v7753_v20  ;;  %v9521_v20 = vsub.f32 %v9444_v37, %v12851_v57 }
  0x38   :  { %v9494_v61 = vsub.f32 %v9418_v22, %v734_v32 }
  0x39   :  { %611 = vmatmul.mubr.f32.vlgmr.msra.gmra.mrb[0].mxu0 %v9126_v28  ;;  %v7759_v28 = vpack.c.bf16 %v12828_v12, %v12831_v5  ;;  %v9556_v12 = vsub.f32 %v9506_v40, %v12846_v9  ;;  %v752_v9 = vand.u32 4294901760, %v650_v36 }
  0x3a   :  { %7756 = vmatpush3.bf16.msra.mxu0 %v7755_v8  ;;  %13401 = vst [vmem:[#allocation32_spill] sm:$0xff] %v9494_v61  ;;  %v9526_v8 = vsub.f32 %v9449_v38, %v12850_v59  ;;  %v12836_v50 = vand.u32 4294901760, %v9494_v61  ;;  %v9618_v59 = vpack.c.bf16 %v734_v32, %v731_v26  ;;  %v13418_v38 = vand.u32 4294901760, %v9501_v10 }
  0x3b   :  { %7758 = vmatprep.subr.bf16.mxu0 %v7757_v19  ;;  %v12847_v19 = vand.u32 4294901760, %v9501_v10  ;;  %v12837_v54 = vand.u32 4294901760, %v9556_v12  ;;  %v9628_v47 = vsub.f32 %v650_v36, %v752_v9  ;;  %v13416_v36 = vand.u32 4294901760, %v9461_v49 }
  0x3c   :  { %v12834_v14 = vand.u32 4294901760, %v9526_v8  ;;  %13407 = vst [vmem:[#allocation38_spill] sm:$0xff] %v9618_v59  ;;  %7642 = vmatprep.subr.bf16.mxu1 %v9618_v59 }
  0x3d   :  { %v9551_v13 = vsub.f32 %v9501_v10, %v12847_v19  ;;  %13412 = vst [vmem:[#allocation41_spill] sm:$0xff] %v9628_v47  ;;  %7644 = vmatpush3.bf16.msra.mxu1 %v9626_v58  ;;  %v9643_v26 = vpack.c.bf16 %v13416_v36, %v13415_v11 }
  0x3e   :  { %7760 = vmatpush3.bf16.msra.mxu0 %v7759_v28  ;;  %v9535_v28 = vsub.f32 %v9456_v48, %v12849_v62  ;;  %v1539_v48 = vld [vmem:[%s12808_s5 + $0x88] sm:$0xff] }
  0x3f   :  { %7762 = vmatprep.subr.bf16.mxu0 %v7761_v56  ;;  %v12835_v56 = vand.u32 4294901760, %v9521_v20  ;;  %v12838_v63 = vand.u32 4294901760, %v9551_v13  ;;  %13417 = vst [vmem:[#allocation44_spill] sm:$0xff] %v9643_v26  ;;  %7646 = vmatprep.subr.bf16.mxu1 %v9643_v26  ;;  %v1613_v11 = vand.u32 4294901760, %v1539_v48 }
  0x40   :  { %v12840_v34 = vand.u32 4294901760, %v9535_v28 }
  0x41   :  { %v7771_v5 = vpack.c.bf16 %v12834_v14, %v12835_v56  ;;  %v647_v14 = vld [vmem:[%s12806_s3 + $0xe0] sm:$0xff] }
  0x42   :  { %7764 = vmatpush3.bf16.msra.mxu0 %v7763_v16  ;;  %v7769_v16 = vpack.c.bf16 %v12836_v50, %v12841_v51  ;;  %v743_v56 = vand.u32 4294901760, %v647_v14 }
  0x43   :  { %7766 = vmatprep.subr.bf16.mxu0 %v7765_v17  ;;  %v7773_v17 = vpack.c.bf16 %v12839_v18, %v12840_v34 }
  0x46   :  { %7768 = vmatpush3.bf16.msra.mxu0 %v7767_v45  ;;  %v7775_v45 = vpack.c.bf16 %v12837_v54, %v12838_v63  ;;  %v632_v54 = vld [vmem:[%s12806_s3 + $0x68] sm:$0xff]  ;;  %v9590_v63 = vsub.f32 %v647_v14, %v743_v56  ;;  %v749_v14 = vand.u32 4294901760, %v649_v41 }
  0x47   :  { %7770 = vmatprep.subr.bf16.mxu0 %v7769_v16  ;;  %v648_v16 = vld [vmem:[%s12806_s3 + $0xe8] sm:$0xff] }
  0x48   :  { %v746_v50 = vand.u32 4294901760, %v648_v16  ;;  %13403 = vst [vmem:[#allocation34_spill] sm:$0xff] %v9590_v63  ;;  %v969_v31 = vand.u32 4294901760, %v9590_v63  ;;  %v9620_v27 = vsub.f32 %v649_v41, %v749_v14  ;;  %v990_v41 = vand.u32 4294901760, %v9628_v47 }
  0x4a   :  { %7772 = vmatpush3.bf16.msra.mxu0 %v7771_v5  ;;  %v631_v5 = vld [vmem:[%s12806_s3 + $0x60] sm:$0xff]  ;;  %v9592_v18 = vsub.f32 %v648_v16, %v746_v50  ;;  %v633_v16 = vld [vmem:[%s12806_s3 + $0x70] sm:$0xff]  ;;  %13408 = vst [vmem:[#allocation39_spill] sm:$0xff] %v9620_v27  ;;  %v983_v4 = vand.u32 4294901760, %v9620_v27  ;;  %v9660_v10 = vpack.c.bf16 %v746_v50, %v743_v56  ;;  %v13426_v50 = vand.u32 4294901760, %v9350_v21 }
  0x4b   :  { %7774 = vmatprep.subr.bf16.mxu0 %v7773_v17  ;;  %v695_v17 = vand.u32 4294901760, %v631_v5  ;;  %v701_v2 = vand.u32 4294901760, %v633_v16 }
  0x4c   :  { %13404 = vst [vmem:[#allocation35_spill] sm:$0xff] %v9592_v18  ;;  %v976_v30 = vand.u32 4294901760, %v9592_v18  ;;  %v7781_v37 = vpack.c.bf16 %v990_v41, %v983_v4  ;;  %13421 = vst [vmem:[#allocation46_spill] sm:$0xff] %v9660_v10  ;;  %v886_v56 = vsub.f32 %v9350_v21, %v13426_v50 }
  0x4d   :  { %v9594_v34 = vsub.f32 %v631_v5, %v695_v17  ;;  %v9630_v39 = vsub.f32 %v633_v16, %v701_v2 }
  0x4e   :  { %7776 = vmatpush3.bf16.msra.mxu0 %v7775_v45  ;;  %v698_v45 = vand.u32 4294901760, %v632_v54  ;;  %v7777_v57 = vpack.c.bf16 %v976_v30, %v969_v31 }
  0x4f   :  { %13405 = vst [vmem:[#allocation36_spill] sm:$0xff] %v9594_v34  ;;  %v857_v5 = vand.u32 4294901760, %v9594_v34  ;;  %13413 = vst [vmem:[#allocation42_spill] sm:$0xff] %v9630_v39  ;;  %v871_v1 = vand.u32 4294901760, %v9630_v39 }
  0x50   :  { %v9596_v51 = vsub.f32 %v632_v54, %v698_v45  ;;  %v634_v54 = vld [vmem:[%s12806_s3 + $0x78] sm:$0xff]  ;;  %7778 = vmatprep.subr.bf16.mxu0 %v7777_v57  ;;  %v13419_v57 = vand.u32 4294901760, %v9506_v40  ;;  %v9664_v36 = vpack.c.bf16 %v698_v45, %v695_v17  ;;  %v13427_v17 = vand.u32 4294901760, %v9355_v23 }
  0x51   :  { %v704_v62 = vand.u32 4294901760, %v634_v54 }
  0x52   :  { %13406 = vst [vmem:[#allocation37_spill] sm:$0xff] %v9596_v51  ;;  %v864_v19 = vand.u32 4294901760, %v9596_v51  ;;  %v9650_v16 = vpack.c.bf16 %v13419_v57, %v13418_v38  ;;  %13423 = vst [vmem:[#allocation48_spill] sm:$0xff] %v9664_v36  ;;  %v9670_v57 = vsub.f32 %v1539_v48, %v1613_v11  ;;  %v893_v45 = vsub.f32 %v9355_v23, %v13427_v17 }
  0x53   :  { %v9634_v22 = vsub.f32 %v634_v54, %v704_v62  ;;  %v991_v17 = vsub.f32 %v9628_v47, %v990_v41 }
  0x54   :  { %v7779_v52 = vpack.c.bf16 %v864_v19, %v857_v5  ;;  %13420 = vst [vmem:[#allocation45_spill] sm:$0xff] %v9650_v16  ;;  %7648 = vmatpush3.bf16.msra.mxu1 %v9650_v16  ;;  %v9675_v16 = vpack.c.bf16 %v704_v62, %v701_v2  ;;  %v894_v48 = vand.u32 4294901760, %v893_v45  ;;  %v977_v62 = vsub.f32 %v9592_v18, %v976_v30 }
  0x55   :  { %13414 = vst [vmem:[#allocation43_spill] sm:$0xff] %v9634_v22  ;;  %v878_v32 = vand.u32 4294901760, %v9634_v22  ;;  %7650 = vmatprep.subr.bf16.mxu1 %v9660_v10  ;;  %v858_v2 = vsub.f32 %v9594_v34, %v857_v5  ;;  %v872_v45 = vsub.f32 %v9630_v39, %v871_v1 }
  0x56   :  { %7780 = vmatpush3.bf16.msra.mxu0 %v7779_v52  ;;  %v1538_v52 = vld [vmem:[%s12808_s5 + $0x80] sm:$0xff]  ;;  %13425 = vst [vmem:[#allocation50_spill] sm:$0xff] %v9675_v16  ;;  %v978_v50 = vand.u32 4294901760, %v977_v62 }
  0x57   :  { %v7783_v49 = vpack.c.bf16 %v878_v32, %v871_v1  ;;  %v1610_v54 = vand.u32 4294901760, %v1538_v52  ;;  %7782 = vmatprep.subr.bf16.mxu0 %v7781_v37  ;;  %v9673_v37 = vpack.c.bf16 %v752_v9, %v749_v14  ;;  %v970_v9 = vsub.f32 %v9590_v63, %v969_v31  ;;  %v58_v1 = vld [vmem:[%s12805_s2] sm:$0x3] }
  0x58   :  { %7652 = vmatpush3.bf16.msra.mxu1 %v9664_v36  ;;  %v865_v14 = vsub.f32 %v9596_v51, %v864_v19  ;;  %v992_v31 = vand.u32 4294901760, %v991_v17  ;;  %v879_v30 = vsub.f32 %v9634_v22, %v878_v32  ;;  %v873_v5 = vand.u32 4294901760, %v872_v45  ;;  %v9739_v45 = vld [vmem:[%s12808_s5 + $0x18] sm:$0xff] }
  0x59   :  { %v9662_v40 = vpack.c.bf16 %v1613_v11, %v1610_v54  ;;  %v9668_v38 = vsub.f32 %v1538_v52, %v1610_v54  ;;  %13424 = vst [vmem:[#allocation49_spill] sm:$0xff] %v9673_v37  ;;  %7654 = vmatprep.subr.bf16.mxu1 %v9673_v37  ;;  %v887_v52 = vand.u32 4294901760, %v886_v56  ;;  %v984_v54 = vsub.f32 %v9620_v27, %v983_v4 }
  0x5a   :  { %7784 = vmatpush3.bf16.msra.mxu0 %v7783_v49  ;;  %v971_v11 = vand.u32 4294901760, %v970_v9  ;;  %v880_v4 = vand.u32 4294901760, %v879_v30  ;;  %v60_v9 = vlaneseq  ;;  %v9749_v30 = vld [vmem:[%s12808_s5 + $0xa8] sm:$0xff]  ;;  %v13452_v63 = vand.u32 4294901760, %v9389_v42 }
  0x5b   :  { %13422 = vst [vmem:[#allocation47_spill] sm:$0xff] %v9662_v40  ;;  %7818 = vmatprep.subr.bf16.mxu0 %v9662_v40  ;;  %v7657_v49 = vpack.c.bf16 %v894_v48, %v887_v52  ;;  %v859_v40 = vand.u32 4294901760, %v858_v2  ;;  %v985_v56 = vand.u32 4294901760, %v984_v54  ;;  %v9723_v54 = vld [vmem:[%s12808_s5 + $0x90] sm:$0xff]  ;;  %v13447_v34 = vand.u32 4294901760, %v9749_v30 }
  0x5c   :  { %7656 = vmatpush3.bf16.msra.mxu1 %v9675_v16  ;;  %v866_v16 = vand.u32 4294901760, %v865_v14  ;;  %v9692_v52 = vpack.c.bf16 %v978_v50, %v971_v11  ;;  %v61_v62 = vshrl.u32 %v60_v9, 7  ;;  %v9718_v14 = vld [vmem:[%s12808_s5 + $0x8] sm:$0xff]  ;;  %v9728_v11 = vld [vmem:[%s12808_s5 + $0x98] sm:$0xff]  ;;  %v9733_v50 = vld [vmem:[%s12808_s5 + $0x10] sm:$0xff]  ;;  %v13439_v25 = vand.u32 4294901760, %v9723_v54 }
  0x5d   :  { %7658 = vmatprep.subr.bf16.mxu1 %v7657_v49  ;;  %v9697_v19 = vpack.c.bf16 %v992_v31, %v985_v56  ;;  %v9699_v49 = vpack.c.bf16 %v880_v4, %v873_v5  ;;  %v9744_v31 = vld [vmem:[%s12808_s5 + $0xa0] sm:$0xff]  ;;  %v13431_v56 = vand.u32 4294901760, %v9365_v29  ;;  %v9783_v9 = vld [vmem:[%s12808_s5 + $0xb0] sm:$0xff]  ;;  %v13436_v37 = vand.u32 4294901760, %v9718_v14 }
  0x5e   :  { %v9695_v48 = vpack.c.bf16 %v866_v16, %v859_v40  ;;  %v9701_v41 = vsub.s32 0, %v61_v62  ;;  %v9706_v2 = vsub.s32 1, %v61_v62  ;;  %v9712_v16 = vld [vmem:[%s12808_s5] sm:$0xff]  ;;  %v13430_v62 = vand.u32 4294901760, %v9360_v24 }
  0x5f   :  { %v13435_v36 = vand.u32 4294901760, %v9712_v16  ;;  %v13440_v22 = vand.u32 4294901760, %v9728_v11  ;;  %v13446_v51 = vand.u32 4294901760, %v9744_v31 }
  0x60   :  { %13428 = vst [vmem:[#allocation51_spill] sm:$0xff] %v9701_v41  ;;  %13429 = vst [vmem:[#allocation52_spill] sm:$0xff] %v9706_v2  ;;  %v63_v32 = vrot.slane %v58_v1, %v9701_v41  ;;  %v67_v40 = vrot.slane %v58_v1, %v9706_v2  ;;  %v774_v1 = vsub.f32 %v9360_v24, %v13430_v62  ;;  %v9767_v62 = vld [vmem:[%s12808_s5 + $0x20] sm:$0xff] }
  0x61   :  { %v781_v2 = vsub.f32 %v9365_v29, %v13431_v56  ;;  %v9804_v39 = vpack.c.bf16 %v13440_v22, %v13439_v25  ;;  %v9821_v18 = vpack.c.bf16 %v13447_v34, %v13446_v51  ;;  %v9827_v22 = vld [vmem:[%s12808_s5 + $0x30] sm:$0xff]  ;;  %v13451_v25 = vand.u32 4294901760, %v9383_v15 }
  0x62   :  { %v775_v58 = vand.u32 4294901760, %v774_v1  ;;  %v13444_v1 = vand.u32 4294901760, %v9739_v45 }
  0x63   :  { %v782_v59 = vand.u32 4294901760, %v781_v2  ;;  %13441 = vst [vmem:[#allocation56_spill] sm:$0xff] %v9804_v39  ;;  %v13443_v2 = vand.u32 4294901760, %v9733_v50  ;;  %13448 = vst [vmem:[#allocation59_spill] sm:$0xff] %v9821_v18  ;;  %v788_v47 = vsub.f32 %v9383_v15, %v13451_v25  ;;  %v9866_v15 = vld [vmem:[%s12808_s5 + $0xc0] sm:$0xff] }
  0x64   :  { %13458 = vst [vmem:[#allocation64_spill] sm:$0xff] %v9866_v15 }
  0x65   :  { %v9815_v27 = vpack.c.bf16 %v13444_v1, %v13443_v2  ;;  %v7659_v34 = vpack.c.bf16 %v782_v59, %v775_v58  ;;  %v13454_v58 = vand.u32 4294901760, %v9767_v62 }
  0x67   :  { %13445 = vst [vmem:[#allocation58_spill] sm:$0xff] %v9815_v27 }
 0x10c   :  { %v612_v17 = vpop.f32.mrb[0].mxu0 }
 0x10d   :  { %v8873_v5 = vadd.f32 %v612_v17, %v63_v32  ;;  %v614_v4 = vpop.f32.mrb[1].mxu0  ;;  %v13433_v32 = vand.u32 4294901760, %v9378_v35 }
 0x10e   :  { %v8874_v41 = vadd.f32 %v614_v4, %v67_v40  ;;  %v9772_v40 = vld [vmem:[%s12808_s5 + $0x28] sm:$0xff]  ;;  %v13432_v4 = vand.u32 4294901760, %v9373_v33 }
 0x10f   :  { %v617_v26 = vmax.f32 %v8873_v5, 0.0  ;;  %v907_v17 = vsub.f32 %v9378_v35, %v13433_v32  ;;  %v13455_v59 = vand.u32 4294901760, %v9772_v40 }
 0x110   :  { %v618_v56 = vmax.f32 %v8874_v41, 0.0  ;;  %v900_v5 = vsub.f32 %v9373_v33, %v13432_v4  ;;  %v9791_v41 = vpack.c.bf16 %v13436_v37, %v13435_v36  ;;  %v9796_v4 = vld [vmem:[%s12808_s5 + $0xb8] sm:$0xff] }
 0x111   :  { %v9785_v10 = vand.u32 4294901760, %v617_v26  ;;  %v908_v1 = vand.u32 4294901760, %v907_v17  ;;  %v9847_v17 = vld [vmem:[%s12808_s5 + $0x38] sm:$0xff]  ;;  %v9857_v36 = vpack.c.bf16 %v13455_v59, %v13454_v58  ;;  %v13460_v59 = vand.u32 4294901760, %v9395_v44 }
 0x112   :  { %13437 = vst [vmem:[#allocation54_spill] sm:$0xff] %v9791_v41  ;;  %v9798_v32 = vand.u32 4294901760, %v618_v56  ;;  %v901_v2 = vand.u32 4294901760, %v900_v5 }
 0x113   :  { %13434 = vst [vmem:[#allocation53_spill] sm:$0xff] %v9785_v10  ;;  %v9809_v37 = vsub.f32 %v617_v26, %v9785_v10  ;;  %13456 = vst [vmem:[#allocation63_spill] sm:$0xff] %v9857_v36  ;;  %v921_v25 = vsub.f32 %v9395_v44, %v13460_v59  ;;  %v789_v44 = vand.u32 4294901760, %v788_v47  ;;  %v13467_v47 = vand.u32 4294901760, %v9422_v6 }
 0x114   :  { %13438 = vst [vmem:[#allocation55_spill] sm:$0xff] %v9798_v32  ;;  %v9830_v26 = vsub.f32 %v618_v56, %v9798_v32  ;;  %1409 = vmatprep.mubr.f32.mxu0 %v9798_v32  ;;  %v795_v56 = vsub.f32 %v9389_v42, %v13452_v63  ;;  %v13457_v63 = vand.u32 4294901760, %v9392_v43  ;;  %v7661_v29 = vpack.c.bf16 %v908_v1, %v901_v2  ;;  %v9902_v2 = vld [vmem:[%s12808_s5 + $0x40] sm:$0xff] }
 0x115   :  { %13442 = vst [vmem:[#allocation57_spill] sm:$0xff] %v9809_v37  ;;  %1411 = vmatmul.mubr.f32.vlgmr.msra.gmra.mrb[2].mxu0 %v9785_v10  ;;  %v9836_v51 = vand.u32 4294901760, %v9809_v37  ;;  %v13462_v10 = vand.u32 4294901760, %v9408_v3  ;;  %v928_v1 = vsub.f32 %v9422_v6, %v13467_v47  ;;  %v13470_v59 = vand.u32 4294901760, %v9827_v22 }
 0x116   :  { %13449 = vst [vmem:[#allocation60_spill] sm:$0xff] %v9830_v26  ;;  %7820 = vmatpush3.bf16.msra.mxu0 %v9791_v41  ;;  %v9851_v5 = vand.u32 4294901760, %v9830_v26  ;;  %v914_v42 = vsub.f32 %v9392_v43, %v13457_v63  ;;  %v9871_v41 = vld [vmem:[%s12808_s5 + $0xc8] sm:$0xff]  ;;  %v13461_v63 = vand.u32 4294901760, %v9405_v0  ;;  %v796_v24 = vand.u32 4294901760, %v795_v56 }
 0x117   :  { %13450 = vst [vmem:[#allocation61_spill] sm:$0xff] %v9836_v51  ;;  %13459 = vst [vmem:[#allocation65_spill] sm:$0xff] %v9871_v41  ;;  %7822 = vmatprep.subr.bf16.mxu0 %v9804_v39  ;;  %v763_v58 = vsub.f32 %v9809_v37, %v9836_v51  ;;  %v809_v35 = vsub.f32 %v9408_v3, %v13462_v10  ;;  %v13463_v39 = vand.u32 4294901760, %v9783_v9  ;;  %v13464_v51 = vand.u32 4294901760, %v9796_v4 }
 0x118   :  { %13453 = vst [vmem:[#allocation62_spill] sm:$0xff] %v9851_v5  ;;  %v802_v43 = vsub.f32 %v9405_v0, %v13461_v63  ;;  %v757_v33 = vsub.f32 %v9830_v26, %v9851_v5  ;;  %v915_v5 = vand.u32 4294901760, %v914_v42  ;;  %v922_v56 = vand.u32 4294901760, %v921_v25 }
 0x119   :  { %v9891_v37 = vpack.c.bf16 %v13464_v51, %v13463_v39  ;;  %v9907_v39 = vld [vmem:[%s12808_s5 + $0x48] sm:$0xff]  ;;  %v13468_v51 = vand.u32 4294901760, %v9425_v7  ;;  %v9916_v42 = vand.u32 4294901760, %v763_v58  ;;  %v810_v63 = vand.u32 4294901760, %v809_v35 }
 0x11a   :  { %7824 = vmatpush3.bf16.msra.mxu0 %v9815_v27  ;;  %v9897_v10 = vand.u32 4294901760, %v757_v33  ;;  %v803_v0 = vand.u32 4294901760, %v802_v43  ;;  %v13471_v27 = vand.u32 4294901760, %v9847_v17  ;;  %v9934_v43 = vld [vmem:[%s12808_s5 + $0xd8] sm:$0xff]  ;;  %v13473_v35 = vand.u32 4294901760, %v9469_v53 }
 0x11b   :  { %13465 = vst [vmem:[#allocation66_spill] sm:$0xff] %v9891_v37  ;;  %v935_v33 = vsub.f32 %v9425_v7, %v13468_v51  ;;  %7826 = vmatprep.subr.bf16.mxu0 %v9821_v18  ;;  %13469 = vst [vmem:[#allocation68_spill] sm:$0xff] %v9916_v42  ;;  %v9929_v51 = vld [vmem:[%s12808_s5 + $0xd0] sm:$0xff]  ;;  %v13474_v58 = vand.u32 4294901760, %v9474_v55  ;;  %v13479_v3 = vand.u32 4294901760, %v9494_v61 }
 0x11c   :  { %13466 = vst [vmem:[#allocation67_spill] sm:$0xff] %v9897_v10  ;;  %759 = vmatprep.mubr.f32.mxu1 %v9897_v10  ;;  %1662 = vmatprep.mubr.f32.mxu0 %v9897_v10  ;;  %v9924_v47 = vpack.c.bf16 %v13471_v27, %v13470_v59  ;;  %v816_v25 = vsub.f32 %v9469_v53, %v13473_v35  ;;  %v13475_v59 = vand.u32 4294901760, %v9866_v15  ;;  %v13476_v10 = vand.u32 4294901760, %v9871_v41  ;;  %v9954_v35 = vld [vmem:[%s12808_s5 + $0x50] sm:$0xff] }
 0x11d   :  { %v823_v18 = vsub.f32 %v9474_v55, %v13474_v58  ;;  %765 = vmatmul.mubr.f32.vlgmr.msra.gmra.mrb[0].mxu1 %v9916_v42  ;;  %v7663_v27 = vpack.c.bf16 %v796_v24, %v789_v44  ;;  %v9959_v58 = vld [vmem:[%s12808_s5 + $0x58] sm:$0xff]  ;;  %v929_v24 = vand.u32 4294901760, %v928_v1  ;;  %v936_v44 = vand.u32 4294901760, %v935_v33  ;;  %v9971_v55 = vld [vmem:[%s12808_s5 + $0xe0] sm:$0xff] }
 0x11e   :  { %13472 = vst [vmem:[#allocation69_spill] sm:$0xff] %v9924_v47  ;;  %v9947_v7 = vpack.c.bf16 %v13476_v10, %v13475_v59  ;;  %7660 = vmatpush3.bf16.msra.mxu1 %v7659_v34  ;;  %7828 = vmatpush3.bf16.msra.mxu0 %v9857_v36  ;;  %v13478_v10 = vand.u32 4294901760, %v9489_v60  ;;  %v949_v6 = vsub.f32 %v9494_v61, %v13479_v3  ;;  %v9976_v34 = vld [vmem:[%s12808_s5 + $0xe8] sm:$0xff]  ;;  %v12939_v36 = vand.u32 4294901760, %v9934_v43 }
 0x11f   :  { %995 = vmatprep.mubr.f32.mxu1 %v9798_v32  ;;  %7662 = vmatprep.subr.bf16.mxu1 %v7661_v29  ;;  %v7665_v1 = vpack.c.bf16 %v922_v56, %v915_v5  ;;  %v7667_v33 = vpack.c.bf16 %v810_v63, %v803_v0  ;;  %v817_v3 = vand.u32 4294901760, %v816_v25  ;;  %v824_v61 = vand.u32 4294901760, %v823_v18  ;;  %v9995_v18 = vld [vmem:[%s12808_s5 + $0x60] sm:$0xff] }
 0x120   :  { %13477 = vst [vmem:[#allocation70_spill] sm:$0xff] %v9947_v7  ;;  %v942_v59 = vsub.f32 %v9489_v60, %v13478_v10  ;;  %v12941_v10 = vand.u32 4294901760, %v9929_v51  ;;  %7830 = vmatprep.subr.bf16.mxu0 %v9891_v37  ;;  %v12940_v60 = vand.u32 4294901760, %v9954_v35  ;;  %v13480_v29 = vand.u32 4294901760, %v9521_v20 }
 0x121   :  { %v13481_v5 = vand.u32 4294901760, %v9526_v8  ;;  %v13482_v56 = vand.u32 4294901760, %v9902_v2  ;;  %v13483_v25 = vand.u32 4294901760, %v9907_v39  ;;  %v7669_v41 = vpack.c.bf16 %v936_v44, %v929_v24 }
 0x122   :  { %v830_v0 = vsub.f32 %v9521_v20, %v13480_v29  ;;  %7664 = vmatpush3.bf16.msra.mxu1 %v7663_v27  ;;  %7832 = vmatpush3.bf16.msra.mxu0 %v9924_v47  ;;  %v943_v29 = vand.u32 4294901760, %v942_v59  ;;  %v950_v53 = vand.u32 4294901760, %v949_v6  ;;  %v10014_v27 = vpack.c.bf16 %v12939_v36, %v12941_v10  ;;  %v10032_v36 = vld [vmem:[%s12808_s5 + $0xf0] sm:$0xff] }
 0x123   :  { %v837_v63 = vsub.f32 %v9526_v8, %v13481_v5  ;;  %v10002_v15 = vpack.c.bf16 %v13483_v25, %v13482_v56  ;;  %v10007_v5 = vld [vmem:[%s12808_s5 + $0x68] sm:$0xff]  ;;  %7666 = vmatprep.subr.bf16.mxu1 %v7665_v1  ;;  %7834 = vmatprep.subr.bf16.mxu0 %v9947_v7  ;;  %v13486_v56 = vand.u32 4294901760, %v9535_v28  ;;  %v13487_v6 = vand.u32 4294901760, %v9540_v46 }
 0x124   :  { %13485 = vst [vmem:[#allocation72_spill] sm:$0xff] %v10014_v27  ;;  %v7671_v59 = vpack.c.bf16 %v824_v61, %v817_v3  ;;  %v13488_v1 = vand.u32 4294901760, %v9959_v58  ;;  %v13490_v61 = vand.u32 4294901760, %v9971_v55  ;;  %v13491_v3 = vand.u32 4294901760, %v9976_v34 }
 0x125   :  { %13484 = vst [vmem:[#allocation71_spill] sm:$0xff] %v10002_v15  ;;  %v956_v24 = vsub.f32 %v9535_v28, %v13486_v56  ;;  %v963_v44 = vsub.f32 %v9540_v46, %v13487_v6  ;;  %v10037_v56 = vld [vmem:[%s12808_s5 + $0xf8] sm:$0xff]  ;;  %v1601_v10 = vand.u32 4294901760, %v10007_v5  ;;  %v7673_v7 = vpack.c.bf16 %v950_v53, %v943_v29  ;;  %v10059_v53 = vld [vmem:[%s12808_s5 + $0x70] sm:$0xff] }
 0x126   :  { %v10026_v25 = vpack.c.bf16 %v13488_v1, %v12940_v60  ;;  %v10043_v6 = vpack.c.bf16 %v13491_v3, %v13490_v61  ;;  %v831_v1 = vand.u32 4294901760, %v830_v0  ;;  %v838_v60 = vand.u32 4294901760, %v837_v63  ;;  %7668 = vmatpush3.bf16.msra.mxu1 %v7667_v33  ;;  %7836 = vmatpush3.bf16.msra.mxu0 %v10002_v15 }
 0x127   :  { %v13493_v47 = vand.u32 4294901760, %v9551_v13  ;;  %v13494_v32 = vand.u32 4294901760, %v9556_v12  ;;  %7670 = vmatprep.subr.bf16.mxu1 %v7669_v41  ;;  %7838 = vmatprep.subr.bf16.mxu0 %v10014_v27  ;;  %v957_v61 = vand.u32 4294901760, %v956_v24  ;;  %v964_v0 = vand.u32 4294901760, %v963_v44 }
 0x128   :  { %13489 = vst [vmem:[#allocation73_spill] sm:$0xff] %v10026_v25  ;;  %13492 = vst [vmem:[#allocation74_spill] sm:$0xff] %v10043_v6  ;;  %v13495_v41 = vand.u32 4294901760, %v9995_v18  ;;  %v1604_v3 = vand.u32 4294901760, %v10059_v53 }
 0x129   :  { %v844_v37 = vsub.f32 %v9551_v13, %v13493_v47  ;;  %v851_v46 = vsub.f32 %v9556_v12, %v13494_v32  ;;  %v10064_v47 = vld [vmem:[%s12808_s5 + $0x78] sm:$0xff]  ;;  %v7675_v32 = vpack.c.bf16 %v838_v60, %v831_v1  ;;  %v7677_v63 = vpack.c.bf16 %v964_v0, %v957_v61 }
 0x12a   :  { %v10070_v29 = vpack.c.bf16 %v1601_v10, %v13495_v41  ;;  %7672 = vmatpush3.bf16.msra.mxu1 %v7671_v59  ;;  %7840 = vmatpush3.bf16.msra.mxu0 %v10026_v25  ;;  %v1607_v33 = vand.u32 4294901760, %v10064_v47  ;;  %v13497_v60 = vand.u32 4294901760, %v10032_v36  ;;  %v13498_v1 = vand.u32 4294901760, %v10037_v56 }
 0x12b   :  { %v845_v24 = vand.u32 4294901760, %v844_v37  ;;  %v852_v44 = vand.u32 4294901760, %v851_v46  ;;  %7674 = vmatprep.subr.bf16.mxu1 %v7673_v7  ;;  %7842 = vmatprep.subr.bf16.mxu0 %v10043_v6  ;;  %v13500_v59 = vand.u32 4294901760, %v9712_v16  ;;  %v13501_v46 = vand.u32 4294901760, %v9718_v14 }
 0x12c   :  { %13496 = vst [vmem:[#allocation75_spill] sm:$0xff] %v10070_v29  ;;  %v10080_v27 = vpack.c.bf16 %v13498_v1, %v13497_v60  ;;  %v10097_v61 = vpack.c.bf16 %v1607_v33, %v1604_v3  ;;  %v13503_v0 = vand.u32 4294901760, %v9723_v54 }
 0x12d   :  { %v10085_v41 = vsub.f32 %v9712_v16, %v13500_v59  ;;  %v10090_v37 = vsub.f32 %v9718_v14, %v13501_v46  ;;  %v7679_v7 = vpack.c.bf16 %v852_v44, %v845_v24  ;;  %v7881_v16 = vpack.c.bf16 %v9670_v57, %v9668_v38 }
 0x12e   :  { %13499 = vst [vmem:[#allocation76_spill] sm:$0xff] %v10080_v27  ;;  %7676 = vmatpush3.bf16.msra.mxu1 %v7675_v32  ;;  %7844 = vmatpush3.bf16.msra.mxu0 %v10070_v29  ;;  %13502 = vst [vmem:[#allocation77_spill] sm:$0xff] %v10097_v61  ;;  %v10105_v14 = vsub.f32 %v9723_v54, %v13503_v0  ;;  %v13505_v32 = vand.u32 4294901760, %v9728_v11  ;;  %v13507_v44 = vand.u32 4294901760, %v9733_v50  ;;  %v13511_v59 = vand.u32 4294901760, %v9744_v31 }
 0x12f   :  { %7678 = vmatprep.subr.bf16.mxu1 %v7677_v63  ;;  %7846 = vmatprep.subr.bf16.mxu0 %v10080_v27  ;;  %v13509_v63 = vand.u32 4294901760, %v9739_v45  ;;  %v7883_v54 = vpack.c.bf16 %v10090_v37, %v10085_v41  ;;  %v13513_v46 = vand.u32 4294901760, %v9749_v30 }
 0x130   :  { %13504 = vst [vmem:[#allocation78_spill] sm:$0xff] %v10105_v14  ;;  %v10110_v24 = vsub.f32 %v9728_v11, %v13505_v32  ;;  %v10115_v60 = vsub.f32 %v9733_v50, %v13507_v44  ;;  %v10128_v11 = vsub.f32 %v9744_v31, %v13511_v59  ;;  %v13521_v44 = vand.u32 4294901760, %v9796_v4 }
 0x131   :  { %v10120_v1 = vsub.f32 %v9739_v45, %v13509_v63  ;;  %v10133_v50 = vsub.f32 %v9749_v30, %v13513_v46  ;;  %v13517_v30 = vand.u32 4294901760, %v9772_v40  ;;  %v13523_v63 = vand.u32 4294901760, %v9827_v22  ;;  %v13529_v46 = vld [vmem:[#allocation19_spill] sm:$0xff] }
 0x132   :  { %13506 = vst [vmem:[#allocation79_spill] sm:$0xff] %v10110_v24  ;;  %13508 = vst [vmem:[#allocation80_spill] sm:$0xff] %v10115_v60  ;;  %7680 = vmatpush3.bf16.msra.mxu1 %v7679_v7  ;;  %7848 = vmatpush3.bf16.msra.mxu0 %v10097_v61  ;;  %v7885_v45 = vpack.c.bf16 %v10110_v24, %v10105_v14  ;;  %v13515_v7 = vand.u32 4294901760, %v9767_v62 }
 0x133   :  { %13510 = vst [vmem:[#allocation81_spill] sm:$0xff] %v10120_v1  ;;  %13512 = vst [vmem:[#allocation82_spill] sm:$0xff] %v10128_v11  ;;  %7682 = vmatprep.subr.bf16.mxu1 %v9692_v52  ;;  %7882 = vmatprep.subr.bf16.mxu0 %v7881_v16  ;;  %v7887_v31 = vpack.c.bf16 %v10120_v1, %v10115_v60  ;;  %v10150_v52 = vsub.f32 %v9772_v40, %v13517_v30 }
 0x134   :  { %13514 = vst [vmem:[#allocation83_spill] sm:$0xff] %v10133_v50  ;;  %v10142_v0 = vsub.f32 %v9767_v62, %v13515_v7  ;;  %v7689_v16 = vpack.c.bf16 %v9355_v23, %v9350_v21  ;;  %v7889_v62 = vpack.c.bf16 %v10133_v50, %v10128_v11  ;;  %v10166_v40 = vsub.f32 %v9796_v4, %v13521_v44  ;;  %v13525_v21 = vld [vmem:[#allocation17_spill] sm:$0xff]  ;;  %v13526_v23 = vld [vmem:[#allocation18_spill] sm:$0xff]  ;;  %v13531_v7 = vld [vmem:[#allocation64_spill] sm:$0xff] }
 0x135   :  { %1668 = vmatmul.mubr.f32.vlgmr.msra.gmra.mrb[4].mxu0 %v9916_v42  ;;  %13518 = vst [vmem:[#allocation85_spill] sm:$0xff] %v10150_v52  ;;  %v13532_v30 = vand.u32 4294901760, %v13531_v7 }
 0x136   :  { %13516 = vst [vmem:[#allocation84_spill] sm:$0xff] %v10142_v0  ;;  %7684 = vmatpush3.bf16.msra.mxu1 %v9695_v48  ;;  %7884 = vmatpush3.bf16.msra.mxu0 %v7883_v54  ;;  %v13519_v48 = vand.u32 4294901760, %v9783_v9  ;;  %13522 = vst [vmem:[#allocation87_spill] sm:$0xff] %v10166_v40  ;;  %v7691_v54 = vpack.c.bf16 %v13526_v23, %v13525_v21  ;;  %v7891_v4 = vpack.c.bf16 %v10150_v52, %v10142_v0  ;;  %v13540_v21 = vld [vmem:[#allocation21_spill] sm:$0xff]  ;;  %v13541_v23 = vld [vmem:[#allocation22_spill] sm:$0xff] }
 0x137   :  { %2035 = vmatprep.mubr.f32.mxu0 %v9830_v26  ;;  %7686 = vmatprep.subr.bf16.mxu1 %v9697_v19  ;;  %v10171_v19 = vsub.f32 %v9827_v22, %v13523_v63 }
 0x138   :  { %v10161_v32 = vsub.f32 %v9783_v9, %v13519_v48  ;;  %7886 = vmatprep.subr.bf16.mxu0 %v7885_v45  ;;  %v13527_v9 = vand.u32 4294901760, %v9847_v17  ;;  %v13530_v45 = vld [vmem:[#allocation20_spill] sm:$0xff] }
 0x139   :  { %13524 = vst [vmem:[#allocation88_spill] sm:$0xff] %v10171_v19  ;;  %v7693_v22 = vpack.c.bf16 %v13530_v45, %v13529_v46  ;;  %v13542_v46 = vand.u32 4294901760, %v9907_v39 }
 0x13a   :  { %13520 = vst [vmem:[#allocation86_spill] sm:$0xff] %v10161_v32  ;;  %7688 = vmatpush3.bf16.msra.mxu1 %v9699_v49  ;;  %7888 = vmatpush3.bf16.msra.mxu0 %v7887_v31  ;;  %v10179_v59 = vsub.f32 %v9847_v17, %v13527_v9  ;;  %v10188_v49 = vsub.f32 %v13531_v7, %v13532_v30  ;;  %v13534_v31 = vld [vmem:[#allocation65_spill] sm:$0xff]  ;;  %v13544_v30 = vld [vmem:[#allocation23_spill] sm:$0xff] }
 0x13b   :  { %7690 = vmatprep.subr.bf16.mxu1 %v7689_v16  ;;  %7890 = vmatprep.subr.bf16.mxu0 %v7889_v62  ;;  %v13535_v48 = vand.u32 4294901760, %v13534_v31  ;;  %v7893_v17 = vpack.c.bf16 %v10166_v40, %v10161_v32  ;;  %v13537_v16 = vld [vmem:[#allocation53_spill] sm:$0xff]  ;;  %v13538_v62 = vand.u32 4294901760, %v9902_v2  ;;  %v7695_v9 = vpack.c.bf16 %v13541_v23, %v13540_v21 }
 0x13c   :  { %13528 = vst [vmem:[#allocation17_spill] sm:$0xff] %v10179_v59  ;;  %13533 = vst [vmem:[#allocation18_spill] sm:$0xff] %v10188_v49  ;;  %v10209_v45 = vsub.f32 %v9907_v39, %v13542_v46  ;;  %v7895_v7 = vpack.c.bf16 %v10179_v59, %v10171_v19  ;;  %v13552_v23 = vld [vmem:[#allocation25_spill] sm:$0xff]  ;;  %v13553_v46 = vld [vmem:[#allocation26_spill] sm:$0xff] }
 0x13d   :  { %v10193_v44 = vsub.f32 %v13534_v31, %v13535_v48  ;;  %997 = vmatmul.mubr.f32.vlgmr.msra.gmra.mrb[2].mxu1 %v13537_v16  ;;  %v10201_v63 = vsub.f32 %v9902_v2, %v13538_v62  ;;  %v13545_v31 = vld [vmem:[#allocation24_spill] sm:$0xff]  ;;  %v13548_v62 = vand.u32 4294901760, %v9934_v43 }
 0x13e   :  { %7692 = vmatpush3.bf16.msra.mxu1 %v7691_v54  ;;  %1132 = vmatprep.mubr.f32.mxu1 %v9830_v26  ;;  %13543 = vst [vmem:[#allocation64_spill] sm:$0xff] %v10209_v45  ;;  %v7697_v2 = vpack.c.bf16 %v13545_v31, %v13544_v30  ;;  %v13546_v54 = vand.u32 4294901760, %v9929_v51  ;;  %v7699_v30 = vpack.c.bf16 %v13553_v46, %v13552_v23  ;;  %v13564_v46 = vld [vmem:[#allocation29_spill] sm:$0xff] }
 0x13f   :  { %13536 = vst [vmem:[#allocation19_spill] sm:$0xff] %v10193_v44  ;;  %13539 = vst [vmem:[#allocation20_spill] sm:$0xff] %v10201_v63  ;;  %7892 = vmatpush3.bf16.msra.mxu0 %v7891_v4  ;;  %7694 = vmatprep.subr.bf16.mxu1 %v7693_v22  ;;  %v10223_v21 = vsub.f32 %v9934_v43, %v13548_v62  ;;  %v7897_v39 = vpack.c.bf16 %v10193_v44, %v10188_v49  ;;  %v13550_v4 = vand.u32 4294901760, %v9954_v35  ;;  %v13593_v26 = vld [vmem:[#allocation13_spill] sm:$0xff] }
 0x140   :  { %v10218_v48 = vsub.f32 %v9929_v51, %v13546_v54  ;;  %7894 = vmatprep.subr.bf16.mxu0 %v7893_v17  ;;  %v13554_v51 = vand.u32 4294901760, %v9959_v58  ;;  %v7899_v43 = vpack.c.bf16 %v10209_v45, %v10201_v63  ;;  %v13556_v17 = vld [vmem:[#allocation27_spill] sm:$0xff]  ;;  %v13557_v54 = vld [vmem:[#allocation28_spill] sm:$0xff] }
 0x141   :  { %13549 = vst [vmem:[#allocation21_spill] sm:$0xff] %v10223_v21  ;;  %v10230_v22 = vsub.f32 %v9954_v35, %v13550_v4  ;;  %v7701_v62 = vpack.c.bf16 %v13557_v54, %v13556_v17  ;;  %v13558_v35 = vand.u32 4294901760, %v9971_v55  ;;  %v13560_v4 = vand.u32 4294901760, %v9976_v34  ;;  %v13568_v54 = vld [vmem:[#allocation32_spill] sm:$0xff] }
 0x142   :  { %13547 = vst [vmem:[#allocation65_spill] sm:$0xff] %v10218_v48  ;;  %7696 = vmatpush3.bf16.msra.mxu1 %v7695_v9  ;;  %v10237_v31 = vsub.f32 %v9959_v58, %v13554_v51  ;;  %v7901_v58 = vpack.c.bf16 %v10223_v21, %v10218_v48  ;;  %v13565_v51 = vld [vmem:[#allocation30_spill] sm:$0xff]  ;;  %v13594_v61 = vand.u32 4294901760, %v10218_v48  ;;  %v13595_v27 = vand.u32 4294901760, %v10223_v21 }
 0x143   :  { %13551 = vst [vmem:[#allocation22_spill] sm:$0xff] %v10230_v22  ;;  %7896 = vmatpush3.bf16.msra.mxu0 %v7895_v7  ;;  %7698 = vmatprep.subr.bf16.mxu1 %v7697_v2  ;;  %v10246_v9 = vsub.f32 %v9971_v55, %v13558_v35  ;;  %v10251_v23 = vsub.f32 %v9976_v34, %v13560_v4  ;;  %v13562_v7 = vand.u32 4294901760, %v9995_v18  ;;  %v13571_v4 = vand.u32 4294901760, %v10037_v56 }
 0x144   :  { %13555 = vst [vmem:[#allocation23_spill] sm:$0xff] %v10237_v31  ;;  %7898 = vmatprep.subr.bf16.mxu0 %v7897_v39  ;;  %v7703_v17 = vpack.c.bf16 %v13565_v51, %v13564_v46  ;;  %v10265_v55 = vsub.f32 %v10007_v5, %v1601_v10  ;;  %v7903_v34 = vpack.c.bf16 %v10237_v31, %v10230_v22  ;;  %v13567_v39 = vld [vmem:[#allocation31_spill] sm:$0xff]  ;;  %v12964_v51 = vand.u32 4294901760, %v10085_v41 }
 0x145   :  { %13559 = vst [vmem:[#allocation24_spill] sm:$0xff] %v10246_v9  ;;  %13561 = vst [vmem:[#allocation25_spill] sm:$0xff] %v10251_v23  ;;  %v10258_v2 = vsub.f32 %v9995_v18, %v13562_v7  ;;  %v7705_v35 = vpack.c.bf16 %v13568_v54, %v13567_v39  ;;  %v13569_v18 = vand.u32 4294901760, %v10032_v36  ;;  %v10279_v7 = vsub.f32 %v10037_v56, %v13571_v4  ;;  %v13577_v46 = vld [vmem:[#allocation35_spill] sm:$0xff]  ;;  %v13578_v39 = vld [vmem:[#allocation36_spill] sm:$0xff] }
 0x146   :  { %7700 = vmatpush3.bf16.msra.mxu1 %v7699_v30  ;;  %13566 = vst [vmem:[#allocation27_spill] sm:$0xff] %v10265_v55  ;;  %v7905_v10 = vpack.c.bf16 %v10251_v23, %v10246_v9  ;;  %v10286_v5 = vsub.f32 %v10059_v53, %v1604_v3  ;;  %v12968_v3 = vand.u32 4294901760, %v9668_v38  ;;  %v13579_v54 = vld [vmem:[#allocation37_spill] sm:$0xff]  ;;  %v12952_v4 = vand.u32 4294901760, %v10115_v60 }
 0x147   :  { %13563 = vst [vmem:[#allocation26_spill] sm:$0xff] %v10258_v2  ;;  %7900 = vmatpush3.bf16.msra.mxu0 %v7899_v43  ;;  %7702 = vmatprep.subr.bf16.mxu1 %v7701_v62  ;;  %v10274_v30 = vsub.f32 %v10032_v36, %v13569_v18  ;;  %13572 = vst [vmem:[#allocation29_spill] sm:$0xff] %v10279_v7  ;;  %v7707_v43 = vpack.c.bf16 %v9526_v8, %v9521_v20  ;;  %v13575_v62 = vld [vmem:[#allocation33_spill] sm:$0xff]  ;;  %v12967_v20 = vand.u32 4294901760, %v9670_v57 }
 0x148   :  { %7902 = vmatprep.subr.bf16.mxu0 %v7901_v58  ;;  %13573 = vst [vmem:[#allocation30_spill] sm:$0xff] %v10286_v5  ;;  %v10293_v36 = vsub.f32 %v10064_v47, %v1607_v33  ;;  %v7907_v56 = vpack.c.bf16 %v10265_v55, %v10258_v2  ;;  %v7709_v58 = vpack.c.bf16 %v13575_v62, %v9535_v28  ;;  %v13576_v47 = vld [vmem:[#allocation34_spill] sm:$0xff]  ;;  %v13596_v6 = vand.u32 4294901760, %v10230_v22 }
 0x149   :  { %13570 = vst [vmem:[#allocation28_spill] sm:$0xff] %v10274_v30  ;;  %v7909_v53 = vpack.c.bf16 %v10279_v7, %v10274_v30  ;;  %v7711_v8 = vpack.c.bf16 %v9556_v12, %v9551_v13  ;;  %v7713_v28 = vpack.c.bf16 %v13577_v46, %v13576_v47  ;;  %v12962_v12 = vand.u32 4294901760, %v10105_v14  ;;  %v13583_v47 = vld [vmem:[#allocation42_spill] sm:$0xff]  ;;  %v13584_v46 = vld [vmem:[#allocation43_spill] sm:$0xff] }
 0x14a   :  { %7704 = vmatpush3.bf16.msra.mxu1 %v7703_v17  ;;  %13574 = vst [vmem:[#allocation31_spill] sm:$0xff] %v10293_v36  ;;  %v7911_v33 = vpack.c.bf16 %v10293_v36, %v10286_v5  ;;  %v12963_v17 = vand.u32 4294901760, %v10090_v37  ;;  %v12955_v13 = vand.u32 4294901760, %v10110_v24  ;;  %v7965_v29 = vpack.c.bf16 %v13595_v27, %v13594_v61  ;;  %v13634_v24 = vld [vmem:[#allocation44_spill] sm:$0xff] }
 0x14b   :  { %7904 = vmatpush3.bf16.msra.mxu0 %v7903_v34  ;;  %7706 = vmatprep.subr.bf16.mxu1 %v7705_v35  ;;  %v7945_v34 = vpack.c.bf16 %v12967_v20, %v12968_v3  ;;  %v7715_v35 = vpack.c.bf16 %v13579_v54, %v13578_v39  ;;  %v12961_v54 = vand.u32 4294901760, %v10142_v0  ;;  %v2432_v20 = vld [vmem:[%s12810_s7 + $0x38] sm:$0xff]  ;;  %v13598_v42 = vand.u32 4294901760, %v10246_v9 }
 0x14c   :  { %7906 = vmatprep.subr.bf16.mxu0 %v7905_v10  ;;  %v7947_v18 = vpack.c.bf16 %v12963_v17, %v12964_v51  ;;  %v12951_v10 = vand.u32 4294901760, %v10120_v1  ;;  %v2425_v17 = vld [vmem:[%s12810_s7] sm:$0xff]  ;;  %v2427_v51 = vld [vmem:[%s12810_s7 + $0x10] sm:$0xff]  ;;  %v2513_v15 = vand.u32 4294901760, %v2432_v20  ;;  %v13599_v27 = vand.u32 4294901760, %v10251_v23 }
 0x14d   :  { %v13600_v22 = vand.u32 4294901760, %v10258_v2  ;;  %v13603_v21 = vand.u32 4294901760, %v10279_v7  ;;  %v13611_v2 = vld [vmem:[#allocation15_spill] sm:$0xff] }
 0x14e   :  { %7708 = vmatpush3.bf16.msra.mxu1 %v7707_v43  ;;  %v13580_v43 = vld [vmem:[#allocation39_spill] sm:$0xff]  ;;  %v7951_v39 = vpack.c.bf16 %v12951_v10, %v12952_v4  ;;  %v12966_v10 = vand.u32 4294901760, %v10188_v49  ;;  %v12965_v4 = vand.u32 4294901760, %v10193_v44  ;;  %v7969_v61 = vpack.c.bf16 %v13599_v27, %v13598_v42  ;;  %v2433_v42 = vld [vmem:[%s12810_s7 + $0x40] sm:$0xff] }
 0x14f   :  { %7908 = vmatpush3.bf16.msra.mxu0 %v7907_v56  ;;  %7710 = vmatprep.subr.bf16.mxu1 %v7709_v58  ;;  %v13581_v56 = vld [vmem:[#allocation41_spill] sm:$0xff]  ;;  %v7949_v58 = vpack.c.bf16 %v12955_v13, %v12962_v12  ;;  %v2428_v12 = vld [vmem:[%s12810_s7 + $0x18] sm:$0xff]  ;;  %v13592_v13 = vand.u32 4294901760, %v10209_v45  ;;  %v13604_v45 = vand.u32 4294901760, %v10286_v5  ;;  %v2437_v49 = vld [vmem:[%s12810_s7 + $0x60] sm:$0xff] }
 0x150   :  { %7910 = vmatprep.subr.bf16.mxu0 %v7909_v53  ;;  %v7717_v62 = vpack.c.bf16 %v13581_v56, %v13580_v43  ;;  %v12954_v53 = vand.u32 4294901760, %v10128_v11  ;;  %v12956_v43 = vand.u32 4294901760, %v10150_v52  ;;  %v12957_v56 = vand.u32 4294901760, %v10166_v40  ;;  %v13619_v40 = vld [vmem:[#allocation16_spill] sm:$0xff] }
 0x151   :  { %v2527_v0 = vand.u32 4294901760, %v2437_v49 }
 0x152   :  { %7712 = vmatpush3.bf16.msra.mxu1 %v7711_v8  ;;  %v12953_v8 = vand.u32 4294901760, %v10133_v50 }
 0x153   :  { %7912 = vmatpush3.bf16.msra.mxu0 %v7911_v33  ;;  %7714 = vmatprep.subr.bf16.mxu1 %v7713_v28  ;;  %v13582_v33 = vld [vmem:[#allocation57_spill] sm:$0xff]  ;;  %v7719_v28 = vpack.c.bf16 %v13584_v46, %v13583_v47  ;;  %v12960_v47 = vand.u32 4294901760, %v10171_v19  ;;  %v12959_v46 = vand.u32 4294901760, %v10179_v59  ;;  %v10551_v60 = vsub.f32 %v2437_v49, %v2527_v0 }
 0x154   :  { %7946 = vmatprep.subr.bf16.mxu0 %v7945_v34  ;;  %v13585_v34 = vld [vmem:[#allocation55_spill] sm:$0xff] }
 0x155   :  { %13633 = vst [vmem:[#allocation97_spill] sm:$0xff] %v10551_v60 }
 0x156   :  { %2038 = vmatmul.mubr.f32.vlgmr.msra.gmra.mrb[6].mxu0 %v13582_v33  ;;  %7716 = vmatpush3.bf16.msra.mxu1 %v7715_v35  ;;  %v7953_v35 = vpack.c.bf16 %v12953_v8, %v12954_v53  ;;  %v2429_v53 = vld [vmem:[%s12810_s7 + $0x20] sm:$0xff] }
 0x157   :  { %7948 = vmatpush3.bf16.msra.mxu0 %v7947_v18  ;;  %2312 = vmatprep.mubr.f32.mxu0 %v13585_v34  ;;  %v12958_v18 = vand.u32 4294901760, %v10161_v32 }
 0x158   :  { %7718 = vmatprep.subr.bf16.mxu1 %v7717_v62  ;;  %7950 = vmatprep.subr.bf16.mxu0 %v7949_v58  ;;  %v13586_v62 = vld [vmem:[#allocation9_spill] sm:$0xff]  ;;  %v7955_v58 = vpack.c.bf16 %v12956_v43, %v12961_v54  ;;  %v13587_v43 = vld [vmem:[#allocation10_spill] sm:$0xff]  ;;  %v2503_v54 = vand.u32 4294901760, %v2425_v17 }
 0x159   :  { %v7957_v8 = vpack.c.bf16 %v12957_v56, %v12958_v18  ;;  %v13588_v56 = vld [vmem:[#allocation62_spill] sm:$0xff]  ;;  %v7961_v18 = vpack.c.bf16 %v12965_v4, %v12966_v10  ;;  %v13589_v4 = vld [vmem:[#allocation11_spill] sm:$0xff]  ;;  %v2505_v10 = vand.u32 4294901760, %v2428_v12 }
 0x15a   :  { %7720 = vmatpush3.bf16.msra.mxu1 %v7719_v28  ;;  %v7959_v28 = vpack.c.bf16 %v12959_v46, %v12960_v47  ;;  %v13591_v46 = vand.u32 4294901760, %v10201_v63  ;;  %v10476_v23 = vsub.f32 %v2425_v17, %v2503_v54  ;;  %v2444_v17 = vld [vmem:[%s12810_s7 + $0x98] sm:$0xff] }
 0x15b   :  { %7952 = vmatpush3.bf16.msra.mxu0 %v7951_v39  ;;  %7722 = vmatprep.subr.bf16.mxu1 %v13586_v62  ;;  %v13590_v39 = vld [vmem:[#allocation12_spill] sm:$0xff]  ;;  %v10473_v5 = vsub.f32 %v2428_v12, %v2505_v10  ;;  %v2519_v12 = vand.u32 4294901760, %v2433_v42 }
 0x15c   :  { %7954 = vmatprep.subr.bf16.mxu0 %v7953_v35  ;;  %v2426_v35 = vld [vmem:[%s12810_s7 + $0x8] sm:$0xff]  ;;  %v7963_v47 = vpack.c.bf16 %v13592_v13, %v13591_v46  ;;  %v13597_v13 = vand.u32 4294901760, %v10237_v31  ;;  %v13602_v31 = vand.u32 4294901760, %v10274_v30  ;;  %13612 = vst [vmem:[#allocation36_spill] sm:$0xff] %v10476_v23  ;;  %v13664_v23 = vld [vmem:[#allocation50_spill] sm:$0xff] }
 0x15d   :  { %1135 = vmatmul.mubr.f32.vlgmr.msra.gmra.mrb[4].mxu1 %v13582_v33  ;;  %v2501_v3 = vand.u32 4294901760, %v2426_v35  ;;  %v2431_v33 = vld [vmem:[%s12810_s7 + $0x30] sm:$0xff]  ;;  %13610 = vst [vmem:[#allocation35_spill] sm:$0xff] %v10473_v5  ;;  %v10526_v11 = vsub.f32 %v2433_v42, %v2519_v12  ;;  %v2450_v42 = vld [vmem:[%s12810_s7 + $0xc8] sm:$0xff] }
 0x15e   :  { %7724 = vmatpush3.bf16.msra.mxu1 %v13587_v43  ;;  %1239 = vmatprep.mubr.f32.mxu1 %v13588_v56  ;;  %v7967_v46 = vpack.c.bf16 %v13597_v13, %v13596_v6  ;;  %v2434_v56 = vld [vmem:[%s12810_s7 + $0x48] sm:$0xff]  ;;  %v13601_v6 = vand.u32 4294901760, %v10265_v55  ;;  %v10446_v48 = vpack.c.bf16 %v13603_v21, %v13602_v31  ;;  %v2515_v30 = vand.u32 4294901760, %v2431_v33  ;;  %v2435_v21 = vld [vmem:[%s12810_s7 + $0x50] sm:$0xff] }
 0x15f   :  { %7956 = vmatpush3.bf16.msra.mxu0 %v7955_v58  ;;  %7726 = vmatprep.subr.bf16.mxu1 %v13589_v4  ;;  %v2430_v58 = vld [vmem:[%s12810_s7 + $0x28] sm:$0xff]  ;;  %v10457_v27 = vpack.c.bf16 %v2505_v10, %v2501_v3  ;;  %v2517_v7 = vand.u32 4294901760, %v2434_v56  ;;  %v2523_v10 = vand.u32 4294901760, %v2435_v21  ;;  %13626 = vst [vmem:[#allocation91_spill] sm:$0xff] %v10526_v11 }
 0x160   :  { %7958 = vmatprep.subr.bf16.mxu0 %v7957_v8  ;;  %v2507_v8 = vand.u32 4294901760, %v2427_v51  ;;  %v2509_v25 = vand.u32 4294901760, %v2430_v58  ;;  %v10440_v13 = vpack.c.bf16 %v13601_v6, %v13600_v22  ;;  %v2511_v6 = vand.u32 4294901760, %v2429_v53  ;;  %v2438_v31 = vld [vmem:[%s12810_s7 + $0x68] sm:$0xff] }
 0x161   :  { %13606 = vst [vmem:[#allocation32_spill] sm:$0xff] %v10457_v27  ;;  %v10506_v32 = vsub.f32 %v2431_v33, %v2515_v30 }
 0x162   :  { %7728 = vmatpush3.bf16.msra.mxu1 %v13590_v39  ;;  %v10459_v22 = vpack.c.bf16 %v2507_v8, %v2503_v54  ;;  %v10478_v63 = vsub.f32 %v2427_v51, %v2507_v8  ;;  %v10480_v44 = vpack.c.bf16 %v2513_v15, %v2509_v25  ;;  %v2442_v51 = vld [vmem:[%s12810_s7 + $0x88] sm:$0xff]  ;;  %v10494_v54 = vsub.f32 %v2430_v58, %v2509_v25 }
 0x163   :  { %7960 = vmatpush3.bf16.msra.mxu0 %v7959_v28  ;;  %7730 = vmatprep.subr.bf16.mxu1 %v13593_v26  ;;  %v2436_v28 = vld [vmem:[%s12810_s7 + $0x58] sm:$0xff]  ;;  %v10496_v8 = vsub.f32 %v2432_v20, %v2513_v15  ;;  %v10498_v59 = vpack.c.bf16 %v2515_v30, %v2511_v6  ;;  %v10500_v19 = vsub.f32 %v2429_v53, %v2511_v6  ;;  %v2443_v15 = vld [vmem:[%s12810_s7 + $0x90] sm:$0xff]  ;;  %v2446_v25 = vld [vmem:[%s12810_s7 + $0xa8] sm:$0xff]  ;;  %v2533_v58 = vand.u32 4294901760, %v2442_v51 }
 0x164   :  { %7962 = vmatprep.subr.bf16.mxu0 %v7961_v18  ;;  %v13605_v18 = vand.u32 4294901760, %v10293_v36  ;;  %13607 = vst [vmem:[#allocation33_spill] sm:$0xff] %v10459_v22  ;;  %v10471_v36 = vsub.f32 %v2426_v35, %v2501_v3  ;;  %v2521_v55 = vand.u32 4294901760, %v2436_v28  ;;  %13613 = vst [vmem:[#allocation37_spill] sm:$0xff] %v10478_v63  ;;  %v2439_v3 = vld [vmem:[%s12810_s7 + $0x70] sm:$0xff]  ;;  %v2448_v20 = vld [vmem:[%s12810_s7 + $0xb8] sm:$0xff]  ;;  %v10520_v30 = vsub.f32 %v2434_v56, %v2517_v7 }
 0x165   :  { %13614 = vst [vmem:[#allocation39_spill] sm:$0xff] %v10480_v44  ;;  %13615 = vst [vmem:[#allocation41_spill] sm:$0xff] %v10494_v54  ;;  %v2531_v50 = vand.u32 4294901760, %v2439_v3  ;;  %v13622_v53 = vld [vmem:[#allocation38_spill] sm:$0xff]  ;;  %v2537_v6 = vand.u32 4294901760, %v2444_v17  ;;  %v2539_v56 = vand.u32 4294901760, %v2443_v15 }
 0x166   :  { %v10452_v9 = vpack.c.bf16 %v13605_v18, %v13604_v45  ;;  %v2440_v45 = vld [vmem:[%s12810_s7 + $0x78] sm:$0xff]  ;;  %v13608_v18 = vld [vmem:[#allocation14_spill] sm:$0xff]  ;;  %13609 = vst [vmem:[#allocation34_spill] sm:$0xff] %v10471_v36  ;;  %13616 = vst [vmem:[#allocation42_spill] sm:$0xff] %v10496_v8  ;;  %v10508_v52 = vpack.c.bf16 %v2521_v55, %v2517_v7  ;;  %v10522_v33 = vsub.f32 %v2436_v28, %v2521_v55  ;;  %v2541_v28 = vand.u32 4294901760, %v2446_v25 }
 0x167   :  { %7732 = vmatpush3.bf16.msra.mxu1 %v13608_v18  ;;  %7964 = vmatpush3.bf16.msra.mxu0 %v7963_v47  ;;  %v2525_v47 = vand.u32 4294901760, %v2438_v31  ;;  %v2529_v35 = vand.u32 4294901760, %v2440_v45  ;;  %13617 = vst [vmem:[#allocation43_spill] sm:$0xff] %v10498_v59  ;;  %13618 = vst [vmem:[#allocation55_spill] sm:$0xff] %v10500_v19  ;;  %v2447_v55 = vld [vmem:[%s12810_s7 + $0xb0] sm:$0xff]  ;;  %v10549_v1 = vpack.c.bf16 %v2531_v50, %v2527_v0  ;;  %v13658_v63 = vld [vmem:[#allocation49_spill] sm:$0xff] }
 0x168   :  { %7734 = vmatprep.subr.bf16.mxu1 %v13611_v2  ;;  %7966 = vmatprep.subr.bf16.mxu0 %v7965_v29  ;;  %v2441_v29 = vld [vmem:[%s12810_s7 + $0x80] sm:$0xff]  ;;  %13620 = vst [vmem:[#allocation9_spill] sm:$0xff] %v10506_v32  ;;  %13621 = vst [vmem:[#allocation10_spill] sm:$0xff] %v10508_v52  ;;  %v10528_v2 = vsub.f32 %v2435_v21, %v2523_v10  ;;  %v2452_v21 = vld [vmem:[%s12810_s7 + $0xd8] sm:$0xff]  ;;  %v10555_v14 = vsub.f32 %v2439_v3, %v2531_v50  ;;  %v2549_v50 = vand.u32 4294901760, %v2450_v42 }
 0x169   :  { %13623 = vst [vmem:[#allocation11_spill] sm:$0xff] %v10520_v30  ;;  %13624 = vst [vmem:[#allocation89_spill] sm:$0xff] %v10522_v33  ;;  %v10530_v18 = vpack.c.bf16 %v2529_v35, %v2525_v47  ;;  %v2535_v7 = vand.u32 4294901760, %v2441_v29  ;;  %v10557_v26 = vpack.c.bf16 %v2537_v6, %v2533_v58  ;;  %v10566_v0 = vsub.f32 %v2442_v51, %v2533_v58  ;;  %v13643_v51 = vld [vmem:[#allocation45_spill] sm:$0xff]  ;;  %v2468_v8 = vld [vmem:[%s12810_s7 + $0x158] sm:$0xff] }
 0x16a   :  { %13627 = vst [vmem:[#allocation92_spill] sm:$0xff] %v10528_v2  ;;  %13632 = vst [vmem:[#allocation96_spill] sm:$0xff] %v10549_v1  ;;  %v10568_v49 = vsub.f32 %v2444_v17, %v2537_v6  ;;  %v10585_v17 = vsub.f32 %v2446_v25, %v2541_v28  ;;  %v2585_v54 = vand.u32 4294901760, %v2468_v8  ;;  %v13676_v19 = vand.u32 4294901760, %v10090_v37 }
 0x16b   :  { %7736 = vmatpush3.bf16.msra.mxu1 %v13619_v40  ;;  %7968 = vmatpush3.bf16.msra.mxu0 %v7967_v46  ;;  %v10524_v40 = vpack.c.bf16 %v2523_v10, %v2519_v12  ;;  %13628 = vst [vmem:[#allocation93_spill] sm:$0xff] %v10530_v18  ;;  %v2445_v46 = vld [vmem:[%s12810_s7 + $0xa0] sm:$0xff]  ;;  %v10545_v10 = vsub.f32 %v2438_v31, %v2525_v47  ;;  %13635 = vst [vmem:[#allocation98_spill] sm:$0xff] %v10555_v14  ;;  %v2547_v18 = vand.u32 4294901760, %v2447_v55  ;;  %v13689_v14 = vld [vmem:[#allocation79_spill] sm:$0xff] }
 0x16c   :  { %7738 = vmatprep.subr.bf16.mxu1 %v13622_v53  ;;  %7970 = vmatprep.subr.bf16.mxu0 %v7969_v61  ;;  %v2545_v61 = vand.u32 4294901760, %v2448_v20  ;;  %v13629_v12 = vld [vmem:[#allocation40_spill] sm:$0xff]  ;;  %v10547_v53 = vsub.f32 %v2440_v45, %v2529_v35  ;;  %13636 = vst [vmem:[#allocation99_spill] sm:$0xff] %v10557_v26  ;;  %v2543_v39 = vand.u32 4294901760, %v2445_v46  ;;  %v2451_v45 = vld [vmem:[%s12810_s7 + $0xd0] sm:$0xff]  ;;  %13637 = vst [vmem:[#allocation100_spill] sm:$0xff] %v10566_v0 }
 0x16d   :  { %13625 = vst [vmem:[#allocation90_spill] sm:$0xff] %v10524_v40  ;;  %13630 = vst [vmem:[#allocation94_spill] sm:$0xff] %v10545_v10  ;;  %v2449_v31 = vld [vmem:[%s12810_s7 + $0xc0] sm:$0xff]  ;;  %v10570_v3 = vpack.c.bf16 %v2539_v56, %v2535_v7  ;;  %v10572_v47 = vsub.f32 %v2441_v29, %v2535_v7  ;;  %v10574_v35 = vsub.f32 %v2443_v15, %v2539_v56  ;;  %v2555_v6 = vand.u32 4294901760, %v2451_v45  ;;  %v2455_v7 = vld [vmem:[%s12810_s7 + $0xf0] sm:$0xff] }
 0x16e   :  { %13631 = vst [vmem:[#allocation95_spill] sm:$0xff] %v10547_v53  ;;  %13638 = vst [vmem:[#allocation101_spill] sm:$0xff] %v10568_v49  ;;  %v10587_v58 = vsub.f32 %v2448_v20, %v2545_v61  ;;  %v2551_v29 = vand.u32 4294901760, %v2449_v31  ;;  %v2453_v15 = vld [vmem:[%s12810_s7 + $0xe0] sm:$0xff]  ;;  %v13646_v56 = vld [vmem:[#allocation46_spill] sm:$0xff]  ;;  %v10599_v25 = vsub.f32 %v2445_v46, %v2543_v39  ;;  %v10601_v20 = vsub.f32 %v2447_v55, %v2547_v18 }
 0x16f   :  { %7740 = vmatpush3.bf16.msra.mxu1 %v13629_v12  ;;  %7972 = vmatpush3.bf16.msra.mxu0 %v10440_v13  ;;  %v2553_v13 = vand.u32 4294901760, %v2452_v21  ;;  %13639 = vst [vmem:[#allocation102_spill] sm:$0xff] %v10570_v3  ;;  %13640 = vst [vmem:[#allocation103_spill] sm:$0xff] %v10572_v47  ;;  %v2454_v12 = vld [vmem:[%s12810_s7 + $0xe8] sm:$0xff]  ;;  %v10620_v55 = vsub.f32 %v2450_v42, %v2549_v50  ;;  %v13655_v46 = vld [vmem:[#allocation67_spill] sm:$0xff]  ;;  %v13690_v60 = vand.u32 4294901760, %v13689_v14 }
 0x170   :  { %7742 = vmatprep.subr.bf16.mxu1 %v13634_v24  ;;  %7974 = vmatprep.subr.bf16.mxu0 %v10446_v48  ;;  %13641 = vst [vmem:[#allocation104_spill] sm:$0xff] %v10574_v35  ;;  %v10576_v24 = vpack.c.bf16 %v2545_v61, %v2541_v28  ;;  %v2456_v48 = vld [vmem:[%s12810_s7 + $0xf8] sm:$0xff]  ;;  %13644 = vst [vmem:[#allocation106_spill] sm:$0xff] %v10585_v17  ;;  %v2458_v28 = vld [vmem:[%s12810_s7 + $0x108] sm:$0xff]  ;;  %v10632_v42 = vsub.f32 %v2449_v31, %v2551_v29 }
 0x171   :  { %13645 = vst [vmem:[#allocation107_spill] sm:$0xff] %v10587_v58  ;;  %13648 = vst [vmem:[#allocation109_spill] sm:$0xff] %v10599_v25  ;;  %v2460_v61 = vld [vmem:[%s12810_s7 + $0x118] sm:$0xff]  ;;  %v10626_v25 = vsub.f32 %v2452_v21, %v2553_v13  ;;  %v10628_v58 = vpack.c.bf16 %v2555_v6, %v2551_v29  ;;  %v2565_v17 = vand.u32 4294901760, %v2458_v28  ;;  %v1810_v53 = vsub.f32 %v13689_v14, %v13690_v60  ;;  %v13693_v14 = vld [vmem:[#allocation80_spill] sm:$0xff] }
 0x172   :  { %13642 = vst [vmem:[#allocation105_spill] sm:$0xff] %v10576_v24  ;;  %v10597_v24 = vpack.c.bf16 %v2547_v18, %v2543_v39  ;;  %13649 = vst [vmem:[#allocation110_spill] sm:$0xff] %v10601_v20  ;;  %v2457_v39 = vld [vmem:[%s12810_s7 + $0x100] sm:$0xff]  ;;  %v2459_v18 = vld [vmem:[%s12810_s7 + $0x110] sm:$0xff]  ;;  %v2563_v20 = vand.u32 4294901760, %v2455_v7  ;;  %v2569_v3 = vand.u32 4294901760, %v2460_v61 }
 0x173   :  { %7744 = vmatpush3.bf16.msra.mxu1 %v13643_v51  ;;  %7976 = vmatpush3.bf16.msra.mxu0 %v10452_v9  ;;  %v10610_v51 = vpack.c.bf16 %v2553_v13, %v2549_v50  ;;  %v2557_v9 = vand.u32 4294901760, %v2454_v12  ;;  %13651 = vst [vmem:[#allocation112_spill] sm:$0xff] %v10620_v55  ;;  %13654 = vst [vmem:[#allocation113_spill] sm:$0xff] %v10628_v58  ;;  %v10634_v50 = vsub.f32 %v2451_v45, %v2555_v6  ;;  %v2464_v31 = vld [vmem:[%s12810_s7 + $0x138] sm:$0xff]  ;;  %v13697_v49 = vld [vmem:[#allocation14_spill] sm:$0xff] }
 0x174   :  { %7746 = vmatprep.subr.bf16.mxu1 %v13646_v56  ;;  %13647 = vst [vmem:[#allocation108_spill] sm:$0xff] %v10597_v24  ;;  %8010 = vmatprep.subr.bf16.mxu0 %v10457_v27  ;;  %v2561_v56 = vand.u32 4294901760, %v2456_v48  ;;  %v2559_v24 = vand.u32 4294901760, %v2453_v15  ;;  %13656 = vst [vmem:[#allocation67_spill] sm:$0xff] %v10632_v42  ;;  %v2567_v5 = vand.u32 4294901760, %v2457_v39  ;;  %v2571_v27 = vand.u32 4294901760, %v2459_v18 }
 0x175   :  { %13650 = vst [vmem:[#allocation111_spill] sm:$0xff] %v10610_v51  ;;  %v13652_v51 = vld [vmem:[#allocation48_spill] sm:$0xff]  ;;  %13657 = vst [vmem:[#allocation114_spill] sm:$0xff] %v10634_v50  ;;  %v10640_v13 = vsub.f32 %v2454_v12, %v2557_v9  ;;  %v10665_v45 = vsub.f32 %v2455_v7, %v2563_v20  ;;  %v13694_v60 = vand.u32 4294901760, %v13693_v14 }
 0x176   :  { %2314 = vmatmul.mubr.f32.vlgmr.msra.gmra.mrb[8].mxu0 %v13537_v16  ;;  %13653 = vst [vmem:[#allocation48_spill] sm:$0xff] %v10626_v25  ;;  %v10638_v21 = vpack.c.bf16 %v2561_v56, %v2557_v9  ;;  %v10650_v29 = vsub.f32 %v2456_v48, %v2561_v56  ;;  %v10652_v6 = vpack.c.bf16 %v2563_v20, %v2559_v24  ;;  %v2461_v12 = vld [vmem:[%s12810_s7 + $0x120] sm:$0xff]  ;;  %v2463_v9 = vld [vmem:[%s12810_s7 + $0x130] sm:$0xff]  ;;  %v13737_v25 = vld [vmem:[#allocation17_spill] sm:$0xff] }
 0x177   :  { %7748 = vmatpush3.bf16.msra.mxu1 %v13652_v51  ;;  %8012 = vmatpush1.bf16.msra.mxu0 %v10459_v22  ;;  %13660 = vst [vmem:[#allocation115_spill] sm:$0xff] %v10640_v13  ;;  %v2462_v22 = vld [vmem:[%s12810_s7 + $0x128] sm:$0xff]  ;;  %13665 = vst [vmem:[#allocation50_spill] sm:$0xff] %v10665_v45  ;;  %v10667_v48 = vpack.c.bf16 %v2569_v3, %v2565_v17  ;;  %v10669_v56 = vsub.f32 %v2458_v28, %v2565_v17  ;;  %v2577_v28 = vand.u32 4294901760, %v2464_v31  ;;  %v13735_v50 = vld [vmem:[#allocation88_spill] sm:$0xff] }
 0x178   :  { %2634 = vmatprep.mubr.f32.mxu0 %v13655_v46  ;;  %7750 = vmatprep.subr.bf16.mxu1 %v13658_v63  ;;  %13659 = vst [vmem:[#allocation49_spill] sm:$0xff] %v10638_v21  ;;  %13661 = vst [vmem:[#allocation116_spill] sm:$0xff] %v10650_v29  ;;  %v10654_v46 = vsub.f32 %v2453_v15, %v2559_v24  ;;  %v10671_v24 = vsub.f32 %v2460_v61, %v2569_v3  ;;  %v2466_v15 = vld [vmem:[%s12810_s7 + $0x148] sm:$0xff]  ;;  %v2573_v17 = vand.u32 4294901760, %v2462_v22 }
 0x179   :  { %8014 = vmatprep.subr.bf16.mxu0 %v10480_v44  ;;  %13662 = vst [vmem:[#allocation117_spill] sm:$0xff] %v10652_v6  ;;  %13666 = vst [vmem:[#allocation119_spill] sm:$0xff] %v10667_v48  ;;  %v10681_v7 = vpack.c.bf16 %v2571_v27, %v2567_v5  ;;  %v10683_v20 = vsub.f32 %v2457_v39, %v2567_v5  ;;  %v2575_v3 = vand.u32 4294901760, %v2461_v12  ;;  %v2579_v61 = vand.u32 4294901760, %v2463_v9  ;;  %v2482_v45 = vld [vmem:[%s12810_s7 + $0x1c8] sm:$0xff] }
 0x17a   :  { %13663 = vst [vmem:[#allocation118_spill] sm:$0xff] %v10654_v46  ;;  %13667 = vst [vmem:[#allocation120_spill] sm:$0xff] %v10669_v56  ;;  %v13671_v44 = vand.u32 4294901760, %v9668_v38  ;;  %v2581_v39 = vand.u32 4294901760, %v2466_v15  ;;  %v10699_v36 = vsub.f32 %v2459_v18, %v2571_v27  ;;  %v2470_v27 = vld [vmem:[%s12810_s7 + $0x168] sm:$0xff]  ;;  %v1691_v10 = vsub.f32 %v13693_v14, %v13694_v60 }
 0x17b   :  { %7752 = vmatpush3.bf16.msra.mxu1 %v13664_v23  ;;  %13668 = vst [vmem:[#allocation121_spill] sm:$0xff] %v10671_v24  ;;  %8016 = vmatpush1.bf16.msra.mxu0 %v10498_v59  ;;  %13669 = vst [vmem:[#allocation122_spill] sm:$0xff] %v10681_v7  ;;  %v13672_v59 = vld [vmem:[#allocation61_spill] sm:$0xff]  ;;  %v10726_v18 = vsub.f32 %v2461_v12, %v2575_v3  ;;  %v13736_v42 = vand.u32 4294901760, %v13735_v50 }
 0x17c   :  { %7786 = vmatprep.subr.bf16.mxu1 %v13586_v62  ;;  %13670 = vst [vmem:[#allocation123_spill] sm:$0xff] %v10683_v20  ;;  %8018 = vmatprep.subr.bf16.mxu0 %v10508_v52  ;;  %v1789_v32 = vsub.f32 %v9668_v38, %v13671_v44  ;;  %v13673_v62 = vand.u32 4294901760, %v9670_v57  ;;  %13674 = vst [vmem:[#allocation124_spill] sm:$0xff] %v10699_v36  ;;  %v13675_v38 = vand.u32 4294901760, %v10085_v41  ;;  %v1692_v35 = vand.u32 4294901760, %v1691_v10  ;;  %v13718_v10 = vld [vmem:[#allocation38_spill] sm:$0xff] }
 0x17d   :  { %13682 = vst [vmem:[#allocation129_spill] sm:$0xff] %v10726_v18  ;;  %v13723_v30 = vld [vmem:[#allocation111_spill] sm:$0xff] }
 0x17e   :  { %1243 = vmatmul.mubr.f32.vlgmr.msra.gmra.mrb[6].mxu1 %v13672_v59  ;;  %v1796_v5 = vsub.f32 %v9670_v57, %v13673_v62  ;;  %v1677_v44 = vsub.f32 %v10085_v41, %v13675_v38  ;;  %v1684_v59 = vsub.f32 %v10090_v37, %v13676_v19  ;;  %v10709_v57 = vpack.c.bf16 %v2577_v28, %v2573_v17  ;;  %v2467_v41 = vld [vmem:[%s12810_s7 + $0x150] sm:$0xff]  ;;  %v13679_v37 = vld [vmem:[#allocation93_spill] sm:$0xff] }
 0x17f   :  { %7788 = vmatpush3.bf16.msra.mxu1 %v13587_v43  ;;  %1513 = vmatprep.mubr.f32.mxu1 %v13585_v34  ;;  %v10711_v62 = vsub.f32 %v2462_v22, %v2573_v17  ;;  %v2465_v43 = vld [vmem:[%s12810_s7 + $0x140] sm:$0xff]  ;;  %v10722_v19 = vsub.f32 %v2464_v31, %v2577_v28  ;;  %v10730_v17 = vsub.f32 %v2463_v9, %v2579_v61  ;;  %v1790_v38 = vand.u32 4294901760, %v1789_v32  ;;  %v2472_v31 = vld [vmem:[%s12810_s7 + $0x178] sm:$0xff]  ;;  %v13686_v32 = vld [vmem:[#allocation13_spill] sm:$0xff] }
 0x180   :  { %8020 = vmatpush1.bf16.msra.mxu0 %v10524_v40  ;;  %7790 = vmatprep.subr.bf16.mxu1 %v13589_v4  ;;  %13677 = vst [vmem:[#allocation125_spill] sm:$0xff] %v10709_v57  ;;  %v10724_v4 = vpack.c.bf16 %v2579_v61, %v2575_v3  ;;  %v1797_v52 = vand.u32 4294901760, %v1796_v5  ;;  %v10732_v40 = vpack.c.bf16 %v2585_v54, %v2581_v39  ;;  %v13685_v28 = vld [vmem:[#allocation12_spill] sm:$0xff]  ;;  %v1678_v12 = vand.u32 4294901760, %v1677_v44  ;;  %v13687_v9 = vld [vmem:[#allocation78_spill] sm:$0xff] }
 0x181   :  { %13678 = vst [vmem:[#allocation126_spill] sm:$0xff] %v10711_v62  ;;  %8022 = vmatprep.subr.bf16.mxu0 %v13679_v37  ;;  %13680 = vst [vmem:[#allocation127_spill] sm:$0xff] %v10722_v19  ;;  %v1685_v3 = vand.u32 4294901760, %v1684_v59  ;;  %v2583_v37 = vand.u32 4294901760, %v2465_v43  ;;  %v2587_v22 = vand.u32 4294901760, %v2467_v41  ;;  %v13688_v61 = vand.u32 4294901760, %v13687_v9 }
 0x182   :  { %13681 = vst [vmem:[#allocation128_spill] sm:$0xff] %v10724_v4  ;;  %13683 = vst [vmem:[#allocation130_spill] sm:$0xff] %v10730_v17  ;;  %v10752_v59 = vsub.f32 %v2466_v15, %v2581_v39  ;;  %v2589_v44 = vand.u32 4294901760, %v2470_v27 }
 0x183   :  { %13684 = vst [vmem:[#allocation131_spill] sm:$0xff] %v10732_v40  ;;  %7792 = vmatpush3.bf16.msra.mxu1 %v13685_v28  ;;  %v1803_v5 = vsub.f32 %v13687_v9, %v13688_v61  ;;  %v2593_v28 = vand.u32 4294901760, %v2472_v31  ;;  %v10759_v61 = vpack.c.bf16 %v1797_v52, %v1790_v38  ;;  %v10770_v0 = vpack.c.bf16 %v1685_v3, %v1678_v12  ;;  %v13702_v38 = vld [vmem:[#allocation15_spill] sm:$0xff]  ;;  %v13706_v12 = vld [vmem:[#allocation82_spill] sm:$0xff] }
 0x184   :  { %8024 = vmatpush1.bf16.msra.mxu0 %v10549_v1  ;;  %7794 = vmatprep.subr.bf16.mxu1 %v13686_v32  ;;  %13691 = vst [vmem:[#allocation12_spill] sm:$0xff] %v10752_v59  ;;  %v2469_v32 = vld [vmem:[%s12810_s7 + $0x160] sm:$0xff]  ;;  %v10761_v1 = vsub.f32 %v2468_v8, %v2585_v54  ;;  %v10772_v2 = vpack.c.bf16 %v2587_v22, %v2583_v37  ;;  %v2471_v54 = vld [vmem:[%s12810_s7 + $0x170] sm:$0xff]  ;;  %v13707_v3 = vand.u32 4294901760, %v13706_v12 }
 0x185   :  { %8026 = vmatprep.subr.bf16.mxu0 %v10557_v26  ;;  %v13695_v26 = vld [vmem:[#allocation81_spill] sm:$0xff]  ;;  %v10774_v11 = vsub.f32 %v2465_v43, %v2583_v37  ;;  %v10776_v52 = vsub.f32 %v2467_v41, %v2587_v22  ;;  %v13701_v8 = vld [vmem:[#allocation102_spill] sm:$0xff]  ;;  %v1804_v14 = vand.u32 4294901760, %v1803_v5  ;;  %v10783_v60 = vsub.f32 %v2470_v27, %v2589_v44  ;;  %v2476_v41 = vld [vmem:[%s12810_s7 + $0x198] sm:$0xff] }
 0x186   :  { %13692 = vst [vmem:[#allocation13_spill] sm:$0xff] %v10761_v1  ;;  %v13696_v15 = vand.u32 4294901760, %v13695_v26  ;;  %13698 = vst [vmem:[#allocation78_spill] sm:$0xff] %v10772_v2  ;;  %v2474_v43 = vld [vmem:[%s12810_s7 + $0x188] sm:$0xff]  ;;  %v10792_v22 = vpack.c.bf16 %v2593_v28, %v2589_v44  ;;  %v1817_v5 = vsub.f32 %v13706_v12, %v13707_v3  ;;  %v2595_v33 = vand.u32 4294901760, %v2471_v54 }
 0x187   :  { %7796 = vmatpush3.bf16.msra.mxu1 %v13697_v49  ;;  %13699 = vst [vmem:[#allocation79_spill] sm:$0xff] %v10774_v11  ;;  %13700 = vst [vmem:[#allocation80_spill] sm:$0xff] %v10776_v52  ;;  %v2591_v49 = vand.u32 4294901760, %v2469_v32  ;;  %v13704_v37 = vld [vmem:[#allocation105_spill] sm:$0xff]  ;;  %v10805_v44 = vsub.f32 %v2472_v31, %v2593_v28  ;;  %v2597_v12 = vand.u32 4294901760, %v2474_v43  ;;  %v2601_v3 = vand.u32 4294901760, %v2476_v41 }
 0x188   :  { %v1698_v39 = vsub.f32 %v13695_v26, %v13696_v15  ;;  %8028 = vmatpush1.bf16.msra.mxu0 %v13701_v8  ;;  %7798 = vmatprep.subr.bf16.mxu1 %v13702_v38  ;;  %v1811_v26 = vand.u32 4294901760, %v1810_v53  ;;  %13703 = vst [vmem:[#allocation81_spill] sm:$0xff] %v10783_v60  ;;  %13705 = vst [vmem:[#allocation14_spill] sm:$0xff] %v10792_v22  ;;  %v13708_v53 = vld [vmem:[#allocation83_spill] sm:$0xff]  ;;  %v13719_v8 = vld [vmem:[#allocation84_spill] sm:$0xff]  ;;  %v1818_v9 = vand.u32 4294901760, %v1817_v5 }
 0x189   :  { %8030 = vmatprep.subr.bf16.mxu0 %v13704_v37  ;;  %v13709_v27 = vand.u32 4294901760, %v13708_v53  ;;  %v13714_v37 = vld [vmem:[#allocation16_spill] sm:$0xff]  ;;  %13715 = vst [vmem:[#allocation15_spill] sm:$0xff] %v10805_v44  ;;  %v10807_v22 = vsub.f32 %v2469_v32, %v2591_v49  ;;  %v13720_v2 = vand.u32 4294901760, %v13719_v8  ;;  %v13721_v31 = vld [vmem:[#allocation85_spill] sm:$0xff]  ;;  %v2475_v60 = vld [vmem:[%s12810_s7 + $0x190] sm:$0xff]  ;;  %v10837_v38 = vpack.c.bf16 %v2601_v3, %v2597_v12 }
 0x18a   :  { %v1699_v47 = vand.u32 4294901760, %v1698_v39  ;;  %v10814_v39 = vpack.c.bf16 %v1811_v26, %v1804_v14  ;;  %v13722_v28 = vand.u32 4294901760, %v13721_v31  ;;  %v10841_v5 = vsub.f32 %v2476_v41, %v2601_v3  ;;  %v2478_v26 = vld [vmem:[%s12810_s7 + $0x1a8] sm:$0xff] }
 0x18b   :  { %v1824_v15 = vsub.f32 %v13708_v53, %v13709_v27  ;;  %7800 = vmatpush3.bf16.msra.mxu1 %v13714_v37  ;;  %13716 = vst [vmem:[#allocation82_spill] sm:$0xff] %v10807_v22  ;;  %v2473_v53 = vld [vmem:[%s12810_s7 + $0x180] sm:$0xff]  ;;  %v1705_v37 = vsub.f32 %v13719_v8, %v13720_v2  ;;  %v10832_v2 = vpack.c.bf16 %v2595_v33, %v2591_v49  ;;  %13727 = vst [vmem:[#allocation38_spill] sm:$0xff] %v10837_v38  ;;  %v13731_v49 = vld [vmem:[#allocation86_spill] sm:$0xff] }
 0x18c   :  { %v13717_v27 = vld [vmem:[#allocation108_spill] sm:$0xff]  ;;  %7802 = vmatprep.subr.bf16.mxu1 %v13718_v10  ;;  %v1712_v32 = vsub.f32 %v13721_v31, %v13722_v28  ;;  %v10830_v10 = vpack.c.bf16 %v1699_v47, %v1692_v35  ;;  %v10834_v8 = vsub.f32 %v2471_v54, %v2595_v33  ;;  %v2599_v31 = vand.u32 4294901760, %v2473_v53  ;;  %13729 = vst [vmem:[#allocation85_spill] sm:$0xff] %v10841_v5  ;;  %v2480_v47 = vld [vmem:[%s12810_s7 + $0x1b8] sm:$0xff] }
 0x18d   :  { %8032 = vmatpush1.bf16.msra.mxu0 %v13717_v27  ;;  %v1825_v27 = vand.u32 4294901760, %v1824_v15  ;;  %13724 = vst [vmem:[#allocation83_spill] sm:$0xff] %v10832_v2  ;;  %v13726_v28 = vld [vmem:[#allocation40_spill] sm:$0xff]  ;;  %v2603_v15 = vand.u32 4294901760, %v2475_v60  ;;  %v1706_v35 = vand.u32 4294901760, %v1705_v37 }
 0x18e   :  { %8034 = vmatprep.subr.bf16.mxu0 %v13723_v30  ;;  %13725 = vst [vmem:[#allocation16_spill] sm:$0xff] %v10834_v8  ;;  %v10839_v30 = vsub.f32 %v2474_v43, %v2597_v12  ;;  %v13730_v33 = vld [vmem:[#allocation44_spill] sm:$0xff]  ;;  %v1713_v54 = vand.u32 4294901760, %v1712_v32  ;;  %v13732_v43 = vand.u32 4294901760, %v13731_v49  ;;  %v13733_v12 = vld [vmem:[#allocation87_spill] sm:$0xff] }
 0x18f   :  { %7804 = vmatpush3.bf16.msra.mxu1 %v13726_v28  ;;  %v13734_v3 = vand.u32 4294901760, %v13733_v12  ;;  %v10858_v14 = vpack.c.bf16 %v1825_v27, %v1818_v9  ;;  %v2477_v32 = vld [vmem:[%s12810_s7 + $0x1a0] sm:$0xff]  ;;  %v2609_v9 = vand.u32 4294901760, %v2480_v47  ;;  %v13745_v27 = vld [vmem:[#allocation46_spill] sm:$0xff]  ;;  %v13773_v52 = vld [vmem:[#allocation81_spill] sm:$0xff] }
 0x190   :  { %13728 = vst [vmem:[#allocation84_spill] sm:$0xff] %v10839_v30  ;;  %7806 = vmatprep.subr.bf16.mxu1 %v13730_v33  ;;  %v1831_v41 = vsub.f32 %v13731_v49, %v13732_v43  ;;  %v13738_v33 = vand.u32 4294901760, %v13737_v25  ;;  %v10871_v43 = vsub.f32 %v2473_v53, %v2599_v31  ;;  %v13743_v49 = vld [vmem:[#allocation19_spill] sm:$0xff]  ;;  %v13774_v1 = vld [vmem:[#allocation14_spill] sm:$0xff] }
 0x191   :  { %8036 = vmatpush1.bf16.msra.mxu0 %v10628_v58  ;;  %v1838_v28 = vsub.f32 %v13733_v12, %v13734_v3  ;;  %v1719_v58 = vsub.f32 %v13735_v50, %v13736_v42  ;;  %v2605_v12 = vand.u32 4294901760, %v2478_v26  ;;  %v13739_v3 = vld [vmem:[#allocation45_spill] sm:$0xff]  ;;  %v10876_v42 = vpack.c.bf16 %v2603_v15, %v2599_v31 }
 0x192   :  { %8038 = vmatprep.subr.bf16.mxu0 %v10638_v21  ;;  %v1726_v37 = vsub.f32 %v13737_v25, %v13738_v33  ;;  %v10878_v50 = vsub.f32 %v2475_v60, %v2603_v15  ;;  %v2479_v25 = vld [vmem:[%s12810_s7 + $0x1b0] sm:$0xff]  ;;  %v13744_v29 = vand.u32 4294901760, %v13743_v49  ;;  %v10891_v31 = vpack.c.bf16 %v1713_v54, %v1706_v35 }
 0x193   :  { %7808 = vmatpush3.bf16.msra.mxu1 %v13739_v3  ;;  %13740 = vst [vmem:[#allocation40_spill] sm:$0xff] %v10876_v42  ;;  %v13741_v33 = vld [vmem:[#allocation18_spill] sm:$0xff]  ;;  %v1832_v60 = vand.u32 4294901760, %v1831_v41  ;;  %v1839_v15 = vand.u32 4294901760, %v1838_v28  ;;  %v2607_v3 = vand.u32 4294901760, %v2477_v32  ;;  %v10904_v54 = vpack.c.bf16 %v2609_v9, %v2605_v12 }
 0x194   :  { %v13742_v21 = vand.u32 4294901760, %v13741_v33  ;;  %v1852_v13 = vsub.f32 %v13743_v49, %v13744_v29  ;;  %7810 = vmatprep.subr.bf16.mxu1 %v13745_v27  ;;  %v1720_v29 = vand.u32 4294901760, %v1719_v58  ;;  %v1727_v49 = vand.u32 4294901760, %v1726_v37  ;;  %v2481_v37 = vld [vmem:[%s12810_s7 + $0x1c0] sm:$0xff]  ;;  %v2483_v35 = vld [vmem:[%s12810_s7 + $0x1d0] sm:$0xff] }
 0x195   :  { %8040 = vmatpush1.bf16.msra.mxu0 %v10652_v6  ;;  %13746 = vst [vmem:[#allocation44_spill] sm:$0xff] %v10904_v54  ;;  %v10906_v41 = vsub.f32 %v2478_v26, %v2605_v12  ;;  %v10908_v28 = vsub.f32 %v2480_v47, %v2609_v9  ;;  %v10919_v26 = vpack.c.bf16 %v1839_v15, %v1832_v60  ;;  %v13749_v12 = vld [vmem:[#allocation20_spill] sm:$0xff]  ;;  %v2615_v15 = vand.u32 4294901760, %v2481_v37 }
 0x196   :  { %v1845_v53 = vsub.f32 %v13741_v33, %v13742_v21  ;;  %v2484_v21 = vld [vmem:[%s12810_s7 + $0x1d8] sm:$0xff]  ;;  %8042 = vmatprep.subr.bf16.mxu0 %v10667_v48  ;;  %v2611_v33 = vand.u32 4294901760, %v2479_v25  ;;  %v1853_v46 = vand.u32 4294901760, %v1852_v13  ;;  %v2613_v48 = vand.u32 4294901760, %v2482_v45  ;;  %v13751_v27 = vld [vmem:[#allocation64_spill] sm:$0xff] }
 0x197   :  { %13747 = vst [vmem:[#allocation86_spill] sm:$0xff] %v10906_v41  ;;  %13748 = vst [vmem:[#allocation87_spill] sm:$0xff] %v10908_v28  ;;  %7812 = vmatpush3.bf16.msra.mxu1 %v13652_v51  ;;  %v2617_v58 = vand.u32 4294901760, %v2484_v21  ;;  %v10921_v47 = vsub.f32 %v2477_v32, %v2607_v3  ;;  %v10926_v13 = vpack.c.bf16 %v1727_v49, %v1720_v29  ;;  %v13750_v9 = vand.u32 4294901760, %v13749_v12  ;;  %v2486_v29 = vld [vmem:[%s12810_s7 + $0x1e8] sm:$0xff] }
 0x198   :  { %v1846_v6 = vand.u32 4294901760, %v1845_v53  ;;  %7814 = vmatprep.subr.bf16.mxu1 %v13658_v63  ;;  %v13752_v36 = vand.u32 4294901760, %v13751_v27  ;;  %v10936_v32 = vpack.c.bf16 %v2611_v33, %v2607_v3  ;;  %v10938_v60 = vsub.f32 %v2479_v25, %v2611_v33  ;;  %v2488_v25 = vld [vmem:[%s12810_s7 + $0x1f8] sm:$0xff]  ;;  %v13758_v33 = vld [vmem:[#allocation65_spill] sm:$0xff] }
 0x199   :  { %8044 = vmatpush1.bf16.msra.mxu0 %v10681_v7  ;;  %v1733_v53 = vsub.f32 %v13749_v12, %v13750_v9  ;;  %v2619_v51 = vand.u32 4294901760, %v2483_v35  ;;  %v10946_v12 = vpack.c.bf16 %v2617_v58, %v2613_v48  ;;  %v10957_v3 = vsub.f32 %v2481_v37, %v2615_v15  ;;  %v13762_v9 = vld [vmem:[#allocation21_spill] sm:$0xff] }
 0x19a   :  { %8046 = vmatprep.subr.bf16.mxu0 %v10709_v57  ;;  %v1740_v7 = vsub.f32 %v13751_v27, %v13752_v36  ;;  %13753 = vst [vmem:[#allocation88_spill] sm:$0xff] %v10936_v32  ;;  %13754 = vst [vmem:[#allocation17_spill] sm:$0xff] %v10938_v60  ;;  %v10944_v49 = vpack.c.bf16 %v1853_v46, %v1846_v6  ;;  %v10948_v36 = vsub.f32 %v2482_v45, %v2613_v48 }
 0x19b   :  { %7816 = vmatpush3.bf16.msra.mxu1 %v13664_v23  ;;  %13755 = vst [vmem:[#allocation45_spill] sm:$0xff] %v10946_v12  ;;  %v10950_v27 = vsub.f32 %v2484_v21, %v2617_v58  ;;  %13757 = vst [vmem:[#allocation19_spill] sm:$0xff] %v10957_v3  ;;  %v13759_v23 = vand.u32 4294901760, %v13758_v33  ;;  %v1734_v46 = vand.u32 4294901760, %v1733_v53  ;;  %v2621_v21 = vand.u32 4294901760, %v2486_v29  ;;  %v13766_v58 = vld [vmem:[#allocation23_spill] sm:$0xff] }
 0x19c   :  { %7850 = vmatprep.subr.bf16.mxu1 %v10759_v61  ;;  %v1741_v48 = vand.u32 4294901760, %v1740_v7  ;;  %v10968_v61 = vpack.c.bf16 %v2619_v51, %v2615_v15  ;;  %v10970_v37 = vsub.f32 %v2483_v35, %v2619_v51  ;;  %v13763_v63 = vand.u32 4294901760, %v13762_v9  ;;  %v13764_v7 = vld [vmem:[#allocation22_spill] sm:$0xff]  ;;  %v2485_v35 = vld [vmem:[%s12810_s7 + $0x1e0] sm:$0xff] }
 0x19d   :  { %13756 = vst [vmem:[#allocation18_spill] sm:$0xff] %v10950_v27  ;;  %8048 = vmatpush1.bf16.msra.mxu0 %v10724_v4  ;;  %v1859_v6 = vsub.f32 %v13758_v33, %v13759_v23  ;;  %v2625_v23 = vand.u32 4294901760, %v2488_v25  ;;  %v13765_v53 = vand.u32 4294901760, %v13764_v7  ;;  %v13768_v51 = vld [vmem:[#allocation24_spill] sm:$0xff]  ;;  %v10991_v57 = vsub.f32 %v2486_v29, %v2621_v21  ;;  %v13778_v29 = vld [vmem:[#allocation26_spill] sm:$0xff] }
 0x19e   :  { %8050 = vmatprep.subr.bf16.mxu0 %v10732_v40  ;;  %1515 = vmatmul.mubr.f32.vlgmr.msra.gmra.mrb[8].mxu1 %v13537_v16  ;;  %13760 = vst [vmem:[#allocation46_spill] sm:$0xff] %v10968_v61  ;;  %13761 = vst [vmem:[#allocation20_spill] sm:$0xff] %v10970_v37  ;;  %v1866_v33 = vsub.f32 %v13762_v9, %v13763_v63  ;;  %v13767_v40 = vand.u32 4294901760, %v13766_v58  ;;  %v13769_v4 = vand.u32 4294901760, %v13768_v51  ;;  %v13770_v9 = vld [vmem:[#allocation78_spill] sm:$0xff] }
 0x19f   :  { %7852 = vmatpush3.bf16.msra.mxu1 %v10770_v0  ;;  %1898 = vmatprep.mubr.f32.mxu1 %v13585_v34  ;;  %v1747_v45 = vsub.f32 %v13764_v7, %v13765_v53  ;;  %v1860_v0 = vand.u32 4294901760, %v1859_v6  ;;  %v2487_v7 = vld [vmem:[%s12810_s7 + $0x1f0] sm:$0xff]  ;;  %v13776_v6 = vld [vmem:[#allocation35_spill] sm:$0xff]  ;;  %v11008_v17 = vpack.c.bf16 %v2625_v23, %v2621_v21  ;;  %v11010_v18 = vsub.f32 %v2488_v25, %v2625_v23 }
 0x1a0   :  { %v1754_v15 = vsub.f32 %v13766_v58, %v13767_v40  ;;  %v1873_v63 = vsub.f32 %v13768_v51, %v13769_v4  ;;  %7854 = vmatprep.subr.bf16.mxu1 %v10814_v39  ;;  %v13771_v40 = vld [vmem:[#allocation25_spill] sm:$0xff]  ;;  %v11002_v4 = vpack.c.bf16 %v1741_v48, %v1734_v46  ;;  %v13775_v51 = vld [vmem:[#allocation34_spill] sm:$0xff]  ;;  %v1867_v59 = vand.u32 4294901760, %v1866_v33  ;;  %v13780_v21 = vld [vmem:[#allocation27_spill] sm:$0xff] }
 0x1a1   :  { %8052 = vmatpush1.bf16.msra.mxu0 %v13770_v9  ;;  %v13772_v58 = vand.u32 4294901760, %v13771_v40  ;;  %13777 = vst [vmem:[#allocation64_spill] sm:$0xff] %v11008_v17  ;;  %v13779_v39 = vand.u32 4294901760, %v13778_v29  ;;  %v13781_v9 = vand.u32 4294901760, %v13780_v21 }
 0x1a2   :  { %8054 = vmatprep.subr.bf16.mxu0 %v13774_v1  ;;  %v1755_v11 = vand.u32 4294901760, %v1754_v15  ;;  %v2627_v1 = vand.u32 4294901760, %v2487_v7  ;;  %v1874_v46 = vand.u32 4294901760, %v1873_v63  ;;  %v13784_v63 = vld [vmem:[#allocation36_spill] sm:$0xff] }
 0x1a3   :  { %v1880_v53 = vsub.f32 %v13771_v40, %v13772_v58  ;;  %v2623_v40 = vand.u32 4294901760, %v2485_v35  ;;  %7856 = vmatpush3.bf16.msra.mxu1 %v10830_v10  ;;  %v1748_v58 = vand.u32 4294901760, %v1747_v45  ;;  %v1761_v33 = vsub.f32 %v13778_v29, %v13779_v39  ;;  %v13792_v39 = vld [vmem:[#allocation42_spill] sm:$0xff]  ;;  %v13804_v10 = vld [vmem:[#allocation91_spill] sm:$0xff] }
 0x1a4   :  { %7858 = vmatprep.subr.bf16.mxu1 %v10858_v14  ;;  %v1768_v25 = vsub.f32 %v13780_v21, %v13781_v9  ;;  %v13782_v45 = vand.u32 4294901760, %v13775_v51  ;;  %v13783_v14 = vand.u32 4294901760, %v13776_v6  ;;  %v7869_v29 = vpack.c.bf16 %v1867_v59, %v1860_v0  ;;  %v13786_v21 = vld [vmem:[#allocation37_spill] sm:$0xff] }
 0x1a5   :  { %8056 = vmatpush1.bf16.msra.mxu0 %v10832_v2  ;;  %v1881_v48 = vand.u32 4294901760, %v1880_v53  ;;  %v11033_v9 = vsub.f32 %v2485_v35, %v2623_v40  ;;  %v13787_v2 = vld [vmem:[#allocation28_spill] sm:$0xff]  ;;  %v13791_v53 = vld [vmem:[#allocation41_spill] sm:$0xff]  ;;  %v1762_v35 = vand.u32 4294901760, %v1761_v33  ;;  %v13806_v33 = vld [vmem:[#allocation31_spill] sm:$0xff] }
 0x1a6   :  { %8058 = vmatprep.subr.bf16.mxu0 %v10837_v38  ;;  %v2649_v23 = vsub.f32 %v13775_v51, %v13782_v45  ;;  %v2661_v15 = vsub.f32 %v13776_v6, %v13783_v14  ;;  %v13788_v38 = vand.u32 4294901760, %v13787_v2  ;;  %v7871_v45 = vpack.c.bf16 %v1755_v11, %v1748_v58  ;;  %v13795_v58 = vld [vmem:[#allocation29_spill] sm:$0xff] }
 0x1a7   :  { %13785 = vst [vmem:[#allocation65_spill] sm:$0xff] %v11033_v9  ;;  %7860 = vmatpush3.bf16.msra.mxu1 %v10891_v31  ;;  %v11042_v51 = vpack.c.bf16 %v2627_v1, %v2623_v40  ;;  %v11044_v14 = vsub.f32 %v2487_v7, %v2627_v1  ;;  %v13162_v6 = vand.u32 4294901760, %v13791_v53  ;;  %v7873_v59 = vpack.c.bf16 %v1881_v48, %v1874_v46 }
 0x1a8   :  { %v11039_v5 = vsub.f32 %v13787_v2, %v13788_v38  ;;  %7862 = vmatprep.subr.bf16.mxu1 %v10919_v26  ;;  %v1769_v0 = vand.u32 4294901760, %v1768_v25  ;;  %v2650_v38 = vand.u32 4294901760, %v2649_v23  ;;  %v2662_v2 = vand.u32 4294901760, %v2661_v15  ;;  %v13797_v23 = vld [vmem:[#allocation30_spill] sm:$0xff] }
 0x1a9   :  { %13789 = vst [vmem:[#allocation21_spill] sm:$0xff] %v11042_v51  ;;  %13790 = vst [vmem:[#allocation22_spill] sm:$0xff] %v11044_v14  ;;  %8060 = vmatpush1.bf16.msra.mxu0 %v10876_v42  ;;  %v13793_v11 = vand.u32 4294901760, %v13784_v63  ;;  %v13794_v7 = vand.u32 4294901760, %v13786_v21  ;;  %v13796_v46 = vand.u32 4294901760, %v13795_v58  ;;  %v2673_v25 = vsub.f32 %v13791_v53, %v13162_v6 }
 0x1aa   :  { %8062 = vmatprep.subr.bf16.mxu0 %v10904_v54  ;;  %v1888_v40 = vand.u32 4294901760, %v11039_v5  ;;  %v13798_v15 = vand.u32 4294901760, %v13797_v23  ;;  %v13800_v5 = vld [vmem:[#allocation9_spill] sm:$0xff]  ;;  %v13177_v31 = vand.u32 4294901760, %v13804_v10 }
 0x1ab   :  { %v2655_v1 = vsub.f32 %v13784_v63, %v13793_v11  ;;  %v2667_v26 = vsub.f32 %v13786_v21, %v13794_v7  ;;  %v1894_v48 = vsub.f32 %v13795_v58, %v13796_v46  ;;  %7864 = vmatpush3.bf16.msra.mxu1 %v10926_v13  ;;  %v13799_v7 = vld [vmem:[#allocation55_spill] sm:$0xff]  ;;  %v13801_v58 = vand.u32 4294901760, %v13792_v39  ;;  %v13803_v54 = vld [vmem:[#allocation89_spill] sm:$0xff] }
 0x1ac   :  { %v1775_v11 = vsub.f32 %v13797_v23, %v13798_v15  ;;  %7866 = vmatprep.subr.bf16.mxu1 %v10944_v49  ;;  %v13802_v46 = vld [vmem:[#allocation11_spill] sm:$0xff]  ;;  %v7875_v23 = vpack.c.bf16 %v1769_v0, %v1762_v35  ;;  %v13807_v21 = vand.u32 4294901760, %v13806_v33  ;;  %v13808_v35 = vand.u32 4294901760, %v13799_v7 }
 0x1ad   :  { %8064 = vmatpush1.bf16.msra.mxu0 %v10936_v32  ;;  %v2685_v13 = vsub.f32 %v13792_v39, %v13801_v58  ;;  %v2656_v15 = vand.u32 4294901760, %v2655_v1  ;;  %v8073_v32 = vpack.c.bf16 %v2662_v2, %v2650_v38  ;;  %v2668_v53 = vand.u32 4294901760, %v2667_v26  ;;  %v13805_v58 = vld [vmem:[#allocation92_spill] sm:$0xff] }
 0x1ae   :  { %8066 = vmatprep.subr.bf16.mxu0 %v10946_v12  ;;  %v1895_v63 = vand.u32 4294901760, %v1894_v48  ;;  %v13182_v39 = vand.u32 4294901760, %v13805_v58  ;;  %v1776_v6 = vand.u32 4294901760, %v1775_v11  ;;  %v1782_v42 = vsub.f32 %v13806_v33, %v13807_v21  ;;  %v13812_v11 = vld [vmem:[#allocation94_spill] sm:$0xff] }
 0x1af   :  { %7868 = vmatpush3.bf16.msra.mxu1 %v11002_v4  ;;  %v2679_v0 = vsub.f32 %v13799_v7, %v13808_v35  ;;  %v13809_v1 = vand.u32 4294901760, %v13800_v5  ;;  %v2674_v38 = vand.u32 4294901760, %v2673_v25  ;;  %v2686_v2 = vand.u32 4294901760, %v2685_v13 }
 0x1b0   :  { %7870 = vmatprep.subr.bf16.mxu1 %v7869_v29  ;;  %v13810_v4 = vand.u32 4294901760, %v13802_v46  ;;  %v13811_v48 = vand.u32 4294901760, %v13803_v54  ;;  %v2703_v33 = vsub.f32 %v13804_v10, %v13177_v31  ;;  %v2715_v13 = vsub.f32 %v13805_v58, %v13182_v39  ;;  %v13817_v39 = vld [vmem:[#allocation101_spill] sm:$0xff] }
 0x1b1   :  { %v2691_v49 = vsub.f32 %v13800_v5, %v13809_v1  ;;  %8068 = vmatpush1.bf16.msra.mxu0 %v10968_v61  ;;  %v13813_v1 = vld [vmem:[#allocation95_spill] sm:$0xff]  ;;  %v1783_v31 = vand.u32 4294901760, %v1782_v42  ;;  %v2680_v10 = vand.u32 4294901760, %v2679_v0  ;;  %v8075_v25 = vpack.c.bf16 %v2668_v53, %v2656_v15 }
 0x1b2   :  { %v2697_v26 = vsub.f32 %v13802_v46, %v13810_v4  ;;  %v2709_v21 = vsub.f32 %v13803_v54, %v13811_v48  ;;  %8070 = vmatprep.subr.bf16.mxu0 %v11008_v17  ;;  %v13814_v4 = vld [vmem:[#allocation97_spill] sm:$0xff]  ;;  %v13815_v48 = vld [vmem:[#allocation98_spill] sm:$0xff]  ;;  %v13816_v46 = vld [vmem:[#allocation100_spill] sm:$0xff]  ;;  %v7877_v54 = vpack.c.bf16 %v1895_v63, %v1888_v40  ;;  %v8077_v7 = vpack.c.bf16 %v2686_v2, %v2674_v38 }
 0x1b3   :  { %7872 = vmatpush3.bf16.msra.mxu1 %v7871_v45  ;;  %v2692_v35 = vand.u32 4294901760, %v2691_v49  ;;  %v13185_v29 = vand.u32 4294901760, %v13816_v46  ;;  %v13186_v58 = vand.u32 4294901760, %v13817_v39  ;;  %v13818_v5 = vand.u32 4294901760, %v13812_v11  ;;  %v13822_v40 = vld [vmem:[#allocation68_spill] sm:$0xff]  ;;  %v13823_v2 = vld [vmem:[#allocation103_spill] sm:$0xff] }
 0x1b4   :  { %7874 = vmatprep.subr.bf16.mxu1 %v7873_v59  ;;  %v2698_v61 = vand.u32 4294901760, %v2697_v26  ;;  %v2710_v12 = vand.u32 4294901760, %v2709_v21  ;;  %v13819_v42 = vand.u32 4294901760, %v13813_v1  ;;  %v2704_v0 = vand.u32 4294901760, %v2703_v33  ;;  %v13824_v33 = vld [vmem:[#allocation104_spill] sm:$0xff] }
 0x1b5   :  { %8072 = vmatpush1.bf16.msra.mxu0 %v11042_v51  ;;  %v2721_v45 = vsub.f32 %v13812_v11, %v13818_v5  ;;  %v2716_v17 = vand.u32 4294901760, %v2715_v13  ;;  %v13820_v59 = vand.u32 4294901760, %v13814_v4  ;;  %v13821_v53 = vand.u32 4294901760, %v13815_v48  ;;  %v13827_v51 = vld [vmem:[#allocation109_spill] sm:$0xff] }
 0x1b6   :  { %8074 = vmatprep.subr.bf16.mxu0 %v8073_v32  ;;  %v2733_v49 = vsub.f32 %v13813_v1, %v13819_v42  ;;  %v7879_v15 = vpack.c.bf16 %v1783_v31, %v1776_v6  ;;  %v8079_v38 = vpack.c.bf16 %v2692_v35, %v2680_v10  ;;  %v2745_v5 = vsub.f32 %v13816_v46, %v13185_v29  ;;  %v13825_v42 = vld [vmem:[#allocation106_spill] sm:$0xff]  ;;  %v13829_v6 = vld [vmem:[#allocation47_spill] sm:$0xff] }
 0x1b7   :  { %v2727_v63 = vsub.f32 %v13814_v4, %v13820_v59  ;;  %v2739_v32 = vsub.f32 %v13815_v48, %v13821_v53  ;;  %7876 = vmatpush3.bf16.msra.mxu1 %v7875_v23  ;;  %v13190_v26 = vand.u32 4294901760, %v13823_v2  ;;  %v2757_v21 = vsub.f32 %v13817_v39, %v13186_v58  ;;  %v13826_v23 = vld [vmem:[#allocation107_spill] sm:$0xff]  ;;  %v13828_v46 = vld [vmem:[#allocation110_spill] sm:$0xff] }
 0x1b8   :  { %2640 = vmatmul.mubr.f32.vlgmr.msra.gmra.mrb[10].mxu0 %v13822_v40  ;;  %7878 = vmatprep.subr.bf16.mxu1 %v7877_v54  ;;  %v8081_v10 = vpack.c.bf16 %v2710_v12, %v2698_v61  ;;  %v2722_v31 = vand.u32 4294901760, %v2721_v45  ;;  %v2734_v35 = vand.u32 4294901760, %v2733_v49  ;;  %v8083_v53 = vpack.c.bf16 %v2716_v17, %v2704_v0  ;;  %v13837_v59 = vld [vmem:[#allocation62_spill] sm:$0xff] }
 0x1b9   :  { %8076 = vmatpush1.bf16.msra.mxu0 %v8075_v25  ;;  %3031 = vmatprep.mubr.f32.mxu0 %v13585_v34  ;;  %v2728_v40 = vand.u32 4294901760, %v2727_v63  ;;  %v2740_v25 = vand.u32 4294901760, %v2739_v32  ;;  %v2746_v29 = vand.u32 4294901760, %v2745_v5  ;;  %v2751_v58 = vsub.f32 %v13823_v2, %v13190_v26  ;;  %v13833_v32 = vld [vmem:[#allocation48_spill] sm:$0xff]  ;;  %v13836_v26 = vld [vmem:[#allocation54_spill] sm:$0xff] }
 0x1ba   :  { %8078 = vmatprep.subr.bf16.mxu0 %v8077_v7  ;;  %v2758_v54 = vand.u32 4294901760, %v2757_v21  ;;  %v13830_v12 = vand.u32 4294901760, %v13824_v33  ;;  %v13831_v61 = vand.u32 4294901760, %v13825_v42  ;;  %v13832_v45 = vand.u32 4294901760, %v13826_v23  ;;  %v13835_v21 = vld [vmem:[#allocation114_spill] sm:$0xff] }
 0x1bb   :  { %7880 = vmatpush3.bf16.msra.mxu1 %v7879_v15  ;;  %v8085_v0 = vpack.c.bf16 %v2734_v35, %v2722_v31  ;;  %v2752_v13 = vand.u32 4294901760, %v2751_v58  ;;  %v13839_v31 = vand.u32 4294901760, %v13828_v46  ;;  %v13840_v15 = vld [vmem:[#allocation56_spill] sm:$0xff]  ;;  %v13857_v2 = vld [vmem:[#allocation66_spill] sm:$0xff] }
 0x1bc   :  { %7914 = vmatprep.subr.bf16.mxu1 %v13829_v6  ;;  %v2763_v17 = vsub.f32 %v13824_v33, %v13830_v12  ;;  %v2769_v7 = vsub.f32 %v13825_v42, %v13831_v61  ;;  %v2781_v49 = vsub.f32 %v13826_v23, %v13832_v45  ;;  %v8087_v61 = vpack.c.bf16 %v2740_v25, %v2728_v40  ;;  %v13844_v23 = vld [vmem:[#allocation116_spill] sm:$0xff] }
 0x1bd   :  { %8080 = vmatpush1.bf16.msra.mxu0 %v8079_v38  ;;  %v13834_v38 = vld [vmem:[#allocation67_spill] sm:$0xff]  ;;  %v13838_v45 = vand.u32 4294901760, %v13827_v51  ;;  %v2787_v35 = vsub.f32 %v13828_v46, %v13839_v31  ;;  %v8089_v5 = vpack.c.bf16 %v2758_v54, %v2746_v29  ;;  %v13842_v40 = vand.u32 4294901760, %v13833_v32 }
 0x1be   :  { %8082 = vmatprep.subr.bf16.mxu0 %v8081_v10  ;;  %1900 = vmatmul.mubr.f32.vlgmr.msra.gmra.mrb[10].mxu1 %v13537_v16  ;;  %v2764_v63 = vand.u32 4294901760, %v2763_v17  ;;  %v2770_v12 = vand.u32 4294901760, %v2769_v7  ;;  %v2782_v42 = vand.u32 4294901760, %v2781_v49  ;;  %v13846_v54 = vand.u32 4294901760, %v13835_v21  ;;  %v13847_v7 = vld [vmem:[#allocation118_spill] sm:$0xff] }
 0x1bf   :  { %7916 = vmatpush3.bf16.msra.mxu1 %v13836_v26  ;;  %2142 = vmatprep.mubr.f32.mxu1 %v13837_v59  ;;  %v2775_v10 = vsub.f32 %v13827_v51, %v13838_v45  ;;  %v13841_v59 = vand.u32 4294901760, %v10620_v55  ;;  %v2805_v25 = vsub.f32 %v13833_v32, %v13842_v40  ;;  %v13843_v45 = vld [vmem:[#allocation115_spill] sm:$0xff]  ;;  %v2788_v40 = vand.u32 4294901760, %v2787_v35 }
 0x1c0   :  { %7918 = vmatprep.subr.bf16.mxu1 %v13840_v15  ;;  %v2811_v17 = vsub.f32 %v13835_v21, %v13846_v54  ;;  %v13850_v51 = vld [vmem:[#allocation59_spill] sm:$0xff]  ;;  %v8091_v31 = vpack.c.bf16 %v2764_v63, %v2752_v13  ;;  %v8093_v32 = vpack.c.bf16 %v2782_v42, %v2770_v12  ;;  %v13851_v49 = vand.u32 4294901760, %v13843_v45 }
 0x1c1   :  { %8084 = vmatpush1.bf16.msra.mxu0 %v8083_v53  ;;  %v2793_v58 = vsub.f32 %v10620_v55, %v13841_v59  ;;  %v13845_v53 = vand.u32 4294901760, %v13834_v38  ;;  %v13849_v55 = vld [vmem:[#allocation58_spill] sm:$0xff]  ;;  %v2776_v46 = vand.u32 4294901760, %v2775_v10  ;;  %v2806_v54 = vand.u32 4294901760, %v2805_v25  ;;  %v13855_v12 = vld [vmem:[#allocation63_spill] sm:$0xff] }
 0x1c2   :  { %8086 = vmatprep.subr.bf16.mxu0 %v8085_v0  ;;  %v13848_v0 = vld [vmem:[#allocation50_spill] sm:$0xff]  ;;  %v2817_v59 = vsub.f32 %v13843_v45, %v13851_v49  ;;  %v13852_v21 = vand.u32 4294901760, %v13844_v23  ;;  %v2812_v35 = vand.u32 4294901760, %v2811_v17  ;;  %v13853_v13 = vand.u32 4294901760, %v13847_v7  ;;  %v13856_v49 = vld [vmem:[#allocation124_spill] sm:$0xff]  ;;  %v13860_v45 = vld [vmem:[#allocation69_spill] sm:$0xff] }
 0x1c3   :  { %v2799_v29 = vsub.f32 %v13834_v38, %v13845_v53  ;;  %7920 = vmatpush3.bf16.msra.mxu1 %v13849_v55  ;;  %v2794_v38 = vand.u32 4294901760, %v2793_v58  ;;  %v13854_v63 = vand.u32 4294901760, %v13848_v0  ;;  %v8095_v58 = vpack.c.bf16 %v2788_v40, %v2776_v46 }
 0x1c4   :  { %7922 = vmatprep.subr.bf16.mxu1 %v13850_v51  ;;  %v2829_v10 = vsub.f32 %v13844_v23, %v13852_v21  ;;  %v2823_v42 = vsub.f32 %v13847_v7, %v13853_v13  ;;  %v13858_v21 = vand.u32 4294901760, %v10669_v56  ;;  %v13859_v17 = vand.u32 4294901760, %v10671_v24  ;;  %v13864_v7 = vld [vmem:[#allocation130_spill] sm:$0xff] }
 0x1c5   :  { %8088 = vmatpush1.bf16.msra.mxu0 %v8087_v61  ;;  %v2800_v61 = vand.u32 4294901760, %v2799_v29  ;;  %v8097_v46 = vpack.c.bf16 %v2806_v54, %v2794_v38  ;;  %v2818_v40 = vand.u32 4294901760, %v2817_v59  ;;  %v13861_v23 = vand.u32 4294901760, %v10683_v20  ;;  %v13865_v38 = vld [vmem:[#allocation70_spill] sm:$0xff] }
 0x1c6   :  { %8090 = vmatprep.subr.bf16.mxu0 %v8089_v5  ;;  %v2835_v5 = vsub.f32 %v13848_v0, %v13854_v63  ;;  %v2841_v29 = vsub.f32 %v10669_v56, %v13858_v21  ;;  %v2853_v13 = vsub.f32 %v10671_v24, %v13859_v17  ;;  %v2830_v25 = vand.u32 4294901760, %v2829_v10  ;;  %v13863_v63 = vld [vmem:[#allocation129_spill] sm:$0xff] }
 0x1c7   :  { %7924 = vmatpush3.bf16.msra.mxu1 %v13855_v12  ;;  %v8099_v53 = vpack.c.bf16 %v2812_v35, %v2800_v61  ;;  %v2847_v21 = vsub.f32 %v10683_v20, %v13861_v23  ;;  %v13862_v56 = vand.u32 4294901760, %v13856_v49  ;;  %v13866_v10 = vand.u32 4294901760, %v10711_v62  ;;  %v13869_v24 = vld [vmem:[#allocation13_spill] sm:$0xff] }
 0x1c8   :  { %7926 = vmatprep.subr.bf16.mxu1 %v13857_v2  ;;  %v2836_v0 = vand.u32 4294901760, %v2835_v5  ;;  %v2842_v59 = vand.u32 4294901760, %v2841_v29  ;;  %v2854_v54 = vand.u32 4294901760, %v2853_v13  ;;  %v13867_v35 = vand.u32 4294901760, %v10722_v19  ;;  %v13872_v29 = vld [vmem:[#allocation71_spill] sm:$0xff] }
 0x1c9   :  { %8092 = vmatpush1.bf16.msra.mxu0 %v8091_v31  ;;  %v2824_v31 = vand.u32 4294901760, %v2823_v42  ;;  %v2859_v17 = vsub.f32 %v13856_v49, %v13862_v56  ;;  %v2865_v61 = vsub.f32 %v10711_v62, %v13866_v10  ;;  %v8101_v42 = vpack.c.bf16 %v2830_v25, %v2818_v40  ;;  %v13868_v56 = vld [vmem:[#allocation12_spill] sm:$0xff] }
 0x1ca   :  { %8094 = vmatprep.subr.bf16.mxu0 %v8093_v32  ;;  %v2877_v23 = vsub.f32 %v10722_v19, %v13867_v35  ;;  %v13870_v32 = vld [vmem:[#allocation79_spill] sm:$0xff]  ;;  %v13871_v49 = vld [vmem:[#allocation80_spill] sm:$0xff]  ;;  %v2848_v13 = vand.u32 4294901760, %v2847_v21  ;;  %v13873_v10 = vand.u32 4294901760, %v13863_v63  ;;  %v13874_v35 = vand.u32 4294901760, %v13864_v7 }
 0x1cb   :  { %7928 = vmatpush3.bf16.msra.mxu1 %v13860_v45  ;;  %v2860_v39 = vand.u32 4294901760, %v2859_v17  ;;  %v8103_v40 = vpack.c.bf16 %v2836_v0, %v2824_v31  ;;  %v8105_v20 = vpack.c.bf16 %v2854_v54, %v2842_v59  ;;  %v13876_v33 = vand.u32 4294901760, %v13868_v56  ;;  %v13880_v54 = vld [vmem:[#allocation73_spill] sm:$0xff] }
 0x1cc   :  { %7930 = vmatprep.subr.bf16.mxu1 %v13865_v38  ;;  %v2871_v62 = vsub.f32 %v13863_v63, %v13873_v10  ;;  %v2883_v25 = vsub.f32 %v13864_v7, %v13874_v35  ;;  %v2878_v5 = vand.u32 4294901760, %v2877_v23  ;;  %v13877_v17 = vand.u32 4294901760, %v13869_v24 }
 0x1cd   :  { %8096 = vmatpush1.bf16.msra.mxu0 %v8095_v58  ;;  %v2866_v58 = vand.u32 4294901760, %v2865_v61  ;;  %v2889_v21 = vsub.f32 %v13868_v56, %v13876_v33  ;;  %v13879_v31 = vand.u32 4294901760, %v13871_v49  ;;  %v8107_v61 = vpack.c.bf16 %v2860_v39, %v2848_v13  ;;  %v13885_v56 = vld [vmem:[#allocation75_spill] sm:$0xff] }
 0x1ce   :  { %8098 = vmatprep.subr.bf16.mxu0 %v8097_v46  ;;  %v13875_v46 = vld [vmem:[#allocation72_spill] sm:$0xff]  ;;  %v2901_v10 = vsub.f32 %v13869_v24, %v13877_v17  ;;  %v2872_v33 = vand.u32 4294901760, %v2871_v62  ;;  %v2884_v23 = vand.u32 4294901760, %v2883_v25  ;;  %v13881_v17 = vld [vmem:[#allocation74_spill] sm:$0xff]  ;;  %v13224_v35 = vand.u32 4294901760, %v10834_v8 }
 0x1cf   :  { %7932 = vmatpush3.bf16.msra.mxu1 %v13872_v29  ;;  %v2907_v59 = vsub.f32 %v13871_v49, %v13879_v31  ;;  %v8109_v63 = vpack.c.bf16 %v2878_v5, %v2866_v58  ;;  %v2890_v24 = vand.u32 4294901760, %v2889_v21  ;;  %v13883_v49 = vand.u32 4294901760, %v13773_v52 }
 0x1d0   :  { %7934 = vmatprep.subr.bf16.mxu1 %v13875_v46  ;;  %v2902_v31 = vand.u32 4294901760, %v2901_v10  ;;  %v13884_v39 = vand.u32 4294901760, %v10805_v44  ;;  %v13229_v5 = vand.u32 4294901760, %v10871_v43  ;;  %v13886_v10 = vld [vmem:[#allocation76_spill] sm:$0xff] }
 0x1d1   :  { %8100 = vmatpush1.bf16.msra.mxu0 %v8099_v53  ;;  %v13878_v53 = vand.u32 4294901760, %v13870_v32  ;;  %v2913_v62 = vsub.f32 %v13773_v52, %v13883_v49 }
 0x1d2   :  { %8102 = vmatprep.subr.bf16.mxu0 %v8101_v42  ;;  %v13221_v42 = vand.u32 4294901760, %v10807_v22  ;;  %v2925_v13 = vsub.f32 %v10805_v44, %v13884_v39 }
 0x1d3   :  { %v2895_v0 = vsub.f32 %v13870_v32, %v13878_v53  ;;  %7936 = vmatpush3.bf16.msra.mxu1 %v13880_v54  ;;  %v13882_v53 = vld [vmem:[#allocation85_spill] sm:$0xff]  ;;  %v8111_v32 = vpack.c.bf16 %v2884_v23, %v2872_v33  ;;  %v2914_v21 = vand.u32 4294901760, %v2913_v62  ;;  %v13242_v62 = vand.u32 4294901760, %v10938_v60 }
 0x1d4   :  { %7938 = vmatprep.subr.bf16.mxu1 %v13881_v17  ;;  %v13888_v33 = vand.u32 4294901760, %v13882_v53  ;;  %v2926_v58 = vand.u32 4294901760, %v2925_v13 }
 0x1d5   :  { %8104 = vmatpush1.bf16.msra.mxu0 %v8103_v40  ;;  %v2896_v25 = vand.u32 4294901760, %v2895_v0  ;;  %v2908_v40 = vand.u32 4294901760, %v2907_v59  ;;  %v2931_v0 = vsub.f32 %v10834_v8, %v13224_v35  ;;  %v13887_v59 = vand.u32 4294901760, %v10839_v30  ;;  %v13890_v8 = vld [vmem:[#allocation77_spill] sm:$0xff] }
 0x1d6   :  { %8106 = vmatprep.subr.bf16.mxu0 %v8105_v20  ;;  %v2919_v20 = vsub.f32 %v10807_v22, %v13221_v42  ;;  %v2949_v23 = vsub.f32 %v13882_v53, %v13888_v33  ;;  %v8113_v42 = vpack.c.bf16 %v2902_v31, %v2890_v24  ;;  %v13889_v22 = vand.u32 4294901760, %v10878_v50 }
 0x1d7   :  { %7940 = vmatpush3.bf16.msra.mxu1 %v13885_v56  ;;  %v2937_v39 = vsub.f32 %v10839_v30, %v13887_v59  ;;  %v8115_v49 = vpack.c.bf16 %v2908_v40, %v2896_v25  ;;  %v13891_v59 = vand.u32 4294901760, %v10906_v41  ;;  %v13243_v31 = vand.u32 4294901760, %v10921_v47 }
 0x1d8   :  { %7942 = vmatprep.subr.bf16.mxu1 %v13886_v10  ;;  %v2955_v35 = vsub.f32 %v10878_v50, %v13889_v22  ;;  %v2920_v13 = vand.u32 4294901760, %v2919_v20  ;;  %v2932_v25 = vand.u32 4294901760, %v2931_v0  ;;  %v2950_v40 = vand.u32 4294901760, %v2949_v23 }
 0x1d9   :  { %8108 = vmatpush1.bf16.msra.mxu0 %v8107_v61  ;;  %v2943_v61 = vsub.f32 %v10871_v43, %v13229_v5  ;;  %v2961_v30 = vsub.f32 %v10906_v41, %v13891_v59  ;;  %v2938_v22 = vand.u32 4294901760, %v2937_v39  ;;  %v8117_v33 = vpack.c.bf16 %v2926_v58, %v2914_v21  ;;  %v13893_v41 = vld [vmem:[#allocation61_spill] sm:$0xff] }
 0x1da   :  { %8110 = vmatprep.subr.bf16.mxu0 %v8109_v63  ;;  %v13892_v63 = vand.u32 4294901760, %v10908_v28  ;;  %v13241_v5 = vand.u32 4294901760, %v10948_v36  ;;  %v13240_v59 = vand.u32 4294901760, %v10950_v27  ;;  %v2967_v20 = vsub.f32 %v10921_v47, %v13243_v31 }
 0x1db   :  { %7944 = vmatpush3.bf16.msra.mxu1 %v13890_v8  ;;  %v8119_v58 = vpack.c.bf16 %v2932_v25, %v2920_v13  ;;  %v8121_v21 = vpack.c.bf16 %v2950_v40, %v2938_v22  ;;  %v13237_v39 = vand.u32 4294901760, %v10991_v57  ;;  %v13235_v22 = vand.u32 4294901760, %v11033_v9 }
 0x1dc   :  { %v2973_v24 = vsub.f32 %v10908_v28, %v13892_v63  ;;  %7978 = vmatprep.subr.bf16.mxu1 %v13829_v6  ;;  %v2944_v63 = vand.u32 4294901760, %v2943_v61  ;;  %v2956_v28 = vand.u32 4294901760, %v2955_v35  ;;  %v13239_v35 = vand.u32 4294901760, %v10957_v3 }
 0x1dd   :  { %8112 = vmatpush1.bf16.msra.mxu0 %v8111_v32  ;;  %v2962_v32 = vand.u32 4294901760, %v2961_v30  ;;  %v2985_v30 = vsub.f32 %v10948_v36, %v13241_v5  ;;  %v2997_v0 = vsub.f32 %v10950_v27, %v13240_v59  ;;  %v2968_v61 = vand.u32 4294901760, %v2967_v20  ;;  %v13937_v5 = vld [vmem:[#allocation50_spill] sm:$0xff] }
 0x1de   :  { %8114 = vmatprep.subr.bf16.mxu0 %v8113_v42  ;;  %2146 = vmatmul.mubr.f32.vlgmr.msra.gmra.mrb[12].mxu1 %v13893_v41  ;;  %v2974_v6 = vand.u32 4294901760, %v2973_v24  ;;  %v2979_v42 = vsub.f32 %v10938_v60, %v13242_v62  ;;  %v2991_v13 = vsub.f32 %v10957_v3, %v13239_v35  ;;  %v13234_v40 = vand.u32 4294901760, %v11044_v14  ;;  %v13938_v62 = vld [vmem:[#allocation118_spill] sm:$0xff] }
 0x1df   :  { %7980 = vmatpush3.bf16.msra.mxu1 %v13836_v26  ;;  %2416 = vmatprep.mubr.f32.mxu1 %v13585_v34  ;;  %v13238_v26 = vand.u32 4294901760, %v10970_v37  ;;  %v3015_v20 = vsub.f32 %v11033_v9, %v13235_v22  ;;  %v13939_v31 = vpack.c.bf16 %v13937_v5, %v13938_v62 }
 0x1e0   :  { %7982 = vmatprep.subr.bf16.mxu1 %v13840_v15  ;;  %v8123_v15 = vpack.c.bf16 %v2956_v28, %v2944_v63  ;;  %v8125_v23 = vpack.c.bf16 %v2974_v6, %v2962_v32  ;;  %v2980_v24 = vand.u32 4294901760, %v2979_v42  ;;  %v2998_v28 = vand.u32 4294901760, %v2997_v0 }
 0x1e1   :  { %8116 = vmatpush1.bf16.msra.mxu0 %v8115_v49  ;;  %v13236_v49 = vand.u32 4294901760, %v11010_v18  ;;  %v3003_v25 = vsub.f32 %v10970_v37, %v13238_v26  ;;  %v2992_v32 = vand.u32 4294901760, %v2991_v13  ;;  %v3027_v42 = vsub.f32 %v11044_v14, %v13234_v40  ;;  %v13929_v40 = vld [vmem:[#allocation112_spill] sm:$0xff] }
 0x1e2   :  { %8118 = vmatprep.subr.bf16.mxu0 %v8117_v33  ;;  %v3009_v33 = vsub.f32 %v10991_v57, %v13237_v39  ;;  %v8127_v63 = vpack.c.bf16 %v2980_v24, %v2968_v61  ;;  %v13934_v26 = vld [vmem:[#allocation116_spill] sm:$0xff] }
 0x1e3   :  { %7984 = vmatpush3.bf16.msra.mxu1 %v13849_v55  ;;  %v2986_v55 = vand.u32 4294901760, %v2985_v30  ;;  %v3004_v6 = vand.u32 4294901760, %v3003_v25  ;;  %v3028_v24 = vand.u32 4294901760, %v3027_v42 }
 0x1e4   :  { %7986 = vmatprep.subr.bf16.mxu1 %v13850_v51  ;;  %v3021_v51 = vsub.f32 %v11010_v18, %v13236_v49  ;;  %v3010_v30 = vand.u32 4294901760, %v3009_v33  ;;  %v13932_v49 = vld [vmem:[#allocation67_spill] sm:$0xff] }
 0x1e5   :  { %8120 = vmatpush1.bf16.msra.mxu0 %v8119_v58 }
 0x1e6   :  { %8122 = vmatprep.subr.bf16.mxu0 %v8121_v21  ;;  %v8129_v21 = vpack.c.bf16 %v2998_v28, %v2986_v55  ;;  %v3022_v0 = vand.u32 4294901760, %v3021_v51 }
 0x1e7   :  { %7988 = vmatpush3.bf16.msra.mxu1 %v13855_v12 }
 0x1e8   :  { %7990 = vmatprep.subr.bf16.mxu1 %v13857_v2  ;;  %v6909_v58 = vpop.f32.mrb[2].mxu0  ;;  %v8131_v2 = vpack.c.bf16 %v3004_v6, %v2992_v32  ;;  %v8133_v13 = vpack.c.bf16 %v3022_v0, %v3010_v30  ;;  %v13902_v32 = vld [vmem:[#allocation41_spill] sm:$0xff]  ;;  %v13910_v30 = vld [vmem:[#allocation92_spill] sm:$0xff]  ;;  %v13911_v0 = vld [vmem:[#allocation91_spill] sm:$0xff] }
 0x1e9   :  { %8124 = vmatpush1.bf16.msra.mxu0 %v8123_v15  ;;  %v6910_v12 = vpop.f32.mrb[3].mxu0  ;;  %v3016_v15 = vand.u32 4294901760, %v3015_v20  ;;  %v13905_v20 = vld [vmem:[#allocation55_spill] sm:$0xff] }
 0x1ea   :  { %8126 = vmatprep.subr.bf16.mxu0 %v8125_v23  ;;  %v11354_v61 = vadd.f32 %v6910_v12, %v6909_v58  ;;  %v13907_v58 = vld [vmem:[#allocation89_spill] sm:$0xff]  ;;  %v13912_v12 = vpack.c.bf16 %v13910_v30, %v13911_v0 }
 0x1eb   :  { %7992 = vmatpush3.bf16.msra.mxu1 %v13860_v45  ;;  %v8135_v23 = vpack.c.bf16 %v3028_v24, %v3016_v15  ;;  %v13894_v45 = vld [vmem:[#allocation35_spill] sm:$0xff]  ;;  %v13916_v15 = vld [vmem:[#allocation100_spill] sm:$0xff] }
 0x1ec   :  { %7994 = vmatprep.subr.bf16.mxu1 %v13865_v38  ;;  %v13895_v38 = vld [vmem:[#allocation34_spill] sm:$0xff] }
 0x1ed   :  { %8128 = vmatpush1.bf16.msra.mxu0 %v8127_v63  ;;  %v13896_v33 = vpack.c.bf16 %v13894_v45, %v13895_v38  ;;  %v13900_v63 = vld [vmem:[#allocation60_spill] sm:$0xff] }
 0x1ee   :  { %8130 = vmatprep.subr.bf16.mxu0 %v8129_v21 }
 0x1ef   :  { %7996 = vmatpush3.bf16.msra.mxu1 %v13872_v29  ;;  %v13897_v29 = vld [vmem:[#allocation37_spill] sm:$0xff] }
 0x1f0   :  { %7998 = vmatprep.subr.bf16.mxu1 %v13875_v46  ;;  %v6769_v25 = vpop.f32.mrb[0].mxu1  ;;  %v13898_v46 = vld [vmem:[#allocation36_spill] sm:$0xff] }
 0x1f1   :  { %8132 = vmatpush1.bf16.msra.mxu0 %v8131_v2  ;;  %v6770_v55 = vpop.f32.mrb[1].mxu1  ;;  %v13899_v51 = vpack.c.bf16 %v13897_v29, %v13898_v46  ;;  %v13915_v2 = vld [vmem:[#allocation101_spill] sm:$0xff] }
 0x1f2   :  { %8134 = vmatprep.subr.bf16.mxu0 %v8133_v13  ;;  %v6771_v28 = vadd.f32 %v6770_v55, %v6769_v25  ;;  %v13917_v24 = vpack.c.bf16 %v13915_v2, %v13916_v15  ;;  %v13918_v13 = vld [vmem:[#allocation104_spill] sm:$0xff] }
 0x1f3   :  { %8000 = vmatpush3.bf16.msra.mxu1 %v13880_v54  ;;  %v13901_v54 = vld [vmem:[#allocation42_spill] sm:$0xff] }
 0x1f4   :  { %8002 = vmatprep.subr.bf16.mxu1 %v13881_v17  ;;  %v13903_v6 = vpack.c.bf16 %v13901_v54, %v13902_v32  ;;  %v13904_v17 = vld [vmem:[#allocation9_spill] sm:$0xff] }
 0x1f5   :  { %8136 = vmatpush1.bf16.msra.mxu0 %v8135_v23  ;;  %v13906_v42 = vpack.c.bf16 %v13904_v17, %v13905_v20  ;;  %v13919_v23 = vld [vmem:[#allocation103_spill] sm:$0xff] }
 0x1f6   :  { %8138 = vmatprep.subr.bf16.mxu0 %v13896_v33  ;;  %v13920_v25 = vpack.c.bf16 %v13918_v13, %v13919_v23  ;;  %v13921_v33 = vld [vmem:[#allocation107_spill] sm:$0xff] }
 0x1f7   :  { %8004 = vmatpush3.bf16.msra.mxu1 %v13885_v56  ;;  %v13908_v56 = vld [vmem:[#allocation11_spill] sm:$0xff] }
 0x1f8   :  { %3033 = vmatmul.mubr.f32.vlgmr.msra.gmra.mrb[10].mxu0 %v13537_v16  ;;  %8006 = vmatprep.subr.bf16.mxu1 %v13886_v10  ;;  %v13909_v21 = vpack.c.bf16 %v13907_v58, %v13908_v56  ;;  %v13913_v10 = vpack.c.bf16 %v13813_v1, %v13812_v11 }
 0x1f9   :  { %8140 = vmatpush1.bf16.msra.mxu0 %v13899_v51  ;;  %3233 = vmatprep.mubr.f32.mxu0 %v13900_v63  ;;  %v13922_v51 = vld [vmem:[#allocation106_spill] sm:$0xff] }
 0x1fa   :  { %8142 = vmatprep.subr.bf16.mxu0 %v13903_v6  ;;  %v13923_v63 = vpack.c.bf16 %v13921_v33, %v13922_v51 }
 0x1fb   :  { %8008 = vmatpush3.bf16.msra.mxu1 %v13890_v8  ;;  %v13914_v8 = vpack.c.bf16 %v13815_v48, %v13814_v4 }
 0x1fd   :  { %8144 = vmatpush1.bf16.msra.mxu0 %v13906_v42 }
 0x1fe   :  { %8146 = vmatprep.subr.bf16.mxu0 %v13909_v21  ;;  %2418 = vmatmul.mubr.f32.vlgmr.msra.gmra.mrb[14].mxu1 %v13537_v16  ;;  %v13925_v21 = vld [vmem:[#allocation110_spill] sm:$0xff]  ;;  %v13940_v16 = vld [vmem:[#allocation121_spill] sm:$0xff] }
 0x201   :  { %8148 = vmatpush1.bf16.msra.mxu0 %v13912_v12  ;;  %v13926_v12 = vld [vmem:[#allocation109_spill] sm:$0xff] }
 0x202   :  { %8150 = vmatprep.subr.bf16.mxu0 %v13913_v10  ;;  %v13927_v10 = vpack.c.bf16 %v13925_v21, %v13926_v12 }
 0x205   :  { %8152 = vmatpush1.bf16.msra.mxu0 %v13914_v8  ;;  %v13928_v8 = vld [vmem:[#allocation48_spill] sm:$0xff] }
 0x206   :  { %8154 = vmatprep.subr.bf16.mxu0 %v13917_v24  ;;  %v13930_v22 = vpack.c.bf16 %v13928_v8, %v13929_v40  ;;  %v6734_v24 = vld [vmem:[%s12807_s4] ss:$0 sm:$0xff] }
 0x207   :  { %v767_v59 = vadd.f32 %v6771_v28, %v6734_v24  ;;  %v13943_v40 = vld [vmem:[#allocation124_spill] sm:$0xff]  ;;  %v13948_v28 = vld [vmem:[#allocation129_spill] sm:$0xff] }
 0x208   :  { %v6979_v55 = vpop.f32.mrb[4].mxu0  ;;  %v13950_v24 = vld [vmem:[#allocation13_spill] sm:$0xff] }
 0x209   :  { %8156 = vmatpush1.bf16.msra.mxu0 %v13920_v25  ;;  %v6980_v6 = vpop.f32.mrb[5].mxu0  ;;  %v13931_v25 = vld [vmem:[#allocation114_spill] sm:$0xff] }
 0x20a   :  { %8158 = vmatprep.subr.bf16.mxu0 %v13923_v63  ;;  %v11401_v42 = vadd.f32 %v6980_v6, %v6979_v55  ;;  %v13933_v39 = vpack.c.bf16 %v13931_v25, %v13932_v49  ;;  %v13935_v55 = vld [vmem:[#allocation115_spill] sm:$0xff]  ;;  %v13946_v49 = vld [vmem:[#allocation126_spill] sm:$0xff] }
 0x20b   :  { %v13936_v6 = vpack.c.bf16 %v13934_v26, %v13935_v55  ;;  %v13944_v25 = vld [vmem:[#allocation123_spill] sm:$0xff]  ;;  %v13947_v26 = vpack.c.bf16 %v10722_v19, %v13946_v49 }
 0x20c   :  { %13924 = vst [vmem:[#allocation23_spill] sm:$0xff] %v11401_v42  ;;  %v13941_v42 = vld [vmem:[#allocation120_spill] sm:$0xff] }
 0x20d   :  { %8160 = vmatpush1.bf16.msra.mxu0 %v13927_v10  ;;  %v13942_v8 = vpack.c.bf16 %v13940_v16, %v13941_v42 }
 0x20e   :  { %8162 = vmatprep.subr.bf16.mxu0 %v13930_v22 }
 0x210   :  { %v6804_v63 = vpop.f32.mrb[2].mxu1 }
 0x211   :  { %8164 = vmatpush1.bf16.msra.mxu0 %v13933_v39  ;;  %v6805_v35 = vpop.f32.mrb[3].mxu1  ;;  %v13945_v39 = vpack.c.bf16 %v13943_v40, %v13944_v25  ;;  %v13958_v40 = vld [vmem:[#allocation82_spill] sm:$0xff] }
 0x212   :  { %8166 = vmatprep.subr.bf16.mxu0 %v13936_v6  ;;  %v6806_v10 = vadd.f32 %v6805_v35, %v6804_v63  ;;  %v13949_v35 = vpack.c.bf16 %v13864_v7, %v13948_v28  ;;  %v13951_v63 = vld [vmem:[#allocation12_spill] sm:$0xff]  ;;  %v13954_v6 = vld [vmem:[#allocation79_spill] sm:$0xff] }
 0x214   :  { %v999_v22 = vadd.f32 %v6806_v10, %v767_v59  ;;  %v13953_v59 = vld [vmem:[#allocation80_spill] sm:$0xff] }
 0x215   :  { %8168 = vmatpush1.bf16.msra.mxu0 %v13939_v31  ;;  %v13952_v31 = vpack.c.bf16 %v13950_v24, %v13951_v63  ;;  %v13955_v10 = vpack.c.bf16 %v13953_v59, %v13954_v6  ;;  %v13964_v24 = vld [vmem:[#allocation86_spill] sm:$0xff] }
 0x216   :  { %8170 = vmatprep.subr.bf16.mxu0 %v13942_v8  ;;  %v13956_v8 = vpack.c.bf16 %v10805_v44, %v13773_v52 }
 0x219   :  { %8172 = vmatpush1.bf16.msra.mxu0 %v13945_v39  ;;  %v13957_v39 = vld [vmem:[#allocation16_spill] sm:$0xff] }
 0x21a   :  { %8174 = vmatprep.subr.bf16.mxu0 %v13947_v26  ;;  %v13959_v19 = vpack.c.bf16 %v13957_v39, %v13958_v40  ;;  %v13960_v26 = vld [vmem:[#allocation84_spill] sm:$0xff] }
 0x21b   :  { %v13961_v7 = vpack.c.bf16 %v13882_v53, %v13960_v26 }
 0x21d   :  { %8176 = vmatpush1.bf16.msra.mxu0 %v13949_v35  ;;  %v13962_v35 = vpack.c.bf16 %v10878_v50, %v10871_v43 }
 0x21e   :  { %8178 = vmatprep.subr.bf16.mxu0 %v13952_v31  ;;  %v13963_v31 = vld [vmem:[#allocation87_spill] sm:$0xff] }
 0x21f   :  { %v13965_v59 = vpack.c.bf16 %v13963_v31, %v13964_v24 }
 0x221   :  { %8180 = vmatpush1.bf16.msra.mxu0 %v13955_v10 }
 0x222   :  { %8182 = vmatprep.subr.bf16.mxu0 %v13956_v8  ;;  %v13966_v8 = vpack.c.bf16 %v10938_v60, %v10921_v47  ;;  %v13971_v60 = vld [vmem:[#allocation32_spill] sm:$0xff] }
 0x225   :  { %8184 = vmatpush1.bf16.msra.mxu0 %v13959_v19  ;;  %v13967_v19 = vpack.c.bf16 %v10950_v27, %v10948_v36  ;;  %v13972_v27 = vld [vmem:[#allocation57_spill] sm:$0xff] }
 0x226   :  { %8186 = vmatprep.subr.bf16.mxu0 %v13961_v7  ;;  %v13968_v7 = vpack.c.bf16 %v10970_v37, %v10957_v3  ;;  %v13974_v37 = vld [vmem:[#allocation62_spill] sm:$0xff]  ;;  %v13976_v3 = vld [vmem:[#allocation43_spill] sm:$0xff] }
 0x229   :  { %8188 = vmatpush1.bf16.msra.mxu0 %v13962_v35  ;;  %v7049_v10 = vpop.f32.mrb[6].mxu0 }
 0x22a   :  { %8190 = vmatprep.subr.bf16.mxu0 %v13965_v59  ;;  %v7050_v6 = vpop.f32.mrb[7].mxu0  ;;  %v13969_v59 = vpack.c.bf16 %v11010_v18, %v10991_v57 }
 0x22b   :  { %v11454_v44 = vadd.f32 %v7050_v6, %v7049_v10  ;;  %v13970_v10 = vpack.c.bf16 %v11044_v14, %v11033_v9  ;;  %v13989_v9 = vld [vmem:[#allocation119_spill] sm:$0xff] }
 0x22d   :  { %8192 = vmatpush1.bf16.msra.mxu0 %v13966_v8 }
 0x22e   :  { %8194 = vmatprep.subr.bf16.mxu0 %v13967_v19  ;;  %v13973_v19 = vld [vmem:[#allocation33_spill] sm:$0xff] }
 0x230   :  { %v6839_v35 = vpop.f32.mrb[4].mxu1 }
 0x231   :  { %8196 = vmatpush1.bf16.msra.mxu0 %v13968_v7  ;;  %v6840_v31 = vpop.f32.mrb[5].mxu1  ;;  %v13975_v7 = vld [vmem:[#allocation39_spill] sm:$0xff] }
 0x232   :  { %8198 = vmatprep.subr.bf16.mxu0 %v13969_v59  ;;  %v6841_v6 = vadd.f32 %v6840_v31, %v6839_v35  ;;  %v13977_v59 = vld [vmem:[#allocation10_spill] sm:$0xff]  ;;  %v13979_v35 = vld [vmem:[#allocation93_spill] sm:$0xff] }
 0x233   :  { %v13978_v31 = vld [vmem:[#allocation90_spill] sm:$0xff] }
 0x234   :  { %v1137_v8 = vadd.f32 %v6841_v6, %v999_v22  ;;  %v13981_v22 = vld [vmem:[#allocation99_spill] sm:$0xff]  ;;  %v13982_v6 = vld [vmem:[#allocation102_spill] sm:$0xff] }
 0x235   :  { %8200 = vmatpush1.bf16.msra.mxu0 %v13970_v10  ;;  %v13980_v10 = vld [vmem:[#allocation96_spill] sm:$0xff] }
 0x236   :  { %8202 = vmatprep.subr.bf16.mxu0 %v13971_v60 }
 0x238   :  { %3236 = vmatmul.mubr.f32.vlgmr.msra.gmra.mrb[10].mxu0 %v13972_v27  ;;  %v13983_v27 = vld [vmem:[#allocation105_spill] sm:$0xff] }
 0x239   :  { %8204 = vmatpush1.bf16.msra.mxu0 %v13973_v19  ;;  %3373 = vmatprep.mubr.f32.mxu0 %v13974_v37 }
 0x23a   :  { %8206 = vmatprep.subr.bf16.mxu0 %v13975_v7  ;;  %v13984_v7 = vld [vmem:[#allocation108_spill] sm:$0xff] }
 0x23d   :  { %8208 = vmatpush1.bf16.msra.mxu0 %v13976_v3  ;;  %v13985_v3 = vld [vmem:[#allocation111_spill] sm:$0xff] }
 0x23e   :  { %8210 = vmatprep.subr.bf16.mxu0 %v13977_v59  ;;  %v13986_v59 = vld [vmem:[#allocation113_spill] sm:$0xff] }
 0x241   :  { %8212 = vmatpush1.bf16.msra.mxu0 %v13978_v31 }
 0x242   :  { %8214 = vmatprep.subr.bf16.mxu0 %v13979_v35  ;;  %v13987_v35 = vld [vmem:[#allocation49_spill] sm:$0xff] }
 0x245   :  { %8216 = vmatpush1.bf16.msra.mxu0 %v13980_v10 }
 0x246   :  { %8218 = vmatprep.subr.bf16.mxu0 %v13981_v22  ;;  %v13988_v22 = vld [vmem:[#allocation117_spill] sm:$0xff] }
 0x249   :  { %8220 = vmatpush1.bf16.msra.mxu0 %v13982_v6  ;;  %v7119_v19 = vpop.f32.mrb[8].mxu0 }
 0x24a   :  { %8222 = vmatprep.subr.bf16.mxu0 %v13983_v27  ;;  %v7120_v37 = vpop.f32.mrb[9].mxu0 }
 0x24b   :  { %v11484_v60 = vadd.f32 %v7120_v37, %v7119_v19  ;;  %v13990_v19 = vld [vmem:[#allocation122_spill] sm:$0xff]  ;;  %v13991_v37 = vld [vmem:[#allocation125_spill] sm:$0xff] }
 0x24d   :  { %8224 = vmatpush1.bf16.msra.mxu0 %v13984_v7  ;;  %v13992_v7 = vld [vmem:[#allocation128_spill] sm:$0xff] }
 0x24e   :  { %8226 = vmatprep.subr.bf16.mxu0 %v13985_v3  ;;  %v13993_v3 = vld [vmem:[#allocation131_spill] sm:$0xff] }
 0x251   :  { %8228 = vmatpush1.bf16.msra.mxu0 %v13986_v59  ;;  %v6874_v31 = vpop.f32.mrb[6].mxu1  ;;  %v13994_v59 = vld [vmem:[#allocation78_spill] sm:$0xff] }
 0x252   :  { %8230 = vmatprep.subr.bf16.mxu0 %v13987_v35  ;;  %v6875_v10 = vpop.f32.mrb[7].mxu1  ;;  %v13995_v35 = vld [vmem:[#allocation14_spill] sm:$0xff] }
 0x253   :  { %v6876_v14 = vadd.f32 %v6875_v10, %v6874_v31  ;;  %v13996_v31 = vld [vmem:[#allocation83_spill] sm:$0xff]  ;;  %v13997_v10 = vld [vmem:[#allocation38_spill] sm:$0xff] }
 0x255   :  { %8232 = vmatpush1.bf16.msra.mxu0 %v13988_v22  ;;  %v1245_v6 = vadd.f32 %v6876_v14, %v1137_v8  ;;  %v13998_v14 = vld [vmem:[#allocation40_spill] sm:$0xff] }
 0x256   :  { %8234 = vmatprep.subr.bf16.mxu0 %v13989_v9  ;;  %v13999_v8 = vld [vmem:[#allocation44_spill] sm:$0xff]  ;;  %v14006_v9 = vld [vmem:[#allocation21_spill] sm:$0xff] }
 0x257   :  { %v1413_v27 = vadd.f32 %v11354_v61, %v1245_v6  ;;  %v14000_v61 = vld [vmem:[#allocation88_spill] sm:$0xff]  ;;  %v14001_v6 = vld [vmem:[#allocation45_spill] sm:$0xff] }
 0x259   :  { %8236 = vmatpush1.bf16.msra.mxu0 %v13990_v19 }
 0x25a   :  { %8238 = vmatprep.subr.bf16.mxu0 %v13991_v37  ;;  %v14002_v37 = vld [vmem:[#allocation46_spill] sm:$0xff] }
 0x25d   :  { %8240 = vmatpush1.bf16.msra.mxu0 %v13992_v7 }
 0x25e   :  { %8242 = vmatprep.subr.bf16.mxu0 %v13993_v3  ;;  %v14003_v3 = vld [vmem:[#allocation64_spill] sm:$0xff] }
 0x261   :  { %8244 = vmatpush1.bf16.msra.mxu0 %v13994_v59  ;;  %v14004_v59 = vand.u32 4294901760, %v13895_v38 }
 0x262   :  { %8246 = vmatprep.subr.bf16.mxu0 %v13995_v35  ;;  %v14005_v35 = vand.u32 4294901760, %v13894_v45  ;;  %v11524_v45 = vld [vmem:[%s12812_s9 + $0x80] sm:$0xff] }
 0x265   :  { %8248 = vmatpush1.bf16.msra.mxu0 %v13996_v31  ;;  %v8265_v31 = vpack.c.bf16 %v14005_v35, %v14004_v59  ;;  %v11546_v59 = vld [vmem:[%s12812_s9 + $0x8] sm:$0xff] }
 0x266   :  { %8250 = vmatprep.subr.bf16.mxu0 %v13997_v10  ;;  %14013 = vst [vmem:[#allocation24_spill] sm:$0xff] %v11546_v59 }
 0x269   :  { %8252 = vmatpush1.bf16.msra.mxu0 %v13998_v14 }
 0x26a   :  { %8254 = vmatprep.subr.bf16.mxu0 %v13999_v8  ;;  %v14007_v8 = vand.u32 4294901760, %v13898_v46  ;;  %v11534_v46 = vld [vmem:[%s12812_s9] sm:$0xff] }
 0x26b   :  { %v13257_v35 = vand.u32 4294901760, %v11534_v46 }
 0x26d   :  { %8256 = vmatpush1.bf16.msra.mxu0 %v14000_v61  ;;  %v14008_v61 = vand.u32 4294901760, %v13897_v29  ;;  %v11529_v29 = vld [vmem:[%s12812_s9 + $0x88] sm:$0xff] }
 0x26e   :  { %8258 = vmatprep.subr.bf16.mxu0 %v14001_v6 }
 0x26f   :  { %v8267_v14 = vpack.c.bf16 %v14008_v61, %v14007_v8  ;;  %v11569_v8 = vld [vmem:[%s12812_s9 + $0x10] sm:$0xff]  ;;  %v11574_v61 = vld [vmem:[%s12812_s9 + $0x18] sm:$0xff] }
 0x271   :  { %8260 = vmatpush1.bf16.msra.mxu0 %v14002_v37  ;;  %v6944_v7 = vpop.f32.mrb[8].mxu1  ;;  %v14009_v37 = vand.u32 4294901760, %v13902_v32  ;;  %v13255_v32 = vand.u32 4294901760, %v11524_v45 }
 0x272   :  { %8262 = vmatprep.subr.bf16.mxu0 %v14003_v3  ;;  %v6945_v19 = vpop.f32.mrb[9].mxu1  ;;  %v14010_v3 = vand.u32 4294901760, %v13901_v54 }
 0x273   :  { %v6946_v10 = vadd.f32 %v6945_v19, %v6944_v7  ;;  %v13254_v7 = vand.u32 4294901760, %v11529_v29  ;;  %v14017_v19 = vand.u32 4294901760, %v13907_v58  ;;  %v11579_v58 = vld [vmem:[%s12812_s9 + $0xa0] sm:$0xff] }
 0x274   :  { %v8269_v38 = vpack.c.bf16 %v14010_v3, %v14009_v37  ;;  %v14012_v3 = vand.u32 4294901760, %v13904_v17  ;;  %v11557_v17 = vld [vmem:[%s12812_s9 + $0x98] sm:$0xff] }
 0x275   :  { %8264 = vmatpush1.bf16.msra.mxu0 %v14006_v9  ;;  %v1517_v6 = vadd.f32 %v6946_v10, %v1413_v27  ;;  %v11552_v27 = vld [vmem:[%s12812_s9 + $0x90] sm:$0xff]  ;;  %14015 = vst [vmem:[#allocation81_spill] sm:$0xff] %v11557_v17 }
 0x276   :  { %8266 = vmatprep.subr.bf16.mxu0 %v8265_v31  ;;  %14014 = vst [vmem:[#allocation25_spill] sm:$0xff] %v11552_v27  ;;  %v13256_v31 = vand.u32 4294901760, %v11546_v59  ;;  %v13261_v10 = vand.u32 4294901760, %v11552_v27  ;;  %v14025_v27 = vand.u32 4294901760, %v11569_v8  ;;  %v14026_v59 = vand.u32 4294901760, %v11574_v61 }
 0x277   :  { %1521 = vst.msk [vmem:[#allocation6] sm:$0x3] %vm1520_vm1, %v1517_v6  ;;  %v11626_v6 = vld [vmem:[%s12812_s9 + $0xb8] sm:$0xff] }
 0x278   :  { %3377 = vmatmul.mubr.f32.vlgmr.msra.gmra.mrb[10].mxu0 %v13893_v41  ;;  %v14011_v41 = vand.u32 4294901760, %v13905_v20  ;;  %v14016_v20 = vand.u32 4294901760, %v13908_v56  ;;  %v11585_v56 = vpack.c.bf16 %v13254_v7, %v13255_v32  ;;  %v11609_v7 = vpack.c.bf16 %v13256_v31, %v13257_v35 }
 0x279   :  { %8268 = vmatpush1.bf16.msra.mxu0 %v8267_v14  ;;  %3640 = vmatprep.mubr.f32.mxu0 %v13585_v34  ;;  %v13260_v14 = vand.u32 4294901760, %v11557_v17  ;;  %v14021_v31 = vand.u32 4294901760, %v13911_v0  ;;  %v14022_v35 = vand.u32 4294901760, %v13910_v30  ;;  %v14033_v30 = vand.u32 4294901760, %v13915_v2 }
 0x27a   :  { %v8271_v54 = vpack.c.bf16 %v14012_v3, %v14011_v41  ;;  %8270 = vmatprep.subr.bf16.mxu0 %v8269_v38  ;;  %v8273_v37 = vpack.c.bf16 %v14017_v19, %v14016_v20  ;;  %14018 = vst [vmem:[#allocation26_spill] sm:$0xff] %v11585_v56  ;;  %v11592_v41 = vld [vmem:[%s12812_s9 + $0xa8] sm:$0xff]  ;;  %v11598_v20 = vld [vmem:[%s12812_s9 + $0x20] sm:$0xff]  ;;  %14019 = vst [vmem:[#allocation27_spill] sm:$0xff] %v11609_v7  ;;  %8394 = vmatprep.subr.bf16.mxu1 %v11585_v56 }
 0x27b   :  { %v11603_v19 = vld [vmem:[%s12812_s9 + $0x28] sm:$0xff]  ;;  %v11615_v32 = vpack.c.bf16 %v13260_v14, %v13261_v10  ;;  %v11621_v38 = vld [vmem:[%s12812_s9 + $0xb0] sm:$0xff]  ;;  %v8275_v17 = vpack.c.bf16 %v14022_v35, %v14021_v31  ;;  %v14023_v14 = vand.u32 4294901760, %v13812_v11  ;;  %v14024_v10 = vand.u32 4294901760, %v13813_v1  ;;  %8396 = vmatpush3.bf16.msra.mxu1 %v11609_v7 }
 0x27c   :  { %v14027_v35 = vand.u32 4294901760, %v11579_v58  ;;  %v14028_v11 = vand.u32 4294901760, %v11592_v41  ;;  %v14035_v7 = vand.u32 4294901760, %v11603_v19 }
 0x27d   :  { %14020 = vst [vmem:[#allocation28_spill] sm:$0xff] %v11615_v32  ;;  %8272 = vmatpush1.bf16.msra.mxu0 %v8271_v54  ;;  %v8277_v3 = vpack.c.bf16 %v14024_v10, %v14023_v14  ;;  %v11642_v54 = vpack.c.bf16 %v14026_v59, %v14025_v27  ;;  %8398 = vmatprep.subr.bf16.mxu1 %v11615_v32  ;;  %v11658_v59 = vld [vmem:[%s12812_s9 + $0x30] sm:$0xff]  ;;  %v11663_v27 = vld [vmem:[%s12812_s9 + $0x38] sm:$0xff]  ;;  %v11668_v10 = vld [vmem:[%s12812_s9 + $0xc0] sm:$0xff]  ;;  %v14034_v32 = vand.u32 4294901760, %v11598_v20 }
 0x27e   :  { %8274 = vmatprep.subr.bf16.mxu0 %v8273_v37  ;;  %v11651_v1 = vpack.c.bf16 %v14028_v11, %v14027_v35  ;;  %v11673_v14 = vld [vmem:[%s12812_s9 + $0xc8] sm:$0xff]  ;;  %v14030_v35 = vand.u32 4294901760, %v13814_v4  ;;  %v14031_v11 = vand.u32 4294901760, %v13815_v48  ;;  %v14032_v37 = vand.u32 4294901760, %v13916_v15 }
 0x27f   :  { %8400 = vmatpush3.bf16.msra.mxu1 %v11642_v54  ;;  %v11688_v56 = vpack.c.bf16 %v14035_v7, %v14034_v32  ;;  %v13272_v4 = vand.u32 4294901760, %v11663_v27  ;;  %v14037_v48 = vand.u32 4294901760, %v11621_v38  ;;  %v14038_v15 = vand.u32 4294901760, %v11626_v6  ;;  %v11704_v32 = vld [vmem:[%s12812_s9 + $0x40] sm:$0xff]  ;;  %v11709_v7 = vld [vmem:[%s12812_s9 + $0x48] sm:$0xff] }
 0x280   :  { %14029 = vst [vmem:[#allocation29_spill] sm:$0xff] %v11651_v1  ;;  %v8279_v31 = vpack.c.bf16 %v14031_v11, %v14030_v35  ;;  %v8281_v0 = vpack.c.bf16 %v14033_v30, %v14032_v37  ;;  %8402 = vmatprep.subr.bf16.mxu1 %v11651_v1  ;;  %v14040_v37 = vand.u32 4294901760, %v13919_v23  ;;  %v14041_v35 = vand.u32 4294901760, %v13918_v13 }
 0x281   :  { %8276 = vmatpush1.bf16.msra.mxu0 %v8275_v17  ;;  %14036 = vst [vmem:[#allocation30_spill] sm:$0xff] %v11688_v56  ;;  %v13273_v17 = vand.u32 4294901760, %v11658_v59  ;;  %v11697_v2 = vpack.c.bf16 %v14038_v15, %v14037_v48  ;;  %v14042_v48 = vand.u32 4294901760, %v13922_v51  ;;  %v14043_v15 = vand.u32 4294901760, %v13921_v33 }
 0x282   :  { %8278 = vmatprep.subr.bf16.mxu0 %v8277_v3  ;;  %v8283_v11 = vpack.c.bf16 %v14041_v35, %v14040_v37  ;;  %v14045_v13 = vand.u32 4294901760, %v11668_v10  ;;  %v14046_v51 = vand.u32 4294901760, %v11673_v14  ;;  %v14049_v37 = vand.u32 4294901760, %v13925_v21 }
 0x283   :  { %14039 = vst [vmem:[#allocation31_spill] sm:$0xff] %v11697_v2  ;;  %v8285_v30 = vpack.c.bf16 %v14043_v15, %v14042_v48  ;;  %8404 = vmatpush3.bf16.msra.mxu1 %v11688_v56  ;;  %v11724_v3 = vpack.c.bf16 %v13272_v4, %v13273_v17  ;;  %v14050_v48 = vld [vmem:[#allocation112_spill] sm:$0xff] }
 0x284   :  { %8406 = vmatprep.subr.bf16.mxu1 %v11697_v2  ;;  %v11733_v33 = vpack.c.bf16 %v14046_v51, %v14045_v13  ;;  %v14051_v15 = vand.u32 4294901760, %v14050_v48  ;;  %v14052_v4 = vld [vmem:[#allocation48_spill] sm:$0xff]  ;;  %v14054_v2 = vand.u32 4294901760, %v11709_v7  ;;  %v14064_v48 = vand.u32 4294901760, %v13937_v5 }
 0x285   :  { %8280 = vmatpush1.bf16.msra.mxu0 %v8279_v31  ;;  %14044 = vst [vmem:[#allocation94_spill] sm:$0xff] %v11724_v3  ;;  %v13276_v31 = vand.u32 4294901760, %v11704_v32  ;;  %v14053_v17 = vand.u32 4294901760, %v14052_v4  ;;  %v14060_v4 = vand.u32 4294901760, %v13935_v55  ;;  %v14066_v55 = vand.u32 4294901760, %v13940_v16 }
 0x286   :  { %8282 = vmatprep.subr.bf16.mxu0 %v8281_v0  ;;  %14047 = vst [vmem:[#allocation95_spill] sm:$0xff] %v11733_v33  ;;  %v14048_v0 = vand.u32 4294901760, %v13926_v12  ;;  %v14056_v12 = vld [vmem:[#allocation67_spill] sm:$0xff]  ;;  %v14071_v5 = vand.u32 4294901760, %v13946_v49 }
 0x287   :  { %v8289_v23 = vpack.c.bf16 %v14053_v17, %v14051_v15  ;;  %8408 = vmatpush3.bf16.msra.mxu1 %v11724_v3  ;;  %v11748_v13 = vpack.c.bf16 %v14054_v2, %v13276_v31  ;;  %v14057_v21 = vand.u32 4294901760, %v14056_v12  ;;  %v14061_v17 = vld [vmem:[#allocation116_spill] sm:$0xff] }
 0x288   :  { %v8287_v35 = vpack.c.bf16 %v14049_v37, %v14048_v0  ;;  %8410 = vmatprep.subr.bf16.mxu1 %v11733_v33  ;;  %v14062_v0 = vand.u32 4294901760, %v14061_v17  ;;  %v6735_v2 = vld [vmem:[%s12809_s6] ss:$0 sm:$0xff] }
 0x289   :  { %8284 = vmatpush1.bf16.msra.mxu0 %v8283_v11  ;;  %14055 = vst [vmem:[#allocation97_spill] sm:$0xff] %v11748_v13  ;;  %v14058_v11 = vld [vmem:[#allocation114_spill] sm:$0xff] }
 0x28a   :  { %8286 = vmatprep.subr.bf16.mxu0 %v8285_v30  ;;  %v14059_v30 = vand.u32 4294901760, %v14058_v11  ;;  %v8293_v37 = vpack.c.bf16 %v14062_v0, %v14060_v4  ;;  %v14068_v0 = vand.u32 4294901760, %v13944_v25  ;;  %v14077_v25 = vand.u32 4294901760, %v13951_v63 }
 0x28b   :  { %8412 = vmatpush3.bf16.msra.mxu1 %v11748_v13  ;;  %v14088_v63 = vand.u32 4294901760, %v13957_v39  ;;  %v14096_v39 = vand.u32 4294901760, %v10921_v47  ;;  %v14107_v47 = vand.u32 4294901760, %v11010_v18  ;;  %v14114_v18 = vld [vmem:[#allocation33_spill] sm:$0xff] }
 0x28c   :  { %v8291_v51 = vpack.c.bf16 %v14059_v30, %v14057_v21  ;;  %v14067_v30 = vld [vmem:[#allocation23_spill] sm:$0xff] }
 0x28d   :  { %8288 = vmatpush1.bf16.msra.mxu0 %v8287_v35  ;;  %v14063_v35 = vand.u32 4294901760, %v13938_v62  ;;  %v1670_v4 = vadd.f32 %v14067_v30, %v6735_v2  ;;  %v14075_v2 = vld [vmem:[#allocation130_spill] sm:$0xff] }
 0x28e   :  { %8290 = vmatprep.subr.bf16.mxu0 %v8289_v23  ;;  %v14065_v23 = vand.u32 4294901760, %v13941_v42 }
 0x28f   :  { %v8295_v15 = vpack.c.bf16 %v14064_v48, %v14063_v35  ;;  %v14074_v48 = vand.u32 4294901760, %v13948_v28 }
 0x290   :  { %v8297_v21 = vpack.c.bf16 %v14066_v55, %v14065_v23  ;;  %v14078_v23 = vld [vmem:[#allocation13_spill] sm:$0xff] }
 0x291   :  { %8292 = vmatpush1.bf16.msra.mxu0 %v8291_v51  ;;  %v7014_v12 = vpop.f32.mrb[10].mxu1  ;;  %v14069_v51 = vld [vmem:[#allocation124_spill] sm:$0xff] }
 0x292   :  { %8294 = vmatprep.subr.bf16.mxu0 %v8293_v37  ;;  %v7015_v11 = vpop.f32.mrb[11].mxu1  ;;  %v14070_v31 = vand.u32 4294901760, %v14069_v51  ;;  %v14072_v37 = vld [vmem:[#allocation127_spill] sm:$0xff] }
 0x293   :  { %v7016_v17 = vadd.f32 %v7015_v11, %v7014_v12  ;;  %v14073_v35 = vand.u32 4294901760, %v14072_v37  ;;  %v14076_v12 = vand.u32 4294901760, %v14075_v2  ;;  %v14082_v11 = vld [vmem:[#allocation80_spill] sm:$0xff]  ;;  %v14094_v2 = vld [vmem:[#allocation87_spill] sm:$0xff] }
 0x294   :  { %v8299_v62 = vpack.c.bf16 %v14070_v31, %v14068_v0  ;;  %v14079_v31 = vand.u32 4294901760, %v14078_v23  ;;  %v14083_v30 = vand.u32 4294901760, %v14082_v11  ;;  %v14087_v0 = vand.u32 4294901760, %v13958_v40  ;;  %v14100_v23 = vld [vmem:[#allocation18_spill] sm:$0xff] }
 0x295   :  { %8296 = vmatpush1.bf16.msra.mxu0 %v8295_v15  ;;  %v1902_v13 = vadd.f32 %v7016_v17, %v1670_v4  ;;  %v8301_v42 = vpack.c.bf16 %v14073_v35, %v14071_v5  ;;  %v8303_v15 = vpack.c.bf16 %v14076_v12, %v14074_v48  ;;  %v14090_v5 = vand.u32 4294901760, %v13882_v53 }
 0x296   :  { %8298 = vmatprep.subr.bf16.mxu0 %v8297_v21  ;;  %v8305_v55 = vpack.c.bf16 %v14079_v31, %v14077_v25  ;;  %v14080_v21 = vld [vmem:[#allocation79_spill] sm:$0xff]  ;;  %v8311_v51 = vpack.c.bf16 %v14088_v63, %v14087_v0  ;;  %v14091_v35 = vand.u32 4294901760, %v10871_v43  ;;  %v14093_v48 = vand.u32 4294901760, %v13964_v24 }
 0x297   :  { %v2040_v16 = vadd.f32 %v11454_v44, %v1902_v13  ;;  %v14081_v49 = vand.u32 4294901760, %v14080_v21  ;;  %v14084_v44 = vand.u32 4294901760, %v13773_v52  ;;  %v14085_v13 = vld [vmem:[#allocation15_spill] sm:$0xff]  ;;  %v14092_v52 = vand.u32 4294901760, %v10878_v50  ;;  %v14104_v21 = vld [vmem:[#allocation20_spill] sm:$0xff] }
 0x298   :  { %v14086_v28 = vand.u32 4294901760, %v14085_v13  ;;  %v14095_v40 = vand.u32 4294901760, %v14094_v2  ;;  %v14099_v53 = vand.u32 4294901760, %v10948_v36  ;;  %v14101_v43 = vand.u32 4294901760, %v14100_v23  ;;  %v14102_v50 = vld [vmem:[#allocation19_spill] sm:$0xff]  ;;  %v14110_v13 = vld [vmem:[#allocation22_spill] sm:$0xff] }
 0x299   :  { %8300 = vmatpush1.bf16.msra.mxu0 %v8299_v62  ;;  %v8307_v4 = vpack.c.bf16 %v14083_v30, %v14081_v49  ;;  %v14089_v62 = vand.u32 4294901760, %v13960_v26  ;;  %v14105_v24 = vand.u32 4294901760, %v14104_v21  ;;  %v14106_v11 = vand.u32 4294901760, %v10991_v57  ;;  %v14121_v2 = vld [vmem:[#allocation99_spill] sm:$0xff] }
 0x29a   :  { %8302 = vmatprep.subr.bf16.mxu0 %v8301_v42  ;;  %v8309_v17 = vpack.c.bf16 %v14086_v28, %v14084_v44  ;;  %v8315_v42 = vpack.c.bf16 %v14092_v52, %v14091_v35  ;;  %v8317_v12 = vpack.c.bf16 %v14095_v40, %v14093_v48  ;;  %v8321_v31 = vpack.c.bf16 %v14101_v43, %v14099_v53  ;;  %v14116_v35 = vld [vmem:[#allocation43_spill] sm:$0xff]  ;;  %v14117_v52 = vld [vmem:[#allocation10_spill] sm:$0xff]  ;;  %v14119_v48 = vld [vmem:[#allocation93_spill] sm:$0xff] }
 0x29b   :  { %v8313_v37 = vpack.c.bf16 %v14090_v5, %v14089_v62  ;;  %v8325_v30 = vpack.c.bf16 %v14107_v47, %v14106_v11  ;;  %v14111_v36 = vand.u32 4294901760, %v14110_v13  ;;  %v14112_v62 = vld [vmem:[#allocation32_spill] sm:$0xff]  ;;  %v14113_v5 = vld [vmem:[#allocation53_spill] sm:$0xff]  ;;  %v14122_v40 = vld [vmem:[#allocation102_spill] sm:$0xff] }
 0x29c   :  { %v14128_v43 = vld [vmem:[#allocation119_spill] sm:$0xff]  ;;  %v14137_v47 = vld [vmem:[#allocation40_spill] sm:$0xff]  ;;  %v14141_v13 = vld [vmem:[#allocation46_spill] sm:$0xff] }
 0x29d   :  { %8304 = vmatpush1.bf16.msra.mxu0 %v8303_v15  ;;  %v14097_v15 = vld [vmem:[#allocation17_spill] sm:$0xff]  ;;  %v14132_v21 = vld [vmem:[#allocation131_spill] sm:$0xff] }
 0x29e   :  { %8306 = vmatprep.subr.bf16.mxu0 %v8305_v55  ;;  %v14098_v26 = vand.u32 4294901760, %v14097_v15  ;;  %v14103_v55 = vand.u32 4294901760, %v14102_v50  ;;  %v14130_v50 = vld [vmem:[#allocation125_spill] sm:$0xff]  ;;  %v14135_v11 = vld [vmem:[#allocation83_spill] sm:$0xff] }
 0x2a0   :  { %v8319_v25 = vpack.c.bf16 %v14098_v26, %v14096_v39  ;;  %v8323_v49 = vpack.c.bf16 %v14105_v24, %v14103_v55  ;;  %v14126_v39 = vld [vmem:[#allocation113_spill] sm:$0xff]  ;;  %v14131_v55 = vld [vmem:[#allocation128_spill] sm:$0xff]  ;;  %v14133_v24 = vld [vmem:[#allocation78_spill] sm:$0xff] }
 0x2a1   :  { %8308 = vmatpush1.bf16.msra.mxu0 %v8307_v4  ;;  %v14108_v4 = vld [vmem:[#allocation65_spill] sm:$0xff] }
 0x2a2   :  { %8310 = vmatprep.subr.bf16.mxu0 %v8309_v17  ;;  %v14109_v44 = vand.u32 4294901760, %v14108_v4  ;;  %v14127_v26 = vld [vmem:[#allocation49_spill] sm:$0xff]  ;;  %v14139_v4 = vld [vmem:[#allocation88_spill] sm:$0xff] }
 0x2a4   :  { %v8327_v28 = vpack.c.bf16 %v14111_v36, %v14109_v44  ;;  %v14140_v44 = vld [vmem:[#allocation45_spill] sm:$0xff]  ;;  %v14142_v36 = vld [vmem:[#allocation64_spill] sm:$0xff] }
 0x2a5   :  { %8312 = vmatpush1.bf16.msra.mxu0 %v8311_v51 }
 0x2a6   :  { %8314 = vmatprep.subr.bf16.mxu0 %v8313_v37  ;;  %v14115_v37 = vld [vmem:[#allocation39_spill] sm:$0xff] }
 0x2a9   :  { %8316 = vmatpush1.bf16.msra.mxu0 %v8315_v42  ;;  %v14118_v42 = vld [vmem:[#allocation90_spill] sm:$0xff] }
 0x2aa   :  { %8318 = vmatprep.subr.bf16.mxu0 %v8317_v12  ;;  %v14124_v12 = vld [vmem:[#allocation108_spill] sm:$0xff] }
 0x2ad   :  { %8320 = vmatpush1.bf16.msra.mxu0 %v8319_v25 }
 0x2ae   :  { %8322 = vmatprep.subr.bf16.mxu0 %v8321_v31  ;;  %v14129_v31 = vld [vmem:[#allocation122_spill] sm:$0xff] }
 0x2b1   :  { %8324 = vmatpush1.bf16.msra.mxu0 %v8323_v49  ;;  %v7084_v17 = vpop.f32.mrb[12].mxu1  ;;  %v14134_v49 = vld [vmem:[#allocation14_spill] sm:$0xff] }
 0x2b2   :  { %8326 = vmatprep.subr.bf16.mxu0 %v8325_v30  ;;  %v7085_v0 = vpop.f32.mrb[13].mxu1  ;;  %v14138_v30 = vld [vmem:[#allocation44_spill] sm:$0xff] }
 0x2b3   :  { %v7086_v63 = vadd.f32 %v7085_v0, %v7084_v17  ;;  %v3811_v17 = vld [vmem:[%s12812_s9 + $0xd0] sm:$0xff]  ;;  %v3812_v0 = vld [vmem:[%s12812_s9 + $0xd8] sm:$0xff] }
 0x2b5   :  { %8328 = vmatpush1.bf16.msra.mxu0 %v8327_v28  ;;  %v2148_v51 = vadd.f32 %v7086_v63, %v2040_v16  ;;  %v14120_v16 = vld [vmem:[#allocation96_spill] sm:$0xff]  ;;  %v14143_v28 = vmov 0.0   ;;  %v3904_v63 = vand.u32 4294901760, %v3811_v17 }
 0x2b6   :  { %8330 = vmatprep.subr.bf16.mxu0 %v14112_v62  ;;  %v3795_v62 = vld [vmem:[%s12812_s9 + $0x50] sm:$0xff] }
 0x2b7   :  { %v2316_v57 = vadd.f32 %v11484_v60, %v2148_v51  ;;  %v14123_v60 = vld [vmem:[#allocation105_spill] sm:$0xff]  ;;  %v3907_v51 = vand.u32 4294901760, %v3812_v0 }
 0x2b8   :  { %3642 = vmatmul.mubr.f32.vlgmr.msra.gmra.mrb[10].mxu0 %v14113_v5 }
 0x2b9   :  { %8332 = vmatpush1.bf16.msra.mxu0 %v14114_v18  ;;  %3777 = vmatprep.mubr.f32.mxu0 %v13585_v34  ;;  %v14125_v34 = vld [vmem:[#allocation111_spill] sm:$0xff]  ;;  %v11882_v18 = vpack.c.bf16 %v3907_v51, %v3904_v63 }
 0x2ba   :  { %8334 = vmatprep.subr.bf16.mxu0 %v14115_v37 }
 0x2bb   :  { %14144 = vst [vmem:[#allocation98_spill] sm:$0xff] %v11882_v18  ;;  %8414 = vmatprep.subr.bf16.mxu1 %v11882_v18 }
 0x2bd   :  { %8336 = vmatpush1.bf16.msra.mxu0 %v14116_v35  ;;  %v3813_v35 = vld [vmem:[%s12812_s9 + $0xe0] sm:$0xff] }
 0x2be   :  { %8338 = vmatprep.subr.bf16.mxu0 %v14117_v52  ;;  %v3814_v52 = vld [vmem:[%s12812_s9 + $0xe8] sm:$0xff] }
 0x2c1   :  { %8340 = vmatpush1.bf16.msra.mxu0 %v14118_v42  ;;  %v3910_v42 = vand.u32 4294901760, %v3813_v35 }
 0x2c2   :  { %8342 = vmatprep.subr.bf16.mxu0 %v14119_v48  ;;  %v3913_v48 = vand.u32 4294901760, %v3814_v52 }
 0x2c5   :  { %8344 = vmatpush1.bf16.msra.mxu0 %v14120_v16  ;;  %v3797_v16 = vld [vmem:[%s12812_s9 + $0x60] sm:$0xff] }
 0x2c6   :  { %8346 = vmatprep.subr.bf16.mxu0 %v14121_v2  ;;  %v3798_v2 = vld [vmem:[%s12812_s9 + $0x68] sm:$0xff] }
 0x2c9   :  { %8348 = vmatpush1.bf16.msra.mxu0 %v14122_v40  ;;  %v3862_v40 = vand.u32 4294901760, %v3797_v16 }
 0x2ca   :  { %8350 = vmatprep.subr.bf16.mxu0 %v14123_v60  ;;  %v3865_v60 = vand.u32 4294901760, %v3798_v2 }
 0x2cd   :  { %8352 = vmatpush1.bf16.msra.mxu0 %v14124_v12  ;;  %v11900_v12 = vpack.c.bf16 %v3913_v48, %v3910_v42 }
 0x2ce   :  { %8354 = vmatprep.subr.bf16.mxu0 %v14125_v34  ;;  %v14147_v34 = vand.u32 4294901760, %v11524_v45 }
 0x2cf   :  { %14146 = vst [vmem:[#allocation47_spill] sm:$0xff] %v11900_v12 }
 0x2d1   :  { %8356 = vmatpush1.bf16.msra.mxu0 %v14126_v39  ;;  %v7154_v15 = vpop.f32.mrb[14].mxu1  ;;  %v11905_v39 = vsub.f32 %v11524_v45, %v14147_v34  ;;  %v11948_v34 = vsub.f32 %v3812_v0, %v3907_v51 }
 0x2d2   :  { %8358 = vmatprep.subr.bf16.mxu0 %v14127_v26  ;;  %v7155_v25 = vpop.f32.mrb[15].mxu1 }
 0x2d3   :  { %v7156_v53 = vadd.f32 %v7155_v25, %v7154_v15  ;;  %14148 = vst [vmem:[#allocation54_spill] sm:$0xff] %v11905_v39  ;;  %v14149_v15 = vand.u32 4294901760, %v11529_v29  ;;  %v11912_v25 = vpack.c.bf16 %v3865_v60, %v3862_v40  ;;  %14156 = vst [vmem:[#allocation70_spill] sm:$0xff] %v11948_v34 }
 0x2d5   :  { %8360 = vmatpush1.bf16.msra.mxu0 %v13988_v22  ;;  %v2420_v23 = vadd.f32 %v7156_v53, %v2316_v57  ;;  %v14136_v22 = vld [vmem:[#allocation38_spill] sm:$0xff]  ;;  %v11910_v26 = vsub.f32 %v11529_v29, %v14149_v15  ;;  %14151 = vst [vmem:[#allocation58_spill] sm:$0xff] %v11912_v25  ;;  %v3800_v29 = vld [vmem:[%s12812_s9 + $0x78] sm:$0xff] }
 0x2d6   :  { %8362 = vmatprep.subr.bf16.mxu0 %v14128_v43  ;;  %v3815_v53 = vld [vmem:[%s12812_s9 + $0xf0] sm:$0xff] }
 0x2d7   :  { %2424 = vst.msk [vmem:[#allocation4] sm:$0x3] %vm2423_vm2, %v2420_v23  ;;  %14150 = vst [vmem:[#allocation56_spill] sm:$0xff] %v11910_v26  ;;  %v3816_v23 = vld [vmem:[%s12812_s9 + $0xf8] sm:$0xff]  ;;  %v3916_v43 = vand.u32 4294901760, %v3815_v53 }
 0x2d8   :  { %v3919_v45 = vand.u32 4294901760, %v3816_v23 }
 0x2d9   :  { %8364 = vmatpush1.bf16.msra.mxu0 %v14129_v31  ;;  %v3799_v31 = vld [vmem:[%s12812_s9 + $0x70] sm:$0xff] }
 0x2da   :  { %8366 = vmatprep.subr.bf16.mxu0 %v14130_v50  ;;  %v13282_v50 = vand.u32 4294901760, %v11905_v39 }
 0x2dd   :  { %8368 = vmatpush1.bf16.msra.mxu0 %v14131_v55  ;;  %v13279_v55 = vand.u32 4294901760, %v11910_v26 }
 0x2de   :  { %8370 = vmatprep.subr.bf16.mxu0 %v14132_v21  ;;  %v3868_v21 = vand.u32 4294901760, %v3799_v31 }
 0x2e1   :  { %8372 = vmatpush1.bf16.msra.mxu0 %v14133_v24  ;;  %v3871_v24 = vand.u32 4294901760, %v3800_v29 }
 0x2e2   :  { %8374 = vmatprep.subr.bf16.mxu0 %v14134_v49  ;;  %v11930_v49 = vpack.c.bf16 %v3919_v45, %v3916_v43 }
 0x2e4   :  { %14152 = vst [vmem:[#allocation59_spill] sm:$0xff] %v11930_v49 }
 0x2e5   :  { %8376 = vmatpush1.bf16.msra.mxu0 %v14135_v11  ;;  %v4053_v11 = vsub.f32 %v11905_v39, %v13282_v50 }
 0x2e6   :  { %8378 = vmatprep.subr.bf16.mxu0 %v14136_v22  ;;  %v4060_v22 = vsub.f32 %v11910_v26, %v13279_v55 }
 0x2e9   :  { %8380 = vmatpush1.bf16.msra.mxu0 %v14137_v47  ;;  %v11938_v47 = vpack.c.bf16 %v3871_v24, %v3868_v21 }
 0x2ea   :  { %8382 = vmatprep.subr.bf16.mxu0 %v14138_v30  ;;  %v4054_v30 = vand.u32 4294901760, %v4053_v11 }
 0x2eb   :  { %14153 = vst [vmem:[#allocation63_spill] sm:$0xff] %v11938_v47 }
 0x2ed   :  { %8384 = vmatpush1.bf16.msra.mxu0 %v14139_v4  ;;  %v4061_v4 = vand.u32 4294901760, %v4060_v22  ;;  %v13280_v22 = vand.u32 4294901760, %v11948_v34 }
 0x2ee   :  { %8386 = vmatprep.subr.bf16.mxu0 %v14140_v44 }
 0x2ef   :  { %v11942_v44 = vpack.c.bf16 %v4061_v4, %v4054_v30  ;;  %v4130_v0 = vsub.f32 %v11948_v34, %v13280_v22 }
 0x2f1   :  { %8388 = vmatpush1.bf16.msra.mxu0 %v14141_v13  ;;  %14154 = vst [vmem:[#allocation66_spill] sm:$0xff] %v11942_v44  ;;  %v11945_v13 = vsub.f32 %v3811_v17, %v3904_v63  ;;  %v11960_v63 = vsub.f32 %v3813_v35, %v3910_v42  ;;  %v11976_v35 = vsub.f32 %v3798_v2, %v3865_v60  ;;  %v4131_v42 = vand.u32 4294901760, %v4130_v0 }
 0x2f2   :  { %8390 = vmatprep.subr.bf16.mxu0 %v14142_v36  ;;  %v11994_v0 = vsub.f32 %v3816_v23, %v3919_v45  ;;  %v12008_v45 = vsub.f32 %v3800_v29, %v3871_v24 }
 0x2f3   :  { %14155 = vst [vmem:[#allocation69_spill] sm:$0xff] %v11945_v13  ;;  %v13281_v36 = vand.u32 4294901760, %v11945_v13  ;;  %14159 = vst [vmem:[#allocation73_spill] sm:$0xff] %v11960_v63 }
 0x2f4   :  { %14162 = vst [vmem:[#allocation75_spill] sm:$0xff] %v11976_v35  ;;  %14165 = vst [vmem:[#allocation61_spill] sm:$0xff] %v11994_v0 }
 0x2f5   :  { %8392 = vmatpush1.bf16.msra.mxu0 %v14006_v9  ;;  %v3796_v9 = vld [vmem:[%s12812_s9 + $0x58] sm:$0xff]  ;;  %v4123_v55 = vsub.f32 %v11945_v13, %v13281_v36  ;;  %14168 = vst [vmem:[#allocation37_spill] sm:$0xff] %v12008_v45 }
 0x2f6   :  { %v3859_v57 = vand.u32 4294901760, %v3796_v9 }
 0x2f7   :  { %v4124_v4 = vand.u32 4294901760, %v4123_v55 }
 0x2f8   :  { %3779 = vmatmul.mubr.f32.vlgmr.msra.gmra.mrb[10].mxu0 %v14113_v5  ;;  %v3856_v5 = vand.u32 4294901760, %v3795_v62  ;;  %v11955_v11 = vsub.f32 %v3796_v9, %v3859_v57  ;;  %v11970_v9 = vsub.f32 %v3797_v16, %v3862_v40  ;;  %v11984_v16 = vsub.f32 %v3815_v53, %v3916_v43 }
 0x2f9   :  { %4763 = vmatprep.mubr.f32.mxu0 %v14143_v28  ;;  %v11986_v40 = vpack.c.bf16 %v4131_v42, %v4124_v4  ;;  %v14185_v28 = vld [vmem:[#allocation81_spill] sm:$0xff] }
 0x2fa   :  { %v11884_v37 = vpack.c.bf16 %v3859_v57, %v3856_v5  ;;  %v11950_v15 = vsub.f32 %v3795_v62, %v3856_v5  ;;  %14158 = vst [vmem:[#allocation72_spill] sm:$0xff] %v11955_v11  ;;  %v13285_v17 = vand.u32 4294901760, %v11955_v11  ;;  %v11968_v62 = vsub.f32 %v3814_v52, %v3913_v48  ;;  %14161 = vst [vmem:[#allocation85_spill] sm:$0xff] %v11970_v9 }
 0x2fb   :  { %v13283_v57 = vand.u32 4294901760, %v11960_v63  ;;  %v13291_v36 = vand.u32 4294901760, %v11970_v9  ;;  %v13290_v48 = vand.u32 4294901760, %v11976_v35  ;;  %14163 = vst [vmem:[#allocation76_spill] sm:$0xff] %v11984_v16  ;;  %14164 = vst [vmem:[#allocation77_spill] sm:$0xff] %v11986_v40  ;;  %v13289_v43 = vand.u32 4294901760, %v11984_v16 }
 0x2fc   :  { %14145 = vst [vmem:[#allocation68_spill] sm:$0xff] %v11884_v37  ;;  %8416 = vmatpush3.bf16.msra.mxu1 %v11884_v37  ;;  %14157 = vst [vmem:[#allocation71_spill] sm:$0xff] %v11950_v15  ;;  %v13292_v30 = vand.u32 4294901760, %v11950_v15  ;;  %v4018_v5 = vsub.f32 %v11955_v11, %v13285_v17  ;;  %v13284_v22 = vand.u32 4294901760, %v11968_v62 }
 0x2fd   :  { %8418 = vmatprep.subr.bf16.mxu1 %v11900_v12  ;;  %14160 = vst [vmem:[#allocation74_spill] sm:$0xff] %v11968_v62  ;;  %v4137_v52 = vsub.f32 %v11960_v63, %v13283_v57  ;;  %v4025_v60 = vsub.f32 %v11970_v9, %v13291_v36  ;;  %v4032_v53 = vsub.f32 %v11976_v35, %v13290_v48  ;;  %v13288_v57 = vand.u32 4294901760, %v11994_v0  ;;  %v14183_v36 = vld [vmem:[#allocation25_spill] sm:$0xff] }
 0x2fe   :  { %v4011_v51 = vsub.f32 %v11950_v15, %v13292_v30  ;;  %v4019_v50 = vand.u32 4294901760, %v4018_v5  ;;  %v4144_v2 = vsub.f32 %v11968_v62, %v13284_v22  ;;  %v12003_v22 = vsub.f32 %v3799_v31, %v3868_v21 }
 0x2ff   :  { %v4138_v5 = vand.u32 4294901760, %v4137_v52  ;;  %v4026_v42 = vand.u32 4294901760, %v4025_v60  ;;  %v4033_v17 = vand.u32 4294901760, %v4032_v53  ;;  %v4151_v23 = vsub.f32 %v11984_v16, %v13289_v43 }
 0x300   :  { %8420 = vmatpush3.bf16.msra.mxu1 %v11912_v25  ;;  %v4012_v55 = vand.u32 4294901760, %v4011_v51  ;;  %v4145_v4 = vand.u32 4294901760, %v4144_v2  ;;  %14167 = vst [vmem:[#allocation34_spill] sm:$0xff] %v12003_v22  ;;  %v13287_v52 = vand.u32 4294901760, %v12003_v22  ;;  %v13286_v31 = vand.u32 4294901760, %v12008_v45 }
 0x301   :  { %8422 = vmatprep.subr.bf16.mxu1 %v11930_v49  ;;  %v12016_v2 = vpack.c.bf16 %v4033_v17, %v4026_v42  ;;  %v4152_v60 = vand.u32 4294901760, %v4151_v23  ;;  %v12029_v17 = vpack.c.bf16 %v11910_v26, %v11905_v39  ;;  %v12035_v23 = vpack.c.bf16 %v11948_v34, %v11945_v13 }
 0x302   :  { %v11996_v51 = vpack.c.bf16 %v4019_v50, %v4012_v55  ;;  %v12010_v50 = vpack.c.bf16 %v4145_v4, %v4138_v5  ;;  %v4158_v55 = vsub.f32 %v11994_v0, %v13288_v57  ;;  %v4039_v53 = vsub.f32 %v12003_v22, %v13287_v52 }
 0x303   :  { %14170 = vst [vmem:[#allocation60_spill] sm:$0xff] %v12016_v2  ;;  %v4046_v29 = vsub.f32 %v12008_v45, %v13286_v31  ;;  %14172 = vst [vmem:[#allocation41_spill] sm:$0xff] %v12029_v17  ;;  %v14181_v31 = vld [vmem:[#allocation24_spill] sm:$0xff]  ;;  %v14184_v30 = vand.u32 4294901760, %v14183_v36  ;;  %v14207_v26 = vand.u32 4294901760, %v11668_v10 }
 0x304   :  { %8424 = vmatpush3.bf16.msra.mxu1 %v11938_v47  ;;  %14166 = vst [vmem:[#allocation35_spill] sm:$0xff] %v11996_v51  ;;  %14169 = vst [vmem:[#allocation36_spill] sm:$0xff] %v12010_v50  ;;  %v4159_v21 = vand.u32 4294901760, %v4158_v55  ;;  %v4040_v5 = vand.u32 4294901760, %v4039_v53  ;;  %v12039_v55 = vpack.c.bf16 %v11955_v11, %v11950_v15  ;;  %v12051_v53 = vpack.c.bf16 %v11994_v0, %v11984_v16 }
 0x305   :  { %8426 = vmatprep.subr.bf16.mxu1 %v11942_v44  ;;  %v4047_v4 = vand.u32 4294901760, %v4046_v29  ;;  %14174 = vst [vmem:[#allocation55_spill] sm:$0xff] %v12035_v23  ;;  %v12055_v29 = vpack.c.bf16 %v12008_v45, %v12003_v22  ;;  %v14182_v52 = vand.u32 4294901760, %v14181_v31  ;;  %v12072_v44 = vsub.f32 %v14183_v36, %v14184_v30 }
 0x306   :  { %v12025_v24 = vpack.c.bf16 %v4159_v21, %v4152_v60  ;;  %14175 = vst [vmem:[#allocation89_spill] sm:$0xff] %v12039_v55  ;;  %v12043_v60 = vpack.c.bf16 %v11968_v62, %v11960_v63  ;;  %v12047_v21 = vpack.c.bf16 %v11976_v35, %v11970_v9  ;;  %14178 = vst [vmem:[#allocation91_spill] sm:$0xff] %v12051_v53  ;;  %v14186_v45 = vand.u32 4294901760, %v14185_v28  ;;  %v14190_v35 = vld [vmem:[#allocation52_spill] sm:$0xff] }
 0x307   :  { %v12031_v42 = vpack.c.bf16 %v4047_v4, %v4040_v5  ;;  %14179 = vst [vmem:[#allocation101_spill] sm:$0xff] %v12055_v29  ;;  %v14180_v5 = vand.u32 4294901760, %v11534_v46  ;;  %v12065_v57 = vsub.f32 %v14181_v31, %v14182_v52  ;;  %v14187_v36 = vand.u32 4294901760, %v11569_v8 }
 0x308   :  { %14171 = vst [vmem:[#allocation42_spill] sm:$0xff] %v12025_v24  ;;  %14176 = vst [vmem:[#allocation11_spill] sm:$0xff] %v12043_v60  ;;  %v12077_v22 = vsub.f32 %v14185_v28, %v14186_v45  ;;  %v14188_v28 = vand.u32 4294901760, %v11574_v61 }
 0x309   :  { %14173 = vst [vmem:[#allocation9_spill] sm:$0xff] %v12031_v42  ;;  %14177 = vst [vmem:[#allocation92_spill] sm:$0xff] %v12047_v21  ;;  %v12060_v4 = vsub.f32 %v11534_v46, %v14180_v5  ;;  %v13301_v48 = vand.u32 4294901760, %v12065_v57  ;;  %v2489_v46 = vld [vmem:[%s12811_s8] sm:$0x3]  ;;  %v12091_v30 = vsub.f32 %v11569_v8, %v14187_v36  ;;  %v14189_v5 = vld [vmem:[#allocation51_spill] sm:$0xff] }
 0x30a   :  { %v12096_v45 = vsub.f32 %v11574_v61, %v14188_v28  ;;  %v2494_v0 = vrot.slane %v2489_v46, %v14189_v5  ;;  %v2498_v9 = vrot.slane %v2489_v46, %v14190_v35  ;;  %v14192_v8 = vand.u32 4294901760, %v11592_v41 }
 0x30b   :  { %v13298_v43 = vand.u32 4294901760, %v12060_v4  ;;  %v3948_v31 = vsub.f32 %v12065_v57, %v13301_v48  ;;  %v14191_v48 = vand.u32 4294901760, %v11579_v58  ;;  %v13306_v5 = vand.u32 4294901760, %v12091_v30 }
 0x30c   :  { %v12110_v36 = vsub.f32 %v11592_v41, %v14192_v8  ;;  %v14194_v35 = vand.u32 4294901760, %v12072_v44 }
 0x30d   :  { %v3941_v52 = vsub.f32 %v12060_v4, %v13298_v43  ;;  %v12105_v62 = vsub.f32 %v11579_v58, %v14191_v48  ;;  %v3949_v63 = vand.u32 4294901760, %v3948_v31  ;;  %v14195_v48 = vand.u32 4294901760, %v12077_v22 }
 0x30e   :  { %v4067_v58 = vsub.f32 %v12072_v44, %v14194_v35  ;;  %v14197_v31 = vand.u32 4294901760, %v11598_v20 }
 0x30f   :  { %v3942_v28 = vand.u32 4294901760, %v3941_v52  ;;  %v4074_v11 = vsub.f32 %v12077_v22, %v14195_v48 }
 0x310   :  { %v12128_v8 = vsub.f32 %v11598_v20, %v14197_v31  ;;  %v14201_v31 = vand.u32 4294901760, %v12096_v45  ;;  %v4068_v52 = vand.u32 4294901760, %v4067_v58 }
 0x311   :  { %v12147_v20 = vpack.c.bf16 %v3949_v63, %v3942_v28  ;;  %v14203_v28 = vand.u32 4294901760, %v12105_v62 }
 0x313   :  { %14200 = vst [vmem:[#allocation103_spill] sm:$0xff] %v12147_v20 }
 0x3cb   :  { %v3780_v61 = vpop.f32.mrb[10].mxu0 }
 0x3cc   :  { %v12114_v43 = vadd.f32 %v3780_v61, %v2494_v0  ;;  %v3782_v46 = vpop.f32.mrb[11].mxu0  ;;  %v14198_v0 = vand.u32 4294901760, %v11603_v19 }
 0x3cd   :  { %v12122_v41 = vadd.f32 %v3782_v46, %v2498_v9  ;;  %v14199_v9 = vand.u32 4294901760, %v11621_v38 }
 0x3ce   :  { %14193 = vst [vmem:[#allocation100_spill] sm:$0xff] %v12114_v43  ;;  %v12133_v61 = vsub.f32 %v11603_v19, %v14198_v0  ;;  %v12136_v35 = vand.u32 4294901760, %v12114_v43  ;;  %v3955_v19 = vsub.f32 %v12091_v30, %v13306_v5  ;;  %v3962_v0 = vsub.f32 %v12096_v45, %v14201_v31 }
 0x3cf   :  { %14196 = vst [vmem:[#allocation104_spill] sm:$0xff] %v12122_v41  ;;  %v12142_v46 = vsub.f32 %v11621_v38, %v14199_v9  ;;  %v12145_v48 = vand.u32 4294901760, %v12122_v41  ;;  %v4075_v38 = vand.u32 4294901760, %v4074_v11  ;;  %v14202_v9 = vand.u32 4294901760, %v11626_v6 }
 0x3d0   :  { %v12157_v16 = vsub.f32 %v12114_v43, %v12136_v35  ;;  %v4081_v5 = vsub.f32 %v12105_v62, %v14203_v28  ;;  %v14204_v11 = vand.u32 4294901760, %v12110_v36  ;;  %v3956_v28 = vand.u32 4294901760, %v3955_v19 }
 0x3d1   :  { %v12162_v15 = vsub.f32 %v11626_v6, %v14202_v9  ;;  %v12166_v63 = vsub.f32 %v12122_v41, %v12145_v48  ;;  %v14205_v9 = vand.u32 4294901760, %v11658_v59  ;;  %v3963_v47 = vand.u32 4294901760, %v3962_v0 }
 0x3d2   :  { %v13314_v58 = vand.u32 4294901760, %v12157_v16  ;;  %v4088_v34 = vsub.f32 %v12110_v36, %v14204_v11  ;;  %v14206_v31 = vand.u32 4294901760, %v11663_v27  ;;  %v12206_v0 = vpack.c.bf16 %v4075_v38, %v4068_v52 }
 0x3d3   :  { %v12181_v41 = vsub.f32 %v11658_v59, %v14205_v9  ;;  %v13320_v13 = vand.u32 4294901760, %v12166_v63  ;;  %v12196_v59 = vsub.f32 %v11668_v10, %v14207_v26  ;;  %v14208_v9 = vand.u32 4294901760, %v11673_v14 }
 0x3d4   :  { %v12187_v43 = vsub.f32 %v11663_v27, %v14206_v31  ;;  %v3930_v11 = vsub.f32 %v12157_v16, %v13314_v58  ;;  %14209 = vst [vmem:[#allocation107_spill] sm:$0xff] %v12206_v0  ;;  %v4082_v31 = vand.u32 4294901760, %v4081_v5  ;;  %v14210_v58 = vand.u32 4294901760, %v12128_v8 }
 0x3d5   :  { %v12201_v19 = vsub.f32 %v11673_v14, %v14208_v9  ;;  %v3924_v27 = vsub.f32 %v12166_v63, %v13320_v13  ;;  %v4089_v39 = vand.u32 4294901760, %v4088_v34  ;;  %v14211_v10 = vand.u32 4294901760, %v12133_v61 }
 0x3d6   :  { %v3969_v6 = vsub.f32 %v12128_v8, %v14210_v58  ;;  %v14212_v49 = vand.u32 4294901760, %v12142_v46  ;;  %v14213_v5 = vand.u32 4294901760, %v11704_v32  ;;  %v14214_v34 = vand.u32 4294901760, %v11709_v7 }
 0x3d7   :  { %v3976_v26 = vsub.f32 %v12133_v61, %v14211_v10  ;;  %v3925_v25 = vand.u32 4294901760, %v3924_v27  ;;  %v3931_v10 = vand.u32 4294901760, %v3930_v11  ;;  %v14215_v13 = vand.u32 4294901760, %v12162_v15 }
 0x3d8   :  { %v4095_v14 = vsub.f32 %v12142_v46, %v14212_v49  ;;  %v12222_v38 = vsub.f32 %v11704_v32, %v14213_v5  ;;  %v12227_v58 = vsub.f32 %v11709_v7, %v14214_v34  ;;  %v13323_v9 = vand.u32 4294901760, %v12196_v59 }
 0x3d9   :  { %v4102_v49 = vsub.f32 %v12162_v15, %v14215_v13  ;;  %v13324_v27 = vand.u32 4294901760, %v12201_v19  ;;  %3926 = vmatprep.mubr.f32.mxu1 %v3925_v25  ;;  %v12234_v52 = vpack.c.bf16 %v3963_v47, %v3956_v28  ;;  %v12236_v32 = vpack.c.bf16 %v4089_v39, %v4082_v31 }
 0x3da   :  { %3932 = vmatmul.mubr.f32.vlgmr.msra.gmra.mrb[16].mxu1 %v3931_v10  ;;  %v3970_v5 = vand.u32 4294901760, %v3969_v6  ;;  %v3977_v12 = vand.u32 4294901760, %v3976_v26  ;;  %v14218_v7 = vand.u32 4294901760, %v12181_v41  ;;  %v14219_v11 = vand.u32 4294901760, %v12187_v43 }
 0x3db   :  { %14216 = vst [vmem:[#allocation106_spill] sm:$0xff] %v12234_v52  ;;  %14217 = vst [vmem:[#allocation110_spill] sm:$0xff] %v12236_v32  ;;  %8428 = vmatpush3.bf16.msra.mxu1 %v12147_v20  ;;  %4162 = vmatprep.mubr.f32.mxu1 %v12145_v48  ;;  %v13325_v25 = vand.u32 4294901760, %v12222_v38  ;;  %v13326_v47 = vand.u32 4294901760, %v12227_v58  ;;  %v4096_v39 = vand.u32 4294901760, %v4095_v14  ;;  %v4103_v6 = vand.u32 4294901760, %v4102_v49 }
 0x3dc   :  { %v3983_v13 = vsub.f32 %v12181_v41, %v14218_v7  ;;  %v3990_v34 = vsub.f32 %v12187_v43, %v14219_v11  ;;  %8430 = vmatprep.subr.bf16.mxu1 %v12206_v0  ;;  %v4109_v28 = vsub.f32 %v12196_v59, %v13323_v9  ;;  %v4116_v31 = vsub.f32 %v12201_v19, %v13324_v27 }
 0x3dd   :  { %v12255_v26 = vpack.c.bf16 %v3977_v12, %v3970_v5  ;;  %v3997_v11 = vsub.f32 %v12222_v38, %v13325_v25  ;;  %v4004_v14 = vsub.f32 %v12227_v58, %v13326_v47  ;;  %v12265_v49 = vpack.c.bf16 %v4103_v6, %v4096_v39  ;;  %v14237_v47 = vld [vmem:[#allocation28_spill] sm:$0xff] }
 0x3de   :  { %v3984_v10 = vand.u32 4294901760, %v3983_v13  ;;  %v3991_v7 = vand.u32 4294901760, %v3990_v34  ;;  %v4110_v9 = vand.u32 4294901760, %v4109_v28  ;;  %v4117_v27 = vand.u32 4294901760, %v4116_v31 }
 0x3df   :  { %14220 = vst [vmem:[#allocation109_spill] sm:$0xff] %v12255_v26  ;;  %8432 = vmatpush3.bf16.msra.mxu1 %v12234_v52  ;;  %14221 = vst [vmem:[#allocation115_spill] sm:$0xff] %v12265_v49  ;;  %v3998_v5 = vand.u32 4294901760, %v3997_v11  ;;  %v4005_v13 = vand.u32 4294901760, %v4004_v14  ;;  %v12298_v39 = vpack.c.bf16 %v12096_v45, %v12091_v30  ;;  %v12303_v6 = vpack.c.bf16 %v12110_v36, %v12105_v62  ;;  %v14234_v14 = vld [vmem:[#allocation26_spill] sm:$0xff] }
 0x3e0   :  { %8434 = vmatprep.subr.bf16.mxu1 %v12236_v32  ;;  %v12268_v12 = vpack.c.bf16 %v3991_v7, %v3984_v10  ;;  %v12271_v34 = vpack.c.bf16 %v4117_v27, %v4110_v9  ;;  %v12286_v9 = vpack.c.bf16 %v12065_v57, %v12060_v4  ;;  %v12291_v27 = vpack.c.bf16 %v12077_v22, %v12072_v44 }
 0x3e1   :  { %v12274_v25 = vpack.c.bf16 %v4005_v13, %v3998_v5  ;;  %14227 = vst [vmem:[#allocation126_spill] sm:$0xff] %v12298_v39  ;;  %14228 = vst [vmem:[#allocation129_spill] sm:$0xff] %v12303_v6  ;;  %v12308_v28 = vpack.c.bf16 %v12133_v61, %v12128_v8  ;;  %v12313_v31 = vpack.c.bf16 %v12162_v15, %v12142_v46  ;;  %v14235_v5 = vld [vmem:[#allocation27_spill] sm:$0xff]  ;;  %v14236_v13 = vand.u32 4294901760, %v12166_v63 }
 0x3e2   :  { %14222 = vst [vmem:[#allocation50_spill] sm:$0xff] %v12268_v12  ;;  %14223 = vst [vmem:[#allocation118_spill] sm:$0xff] %v12271_v34  ;;  %v12318_v10 = vpack.c.bf16 %v12187_v43, %v12181_v41  ;;  %v12323_v7 = vpack.c.bf16 %v12201_v19, %v12196_v59  ;;  %v12328_v11 = vpack.c.bf16 %v12227_v58, %v12222_v38 }
 0x3e3   :  { %8436 = vmatpush3.bf16.msra.mxu1 %v12255_v26  ;;  %14224 = vst [vmem:[#allocation121_spill] sm:$0xff] %v12274_v25  ;;  %14225 = vst [vmem:[#allocation120_spill] sm:$0xff] %v12286_v9 }
 0x3e4   :  { %8438 = vmatprep.subr.bf16.mxu1 %v12265_v49  ;;  %14226 = vst [vmem:[#allocation123_spill] sm:$0xff] %v12291_v27  ;;  %14229 = vst [vmem:[#allocation12_spill] sm:$0xff] %v12308_v28 }
 0x3e5   :  { %14230 = vst [vmem:[#allocation16_spill] sm:$0xff] %v12313_v31  ;;  %14231 = vst [vmem:[#allocation82_spill] sm:$0xff] %v12318_v10 }
 0x3e6   :  { %14232 = vst [vmem:[#allocation84_spill] sm:$0xff] %v12323_v7  ;;  %14233 = vst [vmem:[#allocation86_spill] sm:$0xff] %v12328_v11 }
 0x3e7   :  { %8440 = vmatpush3.bf16.msra.mxu1 %v12268_v12 }
 0x3e8   :  { %8442 = vmatprep.subr.bf16.mxu1 %v12271_v34 }
 0x3eb   :  { %8444 = vmatpush3.bf16.msra.mxu1 %v12274_v25 }
 0x3ec   :  { %8446 = vmatprep.subr.bf16.mxu1 %v11986_v40 }
 0x3ef   :  { %8448 = vmatpush3.bf16.msra.mxu1 %v11996_v51 }
 0x3f0   :  { %8450 = vmatprep.subr.bf16.mxu1 %v12010_v50 }
 0x3f3   :  { %8452 = vmatpush3.bf16.msra.mxu1 %v12016_v2 }
 0x3f4   :  { %8454 = vmatprep.subr.bf16.mxu1 %v12025_v24 }
 0x3f7   :  { %8456 = vmatpush3.bf16.msra.mxu1 %v12031_v42 }
 0x3f8   :  { %8458 = vmatprep.subr.bf16.mxu1 %v12029_v17 }
 0x3fa   :  { %4164 = vmatmul.mubr.f32.vlgmr.msra.gmra.mrb[18].mxu1 %v12136_v35 }
 0x3fb   :  { %8460 = vmatpush3.bf16.msra.mxu1 %v12286_v9  ;;  %4299 = vmatprep.mubr.f32.mxu1 %v12166_v63  ;;  %v14240_v63 = vld [vmem:[#allocation47_spill] sm:$0xff] }
 0x3fc   :  { %8462 = vmatprep.subr.bf16.mxu1 %v12291_v27  ;;  %v14251_v27 = vand.u32 4294901760, %v12077_v22  ;;  %v14256_v22 = vand.u32 4294901760, %v12110_v36  ;;  %v14262_v36 = vand.u32 4294901760, %v12187_v43  ;;  %v14267_v43 = vld [vmem:[#allocation69_spill] sm:$0xff] }
 0x3ff   :  { %8464 = vmatpush3.bf16.msra.mxu1 %v12298_v39  ;;  %v14250_v39 = vand.u32 4294901760, %v12072_v44  ;;  %v14255_v44 = vand.u32 4294901760, %v12105_v62  ;;  %v14261_v62 = vand.u32 4294901760, %v12181_v41  ;;  %v14268_v41 = vand.u32 4294901760, %v14267_v43  ;;  %v14283_v43 = vld [vmem:[#allocation76_spill] sm:$0xff] }
 0x400   :  { %8466 = vmatprep.subr.bf16.mxu1 %v12303_v6 }
 0x401   :  { %v12374_v9 = vpack.c.bf16 %v14251_v27, %v14250_v39  ;;  %v14258_v27 = vand.u32 4294901760, %v12133_v61  ;;  %v14264_v61 = vand.u32 4294901760, %v12201_v19 }
 0x403   :  { %8468 = vmatpush3.bf16.msra.mxu1 %v12308_v28  ;;  %v14249_v28 = vand.u32 4294901760, %v12065_v57  ;;  %v14254_v57 = vand.u32 4294901760, %v12096_v45  ;;  %v14260_v45 = vand.u32 4294901760, %v12162_v15  ;;  %v14265_v15 = vand.u32 4294901760, %v12222_v38  ;;  %v14275_v38 = vld [vmem:[#allocation73_spill] sm:$0xff] }
 0x404   :  { %8470 = vmatprep.subr.bf16.mxu1 %v12313_v31  ;;  %v14248_v31 = vand.u32 4294901760, %v12060_v4  ;;  %v12391_v4 = vpack.c.bf16 %v14256_v22, %v14255_v44  ;;  %v14273_v22 = vld [vmem:[#allocation72_spill] sm:$0xff] }
 0x406   :  { %v12367_v6 = vpack.c.bf16 %v14249_v28, %v14248_v31  ;;  %v12412_v31 = vpack.c.bf16 %v14262_v36, %v14261_v62  ;;  %v14279_v36 = vld [vmem:[#allocation85_spill] sm:$0xff] }
 0x407   :  { %8472 = vmatpush3.bf16.msra.mxu1 %v12318_v10  ;;  %v14247_v10 = vld [vmem:[#allocation63_spill] sm:$0xff] }
 0x408   :  { %8474 = vmatprep.subr.bf16.mxu1 %v12323_v7 }
 0x40b   :  { %8476 = vmatpush3.bf16.msra.mxu1 %v12328_v11 }
 0x40c   :  { %8478 = vmatprep.subr.bf16.mxu1 %v12035_v23  ;;  %v14245_v23 = vld [vmem:[#allocation56_spill] sm:$0xff] }
 0x40d   :  { %v14246_v11 = vand.u32 4294901760, %v14245_v23  ;;  %v14252_v23 = vand.u32 4294901760, %v12157_v16 }
 0x40f   :  { %8480 = vmatpush3.bf16.msra.mxu1 %v12039_v55 }
 0x410   :  { %8482 = vmatprep.subr.bf16.mxu1 %v12043_v60  ;;  %v14243_v60 = vld [vmem:[#allocation54_spill] sm:$0xff] }
 0x411   :  { %v14244_v55 = vand.u32 4294901760, %v14243_v60 }
 0x413   :  { %8484 = vmatpush3.bf16.msra.mxu1 %v12047_v21  ;;  %v14242_v21 = vld [vmem:[#allocation59_spill] sm:$0xff]  ;;  %v12360_v7 = vpack.c.bf16 %v14246_v11, %v14244_v55  ;;  %v14253_v55 = vand.u32 4294901760, %v12091_v30  ;;  %v14259_v30 = vand.u32 4294901760, %v12142_v46  ;;  %v14266_v46 = vand.u32 4294901760, %v12227_v58 }
 0x414   :  { %8486 = vmatprep.subr.bf16.mxu1 %v12051_v53  ;;  %v14238_v53 = vld [vmem:[#allocation31_spill] sm:$0xff]  ;;  %v14276_v58 = vand.u32 4294901760, %v14275_v38 }
 0x415   :  { %v12384_v60 = vpack.c.bf16 %v14254_v57, %v14253_v55  ;;  %v12405_v28 = vpack.c.bf16 %v14260_v45, %v14259_v30  ;;  %v14269_v55 = vld [vmem:[#allocation70_spill] sm:$0xff] }
 0x416   :  { %v14270_v57 = vand.u32 4294901760, %v14269_v55  ;;  %v14277_v30 = vld [vmem:[#allocation74_spill] sm:$0xff]  ;;  %v14285_v55 = vld [vmem:[#allocation61_spill] sm:$0xff] }
 0x417   :  { %8488 = vmatpush3.bf16.msra.mxu1 %v12055_v29  ;;  %v14239_v29 = vld [vmem:[#allocation97_spill] sm:$0xff]  ;;  %v14278_v45 = vand.u32 4294901760, %v14277_v30 }
 0x418   :  { %8490 = vmatprep.subr.bf16.mxu1 %v14234_v14  ;;  %v12433_v44 = vpack.c.bf16 %v14270_v57, %v14268_v41  ;;  %v14284_v41 = vand.u32 4294901760, %v14283_v43  ;;  %v14286_v57 = vand.u32 4294901760, %v14285_v55 }
 0x419   :  { %v12447_v62 = vpack.c.bf16 %v14278_v45, %v14276_v58 }
 0x41a   :  { %4302 = vmatmul.mubr.f32.vlgmr.msra.gmra.mrb[20].mxu1 %v12157_v16  ;;  %v14257_v16 = vand.u32 4294901760, %v12128_v8  ;;  %v14263_v8 = vand.u32 4294901760, %v12196_v59  ;;  %v14271_v59 = vld [vmem:[#allocation71_spill] sm:$0xff] }
 0x41b   :  { %8492 = vmatpush3.bf16.msra.mxu1 %v14235_v5  ;;  %4406 = vmatprep.mubr.f32.mxu1 %v14236_v13  ;;  %v14241_v13 = vld [vmem:[#allocation58_spill] sm:$0xff]  ;;  %v14272_v19 = vand.u32 4294901760, %v14271_v59  ;;  %v12461_v59 = vpack.c.bf16 %v14286_v57, %v14284_v41  ;;  %v3817_v41 = vld [vmem:[%s12813_s10] sm:$0xff] }
 0x41c   :  { %8494 = vmatprep.subr.bf16.mxu1 %v14237_v47  ;;  %v12398_v39 = vpack.c.bf16 %v14258_v27, %v14257_v16  ;;  %v12419_v11 = vpack.c.bf16 %v14264_v61, %v14263_v8  ;;  %v14274_v16 = vand.u32 4294901760, %v14273_v22  ;;  %v14280_v8 = vand.u32 4294901760, %v14279_v36  ;;  %v14281_v61 = vld [vmem:[#allocation75_spill] sm:$0xff] }
 0x41d   :  { %v4693_v55 = vand.u32 4294901760, %v3817_v41 }
 0x41e   :  { %v12440_v27 = vpack.c.bf16 %v14274_v16, %v14272_v19  ;;  %v14287_v19 = vld [vmem:[#allocation34_spill] sm:$0xff]  ;;  %v14289_v16 = vld [vmem:[#allocation37_spill] sm:$0xff] }
 0x41f   :  { %8496 = vmatpush3.bf16.msra.mxu1 %v11642_v54  ;;  %v14288_v22 = vand.u32 4294901760, %v14287_v19  ;;  %v14290_v38 = vand.u32 4294901760, %v14289_v16  ;;  %v12508_v16 = vsub.f32 %v3817_v41, %v4693_v55  ;;  %v3823_v41 = vld [vmem:[%s12813_s10 + $0x30] sm:$0xff] }
 0x420   :  { %8498 = vmatprep.subr.bf16.mxu1 %v11651_v1  ;;  %v4705_v51 = vand.u32 4294901760, %v3823_v41 }
 0x421   :  { %v12468_v58 = vpack.c.bf16 %v14290_v38, %v14288_v22 }
 0x422   :  { %v4818_v52 = vsub.f32 %v3823_v41, %v4705_v51 }
 0x423   :  { %8500 = vmatpush3.bf16.msra.mxu1 %v11688_v56  ;;  %14291 = vst [vmem:[#allocation57_spill] sm:$0xff] %v12468_v58 }
 0x424   :  { %8502 = vmatprep.subr.bf16.mxu1 %v14238_v53 }
 0x427   :  { %8504 = vmatpush3.bf16.msra.mxu1 %v11724_v3 }
 0x428   :  { %8506 = vmatprep.subr.bf16.mxu1 %v11733_v33 }
 0x42b   :  { %8508 = vmatpush3.bf16.msra.mxu1 %v14239_v29 }
 0x42c   :  { %8510 = vmatprep.subr.bf16.mxu1 %v11882_v18 }
 0x42f   :  { %8512 = vmatpush3.bf16.msra.mxu1 %v11884_v37 }
 0x430   :  { %8514 = vmatprep.subr.bf16.mxu1 %v14240_v63 }
 0x433   :  { %8516 = vmatpush3.bf16.msra.mxu1 %v14241_v13 }
 0x434   :  { %8518 = vmatprep.subr.bf16.mxu1 %v14242_v21 }
 0x437   :  { %8520 = vmatpush3.bf16.msra.mxu1 %v14247_v10 }
 0x438   :  { %8522 = vmatprep.subr.bf16.mxu1 %v12360_v7 }
 0x43a   :  { %4410 = vmatmul.mubr.f32.vlgmr.msra.gmra.mrb[22].mxu1 %v14252_v23  ;;  %v12426_v23 = vpack.c.bf16 %v14266_v46, %v14265_v15  ;;  %v14282_v15 = vand.u32 4294901760, %v14281_v61  ;;  %v3820_v61 = vld [vmem:[%s12813_s10 + $0x18] sm:$0xff] }
 0x43b   :  { %8524 = vmatpush3.bf16.msra.mxu1 %v12367_v6  ;;  %4576 = vmatprep.mubr.f32.mxu1 %v12145_v48  ;;  %v4695_v43 = vand.u32 4294901760, %v3820_v61 }
 0x43c   :  { %8526 = vmatprep.subr.bf16.mxu1 %v12374_v9  ;;  %v12454_v46 = vpack.c.bf16 %v14282_v15, %v14280_v8  ;;  %v3818_v8 = vld [vmem:[%s12813_s10 + $0x8] sm:$0xff] }
 0x43d   :  { %v4691_v15 = vand.u32 4294901760, %v3818_v8  ;;  %v12506_v22 = vsub.f32 %v3820_v61, %v4695_v43  ;;  %v3821_v61 = vld [vmem:[%s12813_s10 + $0x20] sm:$0xff] }
 0x43e   :  { %v4701_v50 = vand.u32 4294901760, %v3821_v61 }
 0x43f   :  { %8528 = vmatpush3.bf16.msra.mxu1 %v12384_v60  ;;  %v12504_v19 = vsub.f32 %v3818_v8, %v4691_v15  ;;  %v4789_v42 = vand.u32 4294901760, %v12506_v22 }
 0x440   :  { %8530 = vmatprep.subr.bf16.mxu1 %v12391_v4  ;;  %v4806_v32 = vsub.f32 %v3821_v61, %v4701_v50 }
 0x441   :  { %v4777_v17 = vand.u32 4294901760, %v12504_v19  ;;  %v4790_v25 = vsub.f32 %v12506_v22, %v4789_v42 }
 0x443   :  { %8532 = vmatpush3.bf16.msra.mxu1 %v12398_v39  ;;  %v4778_v40 = vsub.f32 %v12504_v19, %v4777_v17  ;;  %v4791_v20 = vand.u32 4294901760, %v4790_v25 }
 0x444   :  { %8534 = vmatprep.subr.bf16.mxu1 %v12405_v28 }
 0x445   :  { %v4779_v0 = vand.u32 4294901760, %v4778_v40 }
 0x447   :  { %8536 = vmatpush3.bf16.msra.mxu1 %v12412_v31 }
 0x448   :  { %8538 = vmatprep.subr.bf16.mxu1 %v12419_v11 }
 0x44b   :  { %8540 = vmatpush3.bf16.msra.mxu1 %v12426_v23 }
 0x44c   :  { %8542 = vmatprep.subr.bf16.mxu1 %v12433_v44 }
 0x44f   :  { %8544 = vmatpush3.bf16.msra.mxu1 %v12440_v27 }
 0x450   :  { %8546 = vmatprep.subr.bf16.mxu1 %v12447_v62 }
 0x453   :  { %8548 = vmatpush3.bf16.msra.mxu1 %v12454_v46 }
 0x454   :  { %8550 = vmatprep.subr.bf16.mxu1 %v12461_v59 }
 0x457   :  { %8552 = vmatpush3.bf16.msra.mxu1 %v12468_v58 }
 0x458   :  { %8554 = vmatprep.subr.bf16.mxu1 %v14234_v14 }
 0x45a   :  { %4578 = vmatmul.mubr.f32.vlgmr.msra.gmra.mrb[24].mxu1 %v12136_v35 }
 0x45b   :  { %8556 = vmatpush3.bf16.msra.mxu1 %v14235_v5  ;;  %4680 = vmatprep.mubr.f32.mxu1 %v12145_v48  ;;  %v14292_v48 = vmov 0.0  }
 0x45c   :  { %8558 = vmatprep.subr.bf16.mxu1 %v14237_v47 }
 0x45f   :  { %8560 = vmatpush3.bf16.msra.mxu1 %v11642_v54 }
 0x460   :  { %8562 = vmatprep.subr.bf16.mxu1 %v11651_v1 }
 0x463   :  { %8564 = vmatpush3.bf16.msra.mxu1 %v11688_v56 }
 0x464   :  { %8566 = vmatprep.subr.bf16.mxu1 %v14238_v53 }
 0x467   :  { %8568 = vmatpush3.bf16.msra.mxu1 %v11724_v3  ;;  %v12532_v3 = vpack.c.bf16 %v4791_v20, %v4779_v0 }
 0x468   :  { %8570 = vmatprep.subr.bf16.mxu1 %v11733_v33 }
 0x46b   :  { %8572 = vmatpush3.bf16.msra.mxu1 %v14239_v29  ;;  %v4819_v29 = vand.u32 4294901760, %v4818_v52 }
 0x46c   :  { %8574 = vmatprep.subr.bf16.mxu1 %v11882_v18  ;;  %v4807_v18 = vand.u32 4294901760, %v4806_v32 }
 0x46d   :  { %v4820_v61 = vsub.f32 %v4818_v52, %v4819_v29 }
 0x46e   :  { %v4808_v58 = vsub.f32 %v4806_v32, %v4807_v18 }
 0x46f   :  { %8576 = vmatpush3.bf16.msra.mxu1 %v11884_v37 }
 0x470   :  { %8578 = vmatprep.subr.bf16.mxu1 %v14240_v63 }
 0x473   :  { %8580 = vmatpush3.bf16.msra.mxu1 %v14241_v13 }
 0x474   :  { %8582 = vmatprep.subr.bf16.mxu1 %v14242_v21 }
 0x477   :  { %8584 = vmatpush3.bf16.msra.mxu1 %v14247_v10 }
 0x478   :  { %8594 = vmatprep.subr.bf16.mxu1 %v12532_v3 }
 0x47a   :  { %4682 = vmatmul.mubr.f32.vlgmr.msra.gmra.mrb[26].mxu1 %v12136_v35  ;;  %v3819_v35 = vld [vmem:[%s12813_s10 + $0x10] sm:$0xff] }
 0x47b   :  { %4879 = vmatprep.mubr.f32.mxu1 %v14292_v48  ;;  %v4697_v57 = vand.u32 4294901760, %v3819_v35 }
 0x47d   :  { %v12510_v38 = vsub.f32 %v3819_v35, %v4697_v57  ;;  %v4783_v35 = vand.u32 4294901760, %v12508_v16  ;;  %v12550_v0 = vpack.c.bf16 %v4697_v57, %v4693_v55  ;;  %v12576_v55 = vpack.c.bf16 %v4819_v29, %v4807_v18 }
 0x47f   :  { %v4795_v2 = vand.u32 4294901760, %v12510_v38  ;;  %v4784_v49 = vsub.f32 %v12508_v16, %v4783_v35 }
 0x481   :  { %v4796_v26 = vsub.f32 %v12510_v38, %v4795_v2  ;;  %v4785_v63 = vand.u32 4294901760, %v4784_v49  ;;  %v4821_v49 = vand.u32 4294901760, %v4820_v61 }
 0x483   :  { %v4797_v37 = vand.u32 4294901760, %v4796_v26  ;;  %v4809_v26 = vand.u32 4294901760, %v4808_v58  ;;  %v12564_v58 = vpack.c.bf16 %v4705_v51, %v4701_v50 }
 0x485   :  { %v12534_v56 = vpack.c.bf16 %v4797_v37, %v4785_v63  ;;  %v12540_v20 = vpack.c.bf16 %v4821_v49, %v4809_v26  ;;  %v12548_v37 = vpack.c.bf16 %v12506_v22, %v12504_v19 }
 0x487   :  { %8596 = vmatpush1.bf16.msra.mxu1 %v12534_v56 }
 0x4ad   :  { %v7189_v30 = vpop.f32.mrb[16].mxu1 }
 0x4ae   :  { %v7190_v45 = vpop.f32.mrb[17].mxu1 }
 0x4af   :  { %v7191_v36 = vadd.f32 %v7190_v45, %v7189_v30  ;;  %v3822_v30 = vld [vmem:[%s12813_s10 + $0x28] sm:$0xff]  ;;  %v3824_v45 = vld [vmem:[%s12813_s10 + $0x38] sm:$0xff]  ;;  %s8994_s10 = smov [#allocation4]  }
 0x4b0   :  { %v4699_v8 = vand.u32 4294901760, %v3822_v30  ;;  %v4703_v24 = vand.u32 4294901760, %v3824_v45  ;;  %s6709_s24 = sshll.u32 %s8994_s10, 4  ;;  %s6710_s24 = int_to_ptr.vmem [resolvable:$true] %s6709_s24 }
 0x4b1   :  { %s8923_s25 = scalar_lea.vmem %s6710_s24, 32  ;;  %p8928_p1 = scmp.lt.s32.totalorder %s6710_s24, %s6710_s24 }
 0x4b2   :  { %v4800_v34 = vsub.f32 %v3822_v30, %v4699_v8  ;;  %v4812_v12 = vsub.f32 %v3824_v45, %v4703_v24  ;;  %v12556_v63 = vpack.c.bf16 %v4703_v24, %v4699_v8  ;;  %v12570_v24 = vpack.c.bf16 %v4789_v42, %v4777_v17  ;;  %p8924_p0 = scmp.ne.s32.totalorder %s6710_s24, %s8923_s25  ;;  %p8929_p2 = scmp.lt.s32.totalorder %s8923_s25, %s8923_s25 }
 0x4b4   :  { %v4801_v10 = vand.u32 4294901760, %v4800_v34  ;;  %v4813_v21 = vand.u32 4294901760, %v4812_v12  ;;  %p8930_p3 = por %p8929_p2, %p8928_p1 }
 0x4b6   :  { %v4802_v30 = vsub.f32 %v4800_v34, %v4801_v10  ;;  %v4814_v45 = vsub.f32 %v4812_v12, %v4813_v21  ;;  %p8931_p4 = pnand %p8930_p3, %p8924_p0 }
 0x4b8   :  { %v4803_v40 = vand.u32 4294901760, %v4802_v30  ;;  %v4815_v25 = vand.u32 4294901760, %v4814_v45 }
 0x4ba   :  { %v12538_v1 = vpack.c.bf16 %v4815_v25, %v4803_v40 }
 0x4bc   :  { %8598 = vmatprep.subr.bf16.mxu1 %v12538_v1 }
 0x4bd   :  { %8600 = vmatpush1.bf16.msra.mxu1 %v12540_v20 }
 0x4be   :  { %8602 = vmatprep.subr.bf16.mxu1 %v12548_v37 }
 0x4cd   :  { %v7224_v13 = vpop.f32.mrb[18].mxu1 }
 0x4ce   :  { %v7225_v33 = vpop.f32.mrb[19].mxu1 }
 0x4cf   :  { %v7226_v53 = vadd.f32 %v7225_v33, %v7224_v13  ;;  %v12544_v33 = vpack.c.bf16 %v4695_v43, %v4691_v15  ;;  %v12561_v13 = vpack.c.bf16 %v4812_v12, %v4800_v34  ;;  %v12572_v15 = vpack.c.bf16 %v4795_v2, %v4783_v35 }
 0x4d0   :  { %v12574_v43 = vpack.c.bf16 %v4813_v21, %v4801_v10 }
 0x4d1   :  { %v4166_v41 = vadd.f32 %v7226_v53, %v7191_v36  ;;  %v12554_v53 = vpack.c.bf16 %v12510_v38, %v12508_v16  ;;  %8586 = vmatprep.subr.bf16.mxu0 %v12544_v33  ;;  %v12566_v36 = vpack.c.bf16 %v4818_v52, %v4806_v32 }
 0x4d2   :  { %8588 = vmatpush1.bf16.msra.mxu0 %v12550_v0 }
 0x4d3   :  { %8590 = vmatprep.subr.bf16.mxu0 %v12556_v63 }
 0x4d6   :  { %8592 = vmatpush1.bf16.msra.mxu0 %v12564_v58 }
 0x4d7   :  { %8762 = vmatprep.subr.bf16.mxu0 %v12360_v7 }
 0x4ed   :  { %v7259_v12 = vpop.f32.mrb[20].mxu1 }
 0x4ee   :  { %v7260_v34 = vpop.f32.mrb[21].mxu1 }
 0x4ef   :  { %v7261_v57 = vadd.f32 %v7260_v34, %v7259_v12  ;;  %v14307_v12 = vld [vmem:[#allocation100_spill] sm:$0xff] }
 0x4f1   :  { %v4304_v19 = vadd.f32 %v7261_v57, %v4166_v41  ;;  %v14308_v57 = vld [vmem:[#allocation104_spill] sm:$0xff] }
 0x50d   :  { %v7294_v51 = vpop.f32.mrb[22].mxu1 }
 0x50e   :  { %v7295_v50 = vpop.f32.mrb[23].mxu1 }
 0x50f   :  { %v7296_v52 = vadd.f32 %v7295_v50, %v7294_v51 }
 0x511   :  { %v4412_v32 = vadd.f32 %v7296_v52, %v4304_v19 }
 0x52d   :  { %v7329_v22 = vpop.f32.mrb[24].mxu1 }
 0x52e   :  { %v7330_v16 = vpop.f32.mrb[25].mxu1 }
 0x52f   :  { %v7331_v38 = vadd.f32 %v7330_v16, %v7329_v22 }
 0x531   :  { %v4580_v7 = vadd.f32 %v7331_v38, %v4412_v32 }
 0x54d   :  { %v7364_v17 = vpop.f32.mrb[26].mxu1 }
 0x54e   :  { %v7365_v42 = vpop.f32.mrb[27].mxu1 }
 0x54f   :  { %v7366_v2 = vadd.f32 %v7365_v42, %v7364_v17 }
 0x551   :  { %v4684_v8 = vadd.f32 %v7366_v2, %v4580_v7 }
 0x553   :  { %v4687_v21 = vmul.f32 0.125, %v4684_v8 }
 0x555   :  { %v4689_v18 = vsel %vm70_vm0, %v4687_v21, 0  ;;  %v14309_v21 = vld [vmem:[#allocation103_spill] sm:$0xff] }
 0x556   :  { %v4764_v29 = vand.u32 4294901760, %v4689_v18 }
 0x558   :  { %v4765_v10 = vsub.f32 %v4689_v18, %v4764_v29  ;;  %4881 = vmatmul.mubr.f32.vlgmr.msra.gmra.mrb[28].mxu1 %v4764_v29  ;;  %v14310_v18 = vld [vmem:[#allocation107_spill] sm:$0xff] }
 0x559   :  { %8604 = vmatpush1.bf16.msra.mxu1 %v12554_v53  ;;  %4967 = vmatprep.mubr.f32.mxu1 %v14292_v48 }
 0x55a   :  { %8606 = vmatprep.subr.bf16.mxu1 %v12561_v13  ;;  %v4766_v35 = vand.u32 4294901760, %v4765_v10 }
 0x55c   :  { %v4767_v30 = vsub.f32 %v4765_v10, %v4766_v35 }
 0x55d   :  { %8608 = vmatpush1.bf16.msra.mxu1 %v12566_v36 }
 0x55e   :  { %v4768_v45 = vand.u32 4294901760, %v4767_v30  ;;  %8610 = vmatprep.subr.bf16.mxu1 %v12544_v33  ;;  %v14314_v30 = vld [vmem:[#allocation115_spill] sm:$0xff] }
 0x560   :  { %4769 = vmatmul.mubr.f32.vlgmr.msra.gmra.mrb[12].mxu0 %v4768_v45  ;;  %4970 = vmatmul.mubr.f32.vlgmr.msra.gmra.mrb[28].mxu1 %v4765_v10  ;;  %v14312_v10 = vld [vmem:[#allocation110_spill] sm:$0xff] }
 0x561   :  { %8612 = vmatpush1.bf16.msra.mxu1 %v12550_v0  ;;  %5048 = vmatprep.mubr.f32.mxu1 %v14292_v48  ;;  %v14315_v45 = vld [vmem:[#allocation50_spill] sm:$0xff] }
 0x562   :  { %8614 = vmatprep.subr.bf16.mxu1 %v12556_v63  ;;  %8764 = vmatpush3.bf16.msra.mxu0 %v12367_v6  ;;  %v14294_v6 = vld [vmem:[#allocation57_spill] sm:$0xff] }
 0x563   :  { %8766 = vmatprep.subr.bf16.mxu0 %v12374_v9  ;;  %v14293_v9 = vld [vmem:[#allocation29_spill] sm:$0xff] }
 0x565   :  { %8616 = vmatpush1.bf16.msra.mxu1 %v12564_v58 }
 0x566   :  { %8618 = vmatprep.subr.bf16.mxu1 %v12570_v24  ;;  %8768 = vmatpush3.bf16.msra.mxu0 %v12384_v60  ;;  %v14295_v60 = vld [vmem:[#allocation30_spill] sm:$0xff] }
 0x567   :  { %8770 = vmatprep.subr.bf16.mxu0 %v12391_v4  ;;  %v14296_v4 = vld [vmem:[#allocation31_spill] sm:$0xff] }
 0x568   :  { %5052 = vmatmul.mubr.f32.vlgmr.msra.gmra.mrb[28].mxu1 %v4766_v35  ;;  %v14313_v35 = vld [vmem:[#allocation109_spill] sm:$0xff] }
 0x569   :  { %8620 = vmatpush1.bf16.msra.mxu1 %v12572_v15  ;;  %5146 = vmatprep.mubr.f32.mxu1 %v14292_v48 }
 0x56a   :  { %8622 = vmatprep.subr.bf16.mxu1 %v12574_v43  ;;  %8772 = vmatpush3.bf16.msra.mxu0 %v12398_v39  ;;  %v14297_v39 = vld [vmem:[#allocation94_spill] sm:$0xff] }
 0x56b   :  { %8774 = vmatprep.subr.bf16.mxu0 %v12405_v28  ;;  %v14298_v28 = vld [vmem:[#allocation95_spill] sm:$0xff] }
 0x56d   :  { %8624 = vmatpush1.bf16.msra.mxu1 %v12576_v55 }
 0x56e   :  { %8626 = vmatprep.subr.bf16.mxu1 %v12544_v33  ;;  %8776 = vmatpush3.bf16.msra.mxu0 %v12412_v31  ;;  %v14299_v31 = vld [vmem:[#allocation97_spill] sm:$0xff] }
 0x56f   :  { %8778 = vmatprep.subr.bf16.mxu0 %v12419_v11  ;;  %v14300_v11 = vld [vmem:[#allocation98_spill] sm:$0xff] }
 0x570   :  { %5148 = vmatmul.mubr.f32.vlgmr.msra.gmra.mrb[28].mxu1 %v4764_v29 }
 0x571   :  { %8628 = vmatpush1.bf16.msra.mxu1 %v12550_v0  ;;  %5226 = vmatprep.mubr.f32.mxu1 %v14292_v48 }
 0x572   :  { %8630 = vmatprep.subr.bf16.mxu1 %v12556_v63  ;;  %8780 = vmatpush3.bf16.msra.mxu0 %v12426_v23  ;;  %v14301_v23 = vld [vmem:[#allocation68_spill] sm:$0xff] }
 0x573   :  { %8782 = vmatprep.subr.bf16.mxu0 %v12433_v44  ;;  %v14302_v44 = vld [vmem:[#allocation47_spill] sm:$0xff] }
 0x575   :  { %8632 = vmatpush1.bf16.msra.mxu1 %v12564_v58 }
 0x576   :  { %8634 = vmatprep.subr.bf16.mxu1 %v14234_v14  ;;  %8784 = vmatpush3.bf16.msra.mxu0 %v12440_v27  ;;  %v14303_v27 = vld [vmem:[#allocation58_spill] sm:$0xff] }
 0x577   :  { %8786 = vmatprep.subr.bf16.mxu0 %v12447_v62  ;;  %v14304_v62 = vld [vmem:[#allocation59_spill] sm:$0xff] }
 0x578   :  { %5228 = vmatmul.mubr.f32.vlgmr.msra.gmra.mrb[28].mxu1 %v4764_v29  ;;  %v14311_v29 = vld [vmem:[#allocation106_spill] sm:$0xff] }
 0x579   :  { %8636 = vmatpush3.bf16.msra.mxu1 %v14235_v5 }
 0x57a   :  { %8638 = vmatprep.subr.bf16.mxu1 %v14237_v47  ;;  %8788 = vmatpush3.bf16.msra.mxu0 %v12454_v46  ;;  %v14305_v46 = vld [vmem:[#allocation63_spill] sm:$0xff] }
 0x57b   :  { %8790 = vmatprep.subr.bf16.mxu0 %v12461_v59  ;;  %v14306_v59 = vld [vmem:[#allocation66_spill] sm:$0xff] }
 0x57d   :  { %8640 = vmatpush3.bf16.msra.mxu1 %v11642_v54 }
 0x57e   :  { %8642 = vmatprep.subr.bf16.mxu1 %v14293_v9  ;;  %8792 = vmatpush3.bf16.msra.mxu0 %v14294_v6  ;;  %v14316_v6 = vld [vmem:[#allocation118_spill] sm:$0xff] }
 0x57f   :  { %8826 = vmatprep.subr.bf16.mxu0 %v12544_v33 }
 0x581   :  { %8644 = vmatpush3.bf16.msra.mxu1 %v14295_v60 }
 0x582   :  { %8646 = vmatprep.subr.bf16.mxu1 %v14296_v4 }
 0x585   :  { %8648 = vmatpush3.bf16.msra.mxu1 %v14297_v39 }
 0x586   :  { %8650 = vmatprep.subr.bf16.mxu1 %v14298_v28 }
 0x589   :  { %8652 = vmatpush3.bf16.msra.mxu1 %v14299_v31 }
 0x58a   :  { %8654 = vmatprep.subr.bf16.mxu1 %v14300_v11 }
 0x58d   :  { %8656 = vmatpush3.bf16.msra.mxu1 %v14301_v23 }
 0x58e   :  { %8658 = vmatprep.subr.bf16.mxu1 %v14302_v44 }
 0x591   :  { %8660 = vmatpush3.bf16.msra.mxu1 %v14303_v27 }
 0x592   :  { %8662 = vmatprep.subr.bf16.mxu1 %v14304_v62 }
 0x595   :  { %8664 = vmatpush3.bf16.msra.mxu1 %v14305_v46 }
 0x596   :  { %8666 = vmatprep.subr.bf16.mxu1 %v14306_v59  ;;  %v14318_v59 = vld [vmem:[#allocation77_spill] sm:$0xff] }
 0x633   :  { %v4770_v61 = vpop.f32.mrb[12].mxu0 }
 0x634   :  { %v4772_v40 = vpop.f32.mrb[13].mxu0 }
 0x64b   :  { %v5229_v25 = vpop.f32.mrb[28].mxu1 }
 0x64c   :  { %v8877_v41 = vadd.f32 %v5229_v25, %v4770_v61  ;;  %v5231_v26 = vpop.f32.mrb[29].mxu1  ;;  %v14319_v61 = vld [vmem:[#allocation35_spill] sm:$0xff]  ;;  %v14321_v25 = vld [vmem:[#allocation60_spill] sm:$0xff] }
 0x64d   :  { %v8878_v49 = vadd.f32 %v5231_v26, %v4772_v40  ;;  %v14320_v40 = vld [vmem:[#allocation36_spill] sm:$0xff]  ;;  %v14323_v26 = vld [vmem:[#allocation9_spill] sm:$0xff] }
 0x64e   :  { %v12632_v34 = vsub.f32 %v14307_v12, %v8877_v41  ;;  %v14322_v41 = vld [vmem:[#allocation42_spill] sm:$0xff]  ;;  %v14325_v12 = vld [vmem:[#allocation120_spill] sm:$0xff] }
 0x64f   :  { %v12635_v19 = vsub.f32 %v14308_v57, %v8878_v49  ;;  %v14324_v49 = vld [vmem:[#allocation41_spill] sm:$0xff]  ;;  %v14326_v57 = vld [vmem:[#allocation123_spill] sm:$0xff] }
 0x650   :  { %v5236_v51 = vmul.f32 %v12632_v34, %v12632_v34 }
 0x651   :  { %v5237_v50 = vmul.f32 %v12635_v19, %v12635_v19 }
 0x652   :  { %v12641_v52 = vand.u32 4294901760, %v5236_v51 }
 0x653   :  { %v12643_v32 = vand.u32 4294901760, %v5237_v50 }
 0x654   :  { %v12646_v22 = vsub.f32 %v5236_v51, %v12641_v52  ;;  %v14327_v51 = vld [vmem:[#allocation126_spill] sm:$0xff] }
 0x655   :  { %v5335_v16 = vsub.f32 %v5237_v50, %v12643_v32  ;;  %5989 = vmatprep.mubr.f32.mxu0 %v12643_v32  ;;  %v14328_v50 = vld [vmem:[#allocation129_spill] sm:$0xff] }
 0x656   :  { %5991 = vmatmul.mubr.f32.vlgmr.msra.gmra.mrb[14].mxu0 %v12641_v52  ;;  %v5342_v38 = vand.u32 4294901760, %v12646_v22 }
 0x657   :  { %v5336_v7 = vand.u32 4294901760, %v5335_v16  ;;  %8828 = vmatpush1.bf16.msra.mxu0 %v12550_v0  ;;  %6178 = vmatprep.mubr.f32.mxu0 %v14292_v48 }
 0x658   :  { %v5343_v17 = vsub.f32 %v12646_v22, %v5342_v38  ;;  %8830 = vmatprep.subr.bf16.mxu0 %v12556_v63 }
 0x659   :  { %v5337_v42 = vsub.f32 %v5335_v16, %v5336_v7 }
 0x65a   :  { %v5344_v8 = vand.u32 4294901760, %v5343_v17  ;;  %v14329_v17 = vld [vmem:[#allocation12_spill] sm:$0xff] }
 0x65b   :  { %v5338_v2 = vand.u32 4294901760, %v5337_v42  ;;  %8832 = vmatpush1.bf16.msra.mxu0 %v12564_v58  ;;  %v14330_v42 = vld [vmem:[#allocation16_spill] sm:$0xff] }
 0x65c   :  { %8834 = vmatprep.subr.bf16.mxu0 %v12532_v3  ;;  %v14317_v3 = vld [vmem:[#allocation121_spill] sm:$0xff] }
 0x65d   :  { %5339 = vmatprep.mubr.f32.mxu1 %v5338_v2  ;;  %v14331_v2 = vld [vmem:[#allocation82_spill] sm:$0xff] }
 0x65e   :  { %5345 = vmatmul.mubr.f32.vlgmr.msra.gmra.mrb[30].mxu1 %v5344_v8  ;;  %v14332_v8 = vld [vmem:[#allocation84_spill] sm:$0xff] }
 0x65f   :  { %8668 = vmatpush3.bf16.msra.mxu1 %v14309_v21  ;;  %5575 = vmatprep.mubr.f32.mxu1 %v12643_v32  ;;  %v14333_v21 = vld [vmem:[#allocation86_spill] sm:$0xff] }
 0x660   :  { %8670 = vmatprep.subr.bf16.mxu1 %v14310_v18  ;;  %v14334_v18 = vld [vmem:[#allocation55_spill] sm:$0xff] }
 0x663   :  { %8672 = vmatpush3.bf16.msra.mxu1 %v14311_v29  ;;  %v14335_v29 = vld [vmem:[#allocation89_spill] sm:$0xff] }
 0x664   :  { %8674 = vmatprep.subr.bf16.mxu1 %v14312_v10  ;;  %v14337_v10 = vld [vmem:[#allocation92_spill] sm:$0xff] }
 0x667   :  { %8676 = vmatpush3.bf16.msra.mxu1 %v14313_v35  ;;  %v14338_v35 = vld [vmem:[#allocation91_spill] sm:$0xff] }
 0x668   :  { %8678 = vmatprep.subr.bf16.mxu1 %v14314_v30  ;;  %v14339_v30 = vld [vmem:[#allocation101_spill] sm:$0xff] }
 0x66b   :  { %8680 = vmatpush3.bf16.msra.mxu1 %v14315_v45 }
 0x66c   :  { %8682 = vmatprep.subr.bf16.mxu1 %v14316_v6 }
 0x66f   :  { %8684 = vmatpush3.bf16.msra.mxu1 %v14317_v3 }
 0x670   :  { %8686 = vmatprep.subr.bf16.mxu1 %v14318_v59 }
 0x673   :  { %8688 = vmatpush3.bf16.msra.mxu1 %v14319_v61 }
 0x674   :  { %8690 = vmatprep.subr.bf16.mxu1 %v14320_v40 }
 0x677   :  { %8692 = vmatpush3.bf16.msra.mxu1 %v14321_v25 }
 0x678   :  { %8694 = vmatprep.subr.bf16.mxu1 %v14322_v41 }
 0x67b   :  { %8696 = vmatpush3.bf16.msra.mxu1 %v14323_v26 }
 0x67c   :  { %8698 = vmatprep.subr.bf16.mxu1 %v14324_v49 }
 0x67e   :  { %5577 = vmatmul.mubr.f32.vlgmr.msra.gmra.mrb[32].mxu1 %v12641_v52 }
 0x67f   :  { %8700 = vmatpush3.bf16.msra.mxu1 %v14325_v12  ;;  %5712 = vmatprep.mubr.f32.mxu1 %v5335_v16  ;;  %v14336_v16 = vld [vmem:[#allocation11_spill] sm:$0xff] }
 0x680   :  { %8702 = vmatprep.subr.bf16.mxu1 %v14326_v57 }
 0x683   :  { %8704 = vmatpush3.bf16.msra.mxu1 %v14327_v51 }
 0x684   :  { %8706 = vmatprep.subr.bf16.mxu1 %v14328_v50 }
 0x687   :  { %8708 = vmatpush3.bf16.msra.mxu1 %v14329_v17 }
 0x688   :  { %8710 = vmatprep.subr.bf16.mxu1 %v14330_v42 }
 0x68b   :  { %8712 = vmatpush3.bf16.msra.mxu1 %v14331_v2 }
 0x68c   :  { %8714 = vmatprep.subr.bf16.mxu1 %v14332_v8 }
 0x68f   :  { %8716 = vmatpush3.bf16.msra.mxu1 %v14333_v21 }
 0x690   :  { %8718 = vmatprep.subr.bf16.mxu1 %v14334_v18 }
 0x693   :  { %8720 = vmatpush3.bf16.msra.mxu1 %v14335_v29 }
 0x694   :  { %8722 = vmatprep.subr.bf16.mxu1 %v14336_v16 }
 0x697   :  { %8724 = vmatpush3.bf16.msra.mxu1 %v14337_v10 }
 0x698   :  { %8726 = vmatprep.subr.bf16.mxu1 %v14338_v35 }
 0x69b   :  { %8728 = vmatpush3.bf16.msra.mxu1 %v14339_v30 }
 0x69c   :  { %8730 = vmatprep.subr.bf16.mxu1 %v14234_v14 }
 0x69e   :  { %5715 = vmatmul.mubr.f32.vlgmr.msra.gmra.mrb[34].mxu1 %v12646_v22 }
 0x69f   :  { %8732 = vmatpush3.bf16.msra.mxu1 %v14235_v5  ;;  %5819 = vmatprep.mubr.f32.mxu1 %v5336_v7 }
 0x6a0   :  { %8734 = vmatprep.subr.bf16.mxu1 %v14237_v47 }
 0x6a3   :  { %8736 = vmatpush3.bf16.msra.mxu1 %v11642_v54 }
 0x6a4   :  { %8738 = vmatprep.subr.bf16.mxu1 %v14293_v9 }
 0x6a7   :  { %8740 = vmatpush3.bf16.msra.mxu1 %v14295_v60 }
 0x6a8   :  { %8742 = vmatprep.subr.bf16.mxu1 %v14296_v4 }
 0x6ab   :  { %8744 = vmatpush3.bf16.msra.mxu1 %v14297_v39 }
 0x6ac   :  { %8746 = vmatprep.subr.bf16.mxu1 %v14298_v28 }
 0x6af   :  { %8748 = vmatpush3.bf16.msra.mxu1 %v14299_v31 }
 0x6b0   :  { %8750 = vmatprep.subr.bf16.mxu1 %v14300_v11 }
 0x6b3   :  { %8752 = vmatpush3.bf16.msra.mxu1 %v14301_v23 }
 0x6b4   :  { %8754 = vmatprep.subr.bf16.mxu1 %v14302_v44 }
 0x6b7   :  { %8756 = vmatpush3.bf16.msra.mxu1 %v14303_v27 }
 0x6b8   :  { %8758 = vmatprep.subr.bf16.mxu1 %v14304_v62 }
 0x6bb   :  { %8760 = vmatpush3.bf16.msra.mxu1 %v14305_v46 }
 0x6bc   :  { %8794 = vmatprep.subr.bf16.mxu1 %v14234_v14 }
 0x6be   :  { %5823 = vmatmul.mubr.f32.vlgmr.msra.gmra.mrb[36].mxu1 %v5342_v38 }
 0x6bf   :  { %8796 = vmatpush3.bf16.msra.mxu1 %v14235_v5  ;;  %6093 = vmatprep.mubr.f32.mxu1 %v12643_v32 }
 0x6c0   :  { %8798 = vmatprep.subr.bf16.mxu1 %v14237_v47 }
 0x6c3   :  { %8800 = vmatpush3.bf16.msra.mxu1 %v11642_v54 }
 0x6c4   :  { %8802 = vmatprep.subr.bf16.mxu1 %v14293_v9 }
 0x6c7   :  { %8804 = vmatpush3.bf16.msra.mxu1 %v14295_v60 }
 0x6c8   :  { %8806 = vmatprep.subr.bf16.mxu1 %v14296_v4 }
 0x6cb   :  { %8808 = vmatpush3.bf16.msra.mxu1 %v14297_v39 }
 0x6cc   :  { %8810 = vmatprep.subr.bf16.mxu1 %v14298_v28 }
 0x6cf   :  { %8812 = vmatpush3.bf16.msra.mxu1 %v14299_v31 }
 0x6d0   :  { %8814 = vmatprep.subr.bf16.mxu1 %v14300_v11 }
 0x6d3   :  { %8816 = vmatpush3.bf16.msra.mxu1 %v14301_v23 }
 0x6d4   :  { %8818 = vmatprep.subr.bf16.mxu1 %v14302_v44 }
 0x6d7   :  { %8820 = vmatpush3.bf16.msra.mxu1 %v14303_v27 }
 0x6d8   :  { %8822 = vmatprep.subr.bf16.mxu1 %v14304_v62 }
 0x6db   :  { %8824 = vmatpush3.bf16.msra.mxu1 %v14305_v46 }
 0x6de   :  { %6095 = vmatmul.mubr.f32.vlgmr.msra.gmra.mrb[38].mxu1 %v12641_v52 }
 0x729   :  { %v7539_v54 = vpop.f32.mrb[14].mxu0 }
 0x72a   :  { %v7540_v47 = vpop.f32.mrb[15].mxu0 }
 0x72b   :  { %v7541_v14 = vadd.f32 %v7540_v47, %v7539_v54 }
 0x731   :  { %v7399_v5 = vpop.f32.mrb[30].mxu1 }
 0x732   :  { %v7400_v9 = vpop.f32.mrb[31].mxu1 }
 0x733   :  { %v7401_v60 = vadd.f32 %v7400_v9, %v7399_v5 }
 0x751   :  { %v7434_v4 = vpop.f32.mrb[32].mxu1 }
 0x752   :  { %v7435_v39 = vpop.f32.mrb[33].mxu1 }
 0x753   :  { %v7436_v28 = vadd.f32 %v7435_v39, %v7434_v4 }
 0x755   :  { %v5579_v31 = vadd.f32 %v7436_v28, %v7401_v60 }
 0x771   :  { %v7469_v11 = vpop.f32.mrb[34].mxu1 }
 0x772   :  { %v7470_v23 = vpop.f32.mrb[35].mxu1 }
 0x773   :  { %v7471_v44 = vadd.f32 %v7470_v23, %v7469_v11 }
 0x775   :  { %v5717_v27 = vadd.f32 %v7471_v44, %v5579_v31 }
 0x791   :  { %v7504_v32 = vpop.f32.mrb[36].mxu1 }
 0x792   :  { %v7505_v62 = vpop.f32.mrb[37].mxu1 }
 0x793   :  { %v7506_v22 = vadd.f32 %v7505_v62, %v7504_v32 }
 0x795   :  { %v5825_v46 = vadd.f32 %v7506_v22, %v5717_v27 }
 0x797   :  { %v5993_v38 = vadd.f32 %v7541_v14, %v5825_v46 }
 0x7b1   :  { %v7574_v52 = vpop.f32.mrb[38].mxu1 }
 0x7b2   :  { %v7575_v7 = vpop.f32.mrb[39].mxu1 }
 0x7b3   :  { %v7576_v45 = vadd.f32 %v7575_v7, %v7574_v52 }
 0x7b5   :  { %v6097_v6 = vadd.f32 %v7576_v45, %v5993_v38 }
 0x7b7   :  { %v6100_v3 = vmul.f32 0.125, %v6097_v6 }
 0x7b9   :  { %v6101_v59 = vadd.f32 1e-05, %v6100_v3 }
 0x7bb   :  { %8921 = vrsqrt.f32 %v6101_v59 }
 0x7c5   :  { %v8922_v61 = vpop.eup %8921 }
 0x7c6   :  { %v6104_v40 = vsel %vm70_vm0, %v8922_v61, 0 }
 0x7c7   :  { %v6179_v25 = vand.u32 4294901760, %v6104_v40 }
 0x7c9   :  { %v6180_v41 = vsub.f32 %v6104_v40, %v6179_v25 }
 0x7cb   :  { %v6181_v26 = vand.u32 4294901760, %v6180_v41 }
 0x7cd   :  { %v6182_v49 = vsub.f32 %v6180_v41, %v6181_v26 }
 0x7cf   :  { %v6183_v12 = vand.u32 4294901760, %v6182_v49 }
 0x7d1   :  { %6184 = vmatmul.mubr.f32.vlgmr.msra.gmra.mrb[16].mxu0 %v6183_v12 }
 0x7d2   :  { %8836 = vmatpush1.bf16.msra.mxu0 %v12534_v56  ;;  %6294 = vmatprep.mubr.f32.mxu0 %v14292_v48 }
 0x7d3   :  { %8838 = vmatprep.subr.bf16.mxu0 %v12538_v1 }
 0x7d6   :  { %8840 = vmatpush1.bf16.msra.mxu0 %v12540_v20 }
 0x7d7   :  { %8842 = vmatprep.subr.bf16.mxu0 %v12548_v37 }
 0x7d9   :  { %6296 = vmatmul.mubr.f32.vlgmr.msra.gmra.mrb[16].mxu0 %v6179_v25 }
 0x7da   :  { %8844 = vmatpush1.bf16.msra.mxu0 %v12554_v53  ;;  %6382 = vmatprep.mubr.f32.mxu0 %v14292_v48 }
 0x7db   :  { %8846 = vmatprep.subr.bf16.mxu0 %v12561_v13 }
 0x7de   :  { %8848 = vmatpush1.bf16.msra.mxu0 %v12566_v36 }
 0x7df   :  { %8850 = vmatprep.subr.bf16.mxu0 %v12544_v33 }
 0x7e1   :  { %6385 = vmatmul.mubr.f32.vlgmr.msra.gmra.mrb[16].mxu0 %v6180_v41 }
 0x7e2   :  { %8852 = vmatpush1.bf16.msra.mxu0 %v12550_v0  ;;  %6463 = vmatprep.mubr.f32.mxu0 %v14292_v48 }
 0x7e3   :  { %8854 = vmatprep.subr.bf16.mxu0 %v12556_v63 }
 0x7e6   :  { %8856 = vmatpush1.bf16.msra.mxu0 %v12564_v58 }
 0x7e7   :  { %8858 = vmatprep.subr.bf16.mxu0 %v12570_v24 }
 0x7e9   :  { %6467 = vmatmul.mubr.f32.vlgmr.msra.gmra.mrb[16].mxu0 %v6181_v26 }
 0x7ea   :  { %8860 = vmatpush1.bf16.msra.mxu0 %v12572_v15  ;;  %6561 = vmatprep.mubr.f32.mxu0 %v14292_v48 }
 0x7eb   :  { %8862 = vmatprep.subr.bf16.mxu0 %v12574_v43 }
 0x7ee   :  { %8864 = vmatpush1.bf16.msra.mxu0 %v12576_v55 }
 0x7ef   :  { %8866 = vmatprep.subr.bf16.mxu0 %v12544_v33 }
 0x7f1   :  { %6563 = vmatmul.mubr.f32.vlgmr.msra.gmra.mrb[16].mxu0 %v6179_v25 }
 0x7f2   :  { %8868 = vmatpush1.bf16.msra.mxu0 %v12550_v0  ;;  %6641 = vmatprep.mubr.f32.mxu0 %v14292_v48 }
 0x7f3   :  { %8870 = vmatprep.subr.bf16.mxu0 %v12556_v63 }
 0x7f6   :  { %8872 = vmatpush1.bf16.msra.mxu0 %v12564_v58 }
 0x7f9   :  { %6643 = vmatmul.mubr.f32.vlgmr.msra.gmra.mrb[16].mxu0 %v6179_v25 }
 0x7fa   :  { %8934 = shalt.err (!%p8931_p4)
}
 0x7fb   :  { %s8935_s27 = scalar_lea.hbm %s12817_s14, 32 }
 0x7fc   :  { %p8936_p5 = scmp.ne.s32.totalorder %s12817_s14, %s8935_s27  ;;  %p8939_p6 = scmp.lt.u32.totalorder %s8935_s27, %s12817_s14 }
 0x7fe   :  { %p8941_p7 = pnand %p8939_p6, %p8936_p5 }
 0x800   :  { %8944 = shalt.err (!%p8941_p7)
}
 0x801   :  { %6712 = dma.vmem_to_hbm [thread:$0]  %s6710_s24, 32, %s12817_s14, [#allocation5]  }
 0x802   :  { %s8995_s4 = smov [#allocation6]  }
 0x803   :  { %s6719_s30 = sshll.u32 %s8995_s4, 4  ;;  %s6720_s30 = int_to_ptr.vmem [resolvable:$true] %s6719_s30 }
 0x804   :  { %s8945_s16 = scalar_lea.vmem %s6720_s30, 32  ;;  %p8950_p9 = scmp.lt.s32.totalorder %s6720_s30, %s6720_s30 }
 0x805   :  { %p8946_p8 = scmp.ne.s32.totalorder %s6720_s30, %s8945_s16  ;;  %p8951_p10 = scmp.lt.s32.totalorder %s8945_s16, %s8945_s16 }
 0x807   :  { %p8952_p11 = por %p8951_p10, %p8950_p9 }
 0x809   :  { %p8953_p12 = pnand %p8952_p11, %p8946_p8 }
 0x80b   :  { %8956 = shalt.err (!%p8953_p12)
}
 0x80c   :  { %s8957_s18 = scalar_lea.hbm %s12818_s15, 32 }
 0x80d   :  { %p8958_p13 = scmp.ne.s32.totalorder %s12818_s15, %s8957_s18  ;;  %p8961_p0 = scmp.lt.u32.totalorder %s8957_s18, %s12818_s15 }
 0x80f   :  { %p8963_p1 = pnand %p8961_p0, %p8958_p13 }
 0x811   :  { %8966 = shalt.err (!%p8963_p1)
}
 0x812   :  { %6722 = dma.vmem_to_hbm [thread:$0]  %s6720_s30, 32, %s12818_s15, [#allocation5]   ;;  %v6651_v56 = vld [vmem:[%s12814_s11] sm:$0x3]  ;;  %v14340_v48 = vld [vmem:[#allocation51_spill] sm:$0xff] }
 0x813   :  { %v6665_v1 = vld [vmem:[%s12815_s12] sm:$0x3]  ;;  %v6656_v20 = vrot.slane %v6651_v56, %v14340_v48  ;;  %s8996_s11 = smov [#allocation2]  }
 0x814   :  { %v14341_v37 = vld [vmem:[#allocation52_spill] sm:$0xff]  ;;  %v6670_v13 = vrot.slane %v6665_v1, %v14340_v48  ;;  %s6699_s12 = sshll.u32 %s8996_s11, 4  ;;  %s6700_s12 = int_to_ptr.vmem [resolvable:$true] %s6699_s12 }
 0x815   :  { %v6660_v0 = vrot.slane %v6651_v56, %v14341_v37  ;;  %v6674_v36 = vrot.slane %v6665_v1, %v14341_v37  ;;  %s8967_s15 = scalar_lea.vmem %s6700_s12, 64  ;;  %p8972_p3 = scmp.lt.s32.totalorder %s6700_s12, %s6700_s12 }
 0x816   :  { %p8968_p2 = scmp.ne.s32.totalorder %s6700_s12, %s8967_s15  ;;  %p8973_p4 = scmp.lt.s32.totalorder %s8967_s15, %s8967_s15 }
 0x818   :  { %p8974_p5 = por %p8973_p4, %p8972_p3 }
 0x81a   :  { %p8975_p6 = pnand %p8974_p5, %p8968_p2 }
 0x8cc   :  { %v6644_v33 = vpop.f32.mrb[16].mxu0 }
 0x8cd   :  { %v6649_v53 = vmul.f32 %v6644_v33, %v12632_v34  ;;  %v6646_v63 = vpop.f32.mrb[17].mxu0 }
 0x8ce   :  { %v6650_v58 = vmul.f32 %v6646_v63, %v12635_v19 }
 0x8cf   :  { %v6663_v24 = vmul.f32 %v6656_v20, %v6649_v53 }
 0x8d0   :  { %v6664_v15 = vmul.f32 %v6660_v0, %v6650_v58 }
 0x8d1   :  { %v6677_v43 = vadd.f32 %v6670_v13, %v6663_v24 }
 0x8d2   :  { %v6678_v55 = vadd.f32 %v6674_v36, %v6664_v15 }
 0x8d3   :  { %v6679_v57 = vmax.f32 %v6677_v43, 0.0 }
 0x8d4   :  { %v6680_v51 = vmax.f32 %v6678_v55, 0.0 }
 0x8d6   :  { %v6683_v50 = vcombine.low %v6679_v57, %v6680_v51 }
 0x8d8   :  { %6736 = vst.sshfl [vmem:[#allocation2] sm:$0x33 pattern:$0x76325410] %v6683_v50 }
 0x8d9   :  { %8978 = shalt.err (!%p8975_p6)
}
 0x8da   :  { %s8979_s2 = scalar_lea.hbm %s12816_s13, 64 }
 0x8db   :  { %p8980_p7 = scmp.ne.s32.totalorder %s12816_s13, %s8979_s2  ;;  %p8983_p8 = scmp.lt.u32.totalorder %s8979_s2, %s12816_s13 }
 0x8dd   :  { %p8985_p9 = pnand %p8983_p8, %p8980_p7 }
 0x8df   :  { %8988 = shalt.err (!%p8985_p9)
}
 0x8e0   :  { %6702 = dma.vmem_to_hbm [thread:$0]  %s6700_s12, 64, %s12816_s13, [#allocation3]  }
 0x8e1   :  { %8989 = dma.done.wait [#allocation3], 64  }
 0x8e2   :  { %8990 = vsyncadd [#allocation3], 4294967232 }
 0x8e3   :  { %8991 = dma.done.wait [#allocation5], 64  }
 0x8e4   :  { %8992 = vsyncadd [#allocation5], 4294967232 }
 0x8e5   :  { %6732 = vsyncpa [#allocation3], 1 }
 0x8e6   :  { %6733 = vsyncpa [#allocation5], 1 }

</bundles_post_ra>
